<compile_context>
chip_gen: v7x
topology: tpu7x:2x2x1
jax: 0.10.0
libtpu: 0.0.40
codegen_flags: <defaults>
</compile_context>

<pallas_src>
import math

import jax
import jax.numpy as jnp
from jax.experimental import pallas as pl
from jax.experimental.pallas import tpu as pltpu

HIDDEN = 10           # logical hidden size of the PyTorch module
HIDDEN_PAD = 128      # lane-dense padded hidden size
LANE = 128
ROW_UNIT = 1024       # TB granule: out block (TB//128, 128) keeps sublanes % 8 == 0


def _round_up(x, m):
    return ((x + m - 1) // m) * m


def mlp_kernel(x_ref, w1_ref, b1_ref, w2row_ref, b2_ref, o_ref):
    # Layer 1 on the MXU: (TB, n_in) @ (n_in, 128) + (1, 128), then ReLU.
    h = jnp.dot(x_ref[...], w1_ref[...], preferred_element_type=jnp.float32)
    h = jnp.maximum(h + b1_ref[...], 0.0)
    # Layer 2 on VPU/XLU: broadcast-multiply by the (1, 128) w2 row and reduce
    # over lanes (cheaper than an N=1 MXU matmul) -> (TB, 1).
    z = jnp.sum(h * w2row_ref[...], axis=-1, keepdims=True)
    # Lane-dense epilogue: relayout batch rows onto lanes -> (TB//128, 128),
    # add the SMEM scalar bias.
    z = z.reshape(o_ref.shape) + b2_ref[0]
    # Exact, numerically stable sigmoid: one EUP transcendental (tanh).
    o_ref[...] = 0.5 * jnp.tanh(0.5 * z) + 0.5


def _pick_tb(batch, n_in, target_tile_bytes, vmem_budget_bytes):
    """Rows per grid step: byte-sized x tile, 1024-row granule, VMEM-capped."""
    bpr = _round_up(n_in, LANE) * 4                     # x-tile bytes/row in VMEM (lane padded)
    tb = max(ROW_UNIT, (target_tile_bytes // bpr) // ROW_UNIT * ROW_UNIT)

    def vmem_usage(t):  # 2 double-buffered x tiles + h temp + 2 out buffers
        return 2 * t * bpr + t * HIDDEN_PAD * 4 + 2 * t * 4

    while tb > ROW_UNIT and vmem_usage(tb) > vmem_budget_bytes:
        tb -= ROW_UNIT
    # Keep >= 2 grid steps when the batch allows it (v7x: use both TensorCores).
    if batch >= 2 * ROW_UNIT:
        tb = min(tb, max(ROW_UNIT, (batch // (2 * ROW_UNIT)) * ROW_UNIT))
    # Small batches: a single grid step sized to the (128-padded) batch.
    if batch <= tb:
        tb = _round_up(batch, LANE)
    return tb


def prepare_params(w1, b1, w2, b2):
    """One-time zero-padding of the hidden dim 10 -> 128 (results unchanged:
    ReLU(0 + 0) = 0 and zero w2 lanes contribute nothing)."""
    w1p = jnp.pad(w1.astype(jnp.float32), ((0, 0), (0, HIDDEN_PAD - HIDDEN)))        # (n_in, 128)
    b1p = jnp.pad(b1.astype(jnp.float32).reshape(1, HIDDEN),
                  ((0, 0), (0, HIDDEN_PAD - HIDDEN)))                                 # (1, 128)
    w2row = jnp.pad(w2.astype(jnp.float32), ((0, HIDDEN_PAD - HIDDEN), (0, 0))).T     # (1, 128)
    b2s = b2.astype(jnp.float32).reshape(1)                                           # (1,) SMEM scalar
    return w1p, b1p, w2row, b2s


def mlp_forward(x, w1p, b1p, w2row, b2s, *, target_tile_bytes=2 << 20):
    """y = sigmoid(relu(x @ W1 + b1) @ W2 + b2);  x: (B, n_in) f32 -> (B, 1) f32."""
    B, n_in = x.shape
    TB = _pick_tb(B, n_in, target_tile_bytes, vmem_budget_bytes=12 << 20)
    Bp = _round_up(B, TB)
    grid = (Bp // TB,)

    # Explicit scoped-VMEM budget (raises v5e's 16 MiB default, stays well
    # inside v7x's 64 MiB physical VMEM).
    usage = 2 * TB * _round_up(n_in, LANE) * 4 + TB * HIDDEN_PAD * 4 + 2 * TB * 4
    vmem_limit = int(max(32 << 20, min(60 << 20, 2 * usage)))

    out = pl.pallas_call(
        mlp_kernel,
        out_shape=jax.ShapeDtypeStruct((Bp // LANE, LANE), jnp.float32),
        grid=grid,
        in_specs=[
            pl.BlockSpec((TB, n_in), lambda i: (i, 0)),           # x: streamed (last block clipped)
            pl.BlockSpec((n_in, HIDDEN_PAD), lambda i: (0, 0)),   # w1: VMEM resident
            pl.BlockSpec((1, HIDDEN_PAD), lambda i: (0, 0)),      # b1: VMEM resident
            pl.BlockSpec((1, HIDDEN_PAD), lambda i: (0, 0)),      # w2 row: VMEM resident
            pl.BlockSpec(memory_space=pltpu.MemorySpace.SMEM),    # b2: SMEM scalar
        ],
        out_specs=pl.BlockSpec((TB // LANE, LANE), lambda i: (i, 0)),  # lane-dense output slab
        compiler_params=pltpu.CompilerParams(
            dimension_semantics=("parallel",),    # v7x: shard batch axis over 2 TCs
            vmem_limit_bytes=vmem_limit,
        ),
    )(x, w1p, b1p, w2row, b2s)

    # Free relayout back to (B, 1); rows >= B (from the clipped last block) dropped.
    return out.reshape(Bp, 1)[:B]


def init_params(key, n_inputs, hidden=HIDDEN, out=1):
    """Deterministic init mirroring the PyTorch module's initializers."""
    k1, k2, k3, k4 = jax.random.split(key, 4)

    # hidden1: kaiming_uniform_(nonlinearity='relu') on weight (10, n_inputs)
    gain = math.sqrt(2.0)                       # relu gain
    bound1 = gain * math.sqrt(3.0 / n_inputs)   # fan_in = n_inputs
    w1_t = jax.random.uniform(k1, (hidden, n_inputs), jnp.float32, -bound1, bound1)
    # Linear default bias init: U(-1/sqrt(fan_in), 1/sqrt(fan_in))
    bb1 = 1.0 / math.sqrt(n_inputs)
    b1 = jax.random.uniform(k2, (1, hidden), jnp.float32, -bb1, bb1)

    # hidden2: xavier_uniform_ on weight (1, 10)
    bound2 = math.sqrt(6.0 / (hidden + out))
    w2_t = jax.random.uniform(k3, (out, hidden), jnp.float32, -bound2, bound2)
    bb2 = 1.0 / math.sqrt(hidden)
    b2 = jax.random.uniform(k4, (1, out), jnp.float32, -bb2, bb2)

    # Pre-transpose weights to (in, out) for row-major matmul in the kernel.
    return w1_t.T, b1, w2_t.T, b2


if __name__ == "__main__":
    key = jax.random.PRNGKey(0)
    kx, kp = jax.random.split(key)

    # Multi-step grid (TB=1024 -> 3 steps) with a clipped final x block.
    batch, n_inputs = 2500, 32
    x = jax.random.normal(kx, (batch, n_inputs), dtype=jnp.float32)
    w1, b1, w2, b2 = init_params(kp, n_inputs)
    params = prepare_params(w1, b1, w2, b2)     # hoisted, done once

    fwd = jax.jit(mlp_forward)
    out = fwd(x, *params)
    jax.block_until_ready(out)

    # Reference check in plain JAX (unpadded weights).
    ref = jax.nn.sigmoid(jnp.maximum(x @ w1 + b1, 0.0) @ w2 + b2)
    assert out.shape == (batch, 1)
    assert jnp.allclose(out, ref, atol=1e-5, rtol=1e-5), float(jnp.max(jnp.abs(out - ref)))

    print("KERNEL_OK")
</pallas_src>

<mosaic_0001>
module attributes {stable_mosaic.version = 11 : i64} {
  func.func @mlp_kernel(%arg0: i32, %arg1: memref<1024x32xf32, #tpu.memory_space<vmem>>, %arg2: memref<32x128xf32, #tpu.memory_space<vmem>>, %arg3: memref<1x128xf32, #tpu.memory_space<vmem>>, %arg4: memref<1x128xf32, #tpu.memory_space<vmem>>, %arg5: memref<1xf32, #tpu.memory_space<smem>>, %arg6: memref<8x128xf32, #tpu.memory_space<vmem>>) attributes {dimension_semantics = [#tpu.dimension_semantics<parallel>], iteration_bounds = array<i64: 3>, scalar_prefetch = 0 : i64, scratch_operands = 0 : i64, tpu.core_type = #tpu.core_type<tc>, window_params = [{transform_indices = @transform_0, window_bounds = array<i64: 1024, 32>}, {pipeline_mode = #tpu.pipeline_mode<synchronous>, transform_indices = @transform_1, window_bounds = array<i64: 32, 128>}, {pipeline_mode = #tpu.pipeline_mode<synchronous>, transform_indices = @transform_2, window_bounds = array<i64: 1, 128>}, {pipeline_mode = #tpu.pipeline_mode<synchronous>, transform_indices = @transform_3, window_bounds = array<i64: 1, 128>}, {transform_indices = @transform_4, window_bounds = array<i64: 1>}, {transform_indices = @transform_5, window_bounds = array<i64: 8, 128>}]} {
    %c0 = arith.constant 0 : index
    %c0_0 = arith.constant 0 : index
    %0 = vector.load %arg1[%c0, %c0_0] : memref<1024x32xf32, #tpu.memory_space<vmem>>, vector<1024x32xf32>
    %c0_1 = arith.constant 0 : index
    %c0_2 = arith.constant 0 : index
    %1 = vector.load %arg2[%c0_1, %c0_2] : memref<32x128xf32, #tpu.memory_space<vmem>>, vector<32x128xf32>
    %cst = arith.constant dense<0.000000e+00> : vector<1024x128xf32>
    %2 = tpu.matmul %0, %1, %cst {dimension_numbers = #tpu.dot_dimension_numbers<[1], [0], [0], [1], [0, 0, 1, 1], [], []>} : vector<1024x32xf32>, vector<32x128xf32>, vector<1024x128xf32> -> vector<1024x128xf32>
    %c0_3 = arith.constant 0 : index
    %c0_4 = arith.constant 0 : index
    %3 = vector.load %arg3[%c0_3, %c0_4] : memref<1x128xf32, #tpu.memory_space<vmem>>, vector<1x128xf32>
    %4 = vector.broadcast %3 : vector<1x128xf32> to vector<1024x128xf32>
    %5 = arith.addf %2, %4 : vector<1024x128xf32>
    %cst_5 = arith.constant 0.000000e+00 : f32
    %6 = vector.broadcast %cst_5 : f32 to vector<1024x128xf32>
    %7 = arith.maximumf %5, %6 : vector<1024x128xf32>
    %c0_6 = arith.constant 0 : index
    %c0_7 = arith.constant 0 : index
    %8 = vector.load %arg4[%c0_6, %c0_7] : memref<1x128xf32, #tpu.memory_space<vmem>>, vector<1x128xf32>
    %9 = vector.broadcast %8 : vector<1x128xf32> to vector<1024x128xf32>
    %10 = arith.mulf %7, %9 : vector<1024x128xf32>
    %cst_8 = arith.constant dense<0.000000e+00> : vector<1024xf32>
    %11 = vector.multi_reduction <add>, %10, %cst_8 [1] : vector<1024x128xf32> to vector<1024xf32>
    %12 = vector.shape_cast %11 : vector<1024xf32> to vector<1024x1xf32>
    %13 = vector.shape_cast %12 : vector<1024x1xf32> to vector<8x128xf32>
    %c0_9 = arith.constant 0 : index
    %14 = memref.load %arg5[%c0_9] : memref<1xf32, #tpu.memory_space<smem>>
    %15 = vector.broadcast %14 : f32 to vector<8x128xf32>
    %16 = arith.addf %13, %15 : vector<8x128xf32>
    %cst_10 = arith.constant 5.000000e-01 : f32
    %17 = vector.broadcast %cst_10 : f32 to vector<8x128xf32>
    %18 = arith.mulf %17, %16 : vector<8x128xf32>
    %19 = math.tanh %18 : vector<8x128xf32>
    %cst_11 = arith.constant 5.000000e-01 : f32
    %20 = vector.broadcast %cst_11 : f32 to vector<8x128xf32>
    %21 = arith.mulf %20, %19 : vector<8x128xf32>
    %cst_12 = arith.constant 5.000000e-01 : f32
    %22 = vector.broadcast %cst_12 : f32 to vector<8x128xf32>
    %23 = arith.addf %21, %22 : vector<8x128xf32>
    %c0_13 = arith.constant 0 : index
    %c0_14 = arith.constant 0 : index
    %24 = vector.load %arg6[%c0_13, %c0_14] : memref<8x128xf32, #tpu.memory_space<vmem>>, vector<8x128xf32>
    tpu.vector_store %arg6[%c0_13, %c0_14], %23 {strides = array<i32>} : memref<8x128xf32, #tpu.memory_space<vmem>>, vector<8x128xf32>,
    return
  }
  func.func @transform_0(%arg0: i32) -> (i32, i32) {
    %c0_i32 = arith.constant 0 : i32
    %c0_i32_0 = arith.constant 0 : i32
    return %arg0, %c0_i32 : i32, i32
  }
  func.func @transform_1(%arg0: i32) -> (i32, i32) {
    %c0_i32 = arith.constant 0 : i32
    %c0_i32_0 = arith.constant 0 : i32
    %c0_i32_1 = arith.constant 0 : i32
    return %c0_i32, %c0_i32_0 : i32, i32
  }
  func.func @transform_2(%arg0: i32) -> (i32, i32) {
    %c0_i32 = arith.constant 0 : i32
    %c0_i32_0 = arith.constant 0 : i32
    %c0_i32_1 = arith.constant 0 : i32
    return %c0_i32, %c0_i32_0 : i32, i32
  }
  func.func @transform_3(%arg0: i32) -> (i32, i32) {
    %c0_i32 = arith.constant 0 : i32
    %c0_i32_0 = arith.constant 0 : i32
    %c0_i32_1 = arith.constant 0 : i32
    return %c0_i32, %c0_i32_0 : i32, i32
  }
  func.func @transform_4(%arg0: i32) -> i32 {
    %c0_i32 = arith.constant 0 : i32
    %c0_i32_0 = arith.constant 0 : i32
    return %c0_i32 : i32
  }
  func.func @transform_5(%arg0: i32) -> (i32, i32) {
    %c0_i32 = arith.constant 0 : i32
    %c0_i32_0 = arith.constant 0 : i32
    return %arg0, %c0_i32 : i32, i32
  }
}

</mosaic_0001>

<bundles_post_ra>
// kernel: mlp_forward.1
= control target key start
LH: loop header
LB: loop body
LE: loop exit
PB: predicated region body
PF: predicated region fallthrough
CT: control target
= control target key end

     0   :  { %s4289_s20 = smov 0   ;;  %s5955_s0 = inlined_call_operand.vmem [shape: f32[2500,32], index: 0, kind: input, shape index: {}]   ;;  %s5956_s1 = inlined_call_operand.vmem [shape: f32[32,128], index: 1, kind: input, shape index: {}]   ;;  %s5957_s2 = inlined_call_operand.vmem [shape: f32[1,128], index: 2, kind: input, shape index: {}]   ;;  %s5958_s3 = inlined_call_operand.vmem [shape: f32[1,128], index: 3, kind: input, shape index: {}]   ;;  %s5959_s4 = inlined_call_operand.<no memory space> [shape: f32[1], index: 4, kind: input, shape index: {}]   ;;  %s5960_s5 = inlined_call_operand.vmem [shape: f32[24,128], index: 5, kind: output, shape index: {}]  }
   0x1   :  { %10 = sst [smem:[#allocation2]] %s5959_s4 }
   0x2 LB: > { %s4295_s21 = sadd.s32 4294967295, %s4254_s20   ;;  %p3501_p0 = scmp.ge.s32.totalorder %s4254_s20, 1  ;;  %s4254_s20 = sphi %s4289_s20, %s16_s20  }
   0x3   : > { %p197_p1 = scmp.lt.s32.totalorder %s4254_s20, 4 }
   0x5   : > { %p198_p2 = pnand %p3501_p0, %p197_p1 }
   0x7   : > { %201 = sbr.rel (%p198_p2) target bundleno = 663 (0x297), region = 40 }
   0xe   : > { %v374_v0 = vld [vmem:[%s5956_s1] sm:$0xff]  ;;  %v375_v1 = vld [vmem:[%s5956_s1 + $0x8] sm:$0xff]  ;;  %v376_v2 = vld [vmem:[%s5956_s1 + $0x10] sm:$0xff]  ;;  %s3502_s27 = sshll.u32 %s4295_s21, 7  ;;  %vm385_vm0 = vcmask 261120   ;;  %s5006_s13 = sld [smem:[#allocation2]] }
   0xf   : > { %v3969_v3 = vpack.c.bf16 %v375_v1, %v374_v0  ;;  %v377_v4 = vld [vmem:[%s5956_s1 + $0x18] sm:$0xff]  ;;  %p233_p3 = scmp.lt.s32.totalorder %s3502_s27, 312  ;;  %vm2775_vm1 = vcmask 130112   ;;  %vm2782_vm2 = vcmask 195712   ;;  %vm2789_vm3 = vcmask 261312   ;;  %p242_p4 = scmp.lt.s32.totalorder %s4295_s21, 2 }
  0x10   : > { %v3973_v5 = vpack.c.bf16 %v377_v4, %v376_v2  ;;  %vm2796_vm4 = vcmask 326912   ;;  %vm2803_vm5 = vcmask 392512   ;;  %vm2810_vm6 = vcmask 458112  }
  0x11   : > { %3970 = vmatprep.subr.bf16.mxu0 %v3969_v3  ;;  %3977 = vmatprep.subr.bf16.mxu1 %v3969_v3  ;;  %s6018_s27 = smov (!%p233_p3, %s3502_s27), 312  ;;  %vm2817_vm7 = vcmask 523712   ;;  %vm2824_vm8 = vcmask 589312   ;;  %vm2831_vm9 = vcmask 654912   ;;  %vm2838_vm10 = vcmask 720512   ;;  %s6020_s21 = smov (!%p242_p4, %s4295_s21), 2 }
  0x12   : > { %3972 = vmatpush3.bf16.msra.mxu0 %v3969_v3  ;;  %3979 = vmatpush3.bf16.msra.mxu1 %v3969_v3  ;;  %s3503_s30 = sshll.u32 %s6018_s27, 3  ;;  %vm2845_vm11 = vcmask 786112   ;;  %vm2852_vm12 = vcmask 851712   ;;  %vm2859_vm13 = vcmask 917312   ;;  %vm2866_vm14 = vcmask 982912   ;;  %s3504_s22 = sshll.u32 %s6020_s21, 3 }
  0x13   : > { %3974 = vmatprep.subr.bf16.mxu0 %v3973_v5  ;;  %3978 = vmatprep.subr.bf16.mxu1 %v3973_v5  ;;  %s4315_s8 = scalar_lea.vmem %s5955_s0, %s3503_s30  ;;  %vm2873_vm15 = vcmask 1048512   ;;  %s245_s24 = scalar_lea.vmem %s5960_s5, %s3504_s22 }
  0x14   : > { %v246_v6 = vld [vmem:[%s4315_s8] sm:$0xff]  ;;  %v247_v8 = vld [vmem:[%s4315_s8 + $0x8] sm:$0xff]  ;;  %v248_v10 = vld [vmem:[%s4315_s8 + $0x10] sm:$0xff] }
  0x15   : > { %v310_v7 = vld [vmem:[%s4315_s8 + $0x200] sm:$0xff]  ;;  %v311_v9 = vld [vmem:[%s4315_s8 + $0x208] sm:$0xff]  ;;  %3777 = vmatprep.mubr.msk.f32.mxu0 %vm385_vm0, %v246_v6  ;;  %v312_v11 = vld [vmem:[%s4315_s8 + $0x210] sm:$0xff] }
  0x16   : > { %3976 = vmatpush3.bf16.msra.mxu0 %v3973_v5  ;;  %3980 = vmatpush3.bf16.msra.mxu1 %v3973_v5  ;;  %v249_v12 = vld [vmem:[%s4315_s8 + $0x18] sm:$0xff]  ;;  %v250_v14 = vld [vmem:[%s4315_s8 + $0x20] sm:$0xff]  ;;  %v251_v16 = vld [vmem:[%s4315_s8 + $0x28] sm:$0xff] }
  0x17   : > { %3873 = vmatprep.mubr.msk.f32.mxu1 %vm385_vm0, %v310_v7  ;;  %v313_v13 = vld [vmem:[%s4315_s8 + $0x218] sm:$0xff]  ;;  %v314_v15 = vld [vmem:[%s4315_s8 + $0x220] sm:$0xff]  ;;  %v315_v17 = vld [vmem:[%s4315_s8 + $0x228] sm:$0xff] }
  0x18   : > { %v252_v18 = vld [vmem:[%s4315_s8 + $0x30] sm:$0xff]  ;;  %v253_v20 = vld [vmem:[%s4315_s8 + $0x38] sm:$0xff]  ;;  %v318_v22 = vld [vmem:[%s4315_s8 + $0x240] sm:$0xff] }
  0x19   : > { %3778 = vmatmul.mubr.msk.f32.vlgmr.msra.gmra.mrb[0].mxu0 %vm385_vm0, %v247_v8  ;;  %3874 = vmatmul.mubr.msk.f32.vlgmr.msra.gmra.mrb[0].mxu1 %vm385_vm0, %v311_v9  ;;  %v316_v19 = vld [vmem:[%s4315_s8 + $0x230] sm:$0xff]  ;;  %v317_v21 = vld [vmem:[%s4315_s8 + $0x238] sm:$0xff]  ;;  %v254_v23 = vld [vmem:[%s4315_s8 + $0x40] sm:$0xff] }
  0x1a   : > { %3780 = vmatprep.mubr.msk.f32.mxu0 %vm385_vm0, %v248_v10  ;;  %3876 = vmatprep.mubr.msk.f32.mxu1 %vm385_vm0, %v312_v11  ;;  %v319_v24 = vld [vmem:[%s4315_s8 + $0x248] sm:$0xff]  ;;  %v256_v26 = vld [vmem:[%s4315_s8 + $0x50] sm:$0xff]  ;;  %v257_v28 = vld [vmem:[%s4315_s8 + $0x58] sm:$0xff] }
  0x1b   : > { %v255_v25 = vld [vmem:[%s4315_s8 + $0x48] sm:$0xff]  ;;  %v320_v27 = vld [vmem:[%s4315_s8 + $0x250] sm:$0xff]  ;;  %v321_v29 = vld [vmem:[%s4315_s8 + $0x258] sm:$0xff] }
  0x1c   : > { %v258_v30 = vld [vmem:[%s4315_s8 + $0x60] sm:$0xff]  ;;  %v259_v32 = vld [vmem:[%s4315_s8 + $0x68] sm:$0xff]  ;;  %v260_v34 = vld [vmem:[%s4315_s8 + $0x70] sm:$0xff] }
  0x1d   : > { %3781 = vmatmul.mubr.msk.f32.gmra.mrb[2].mxu0 %vm385_vm0, %v249_v12  ;;  %3877 = vmatmul.mubr.msk.f32.gmra.mrb[2].mxu1 %vm385_vm0, %v313_v13  ;;  %v322_v31 = vld [vmem:[%s4315_s8 + $0x260] sm:$0xff]  ;;  %v323_v33 = vld [vmem:[%s4315_s8 + $0x268] sm:$0xff]  ;;  %v324_v35 = vld [vmem:[%s4315_s8 + $0x270] sm:$0xff] }
  0x1e   : > { %3783 = vmatprep.mubr.msk.f32.mxu0 %vm385_vm0, %v250_v14  ;;  %3879 = vmatprep.mubr.msk.f32.mxu1 %vm385_vm0, %v314_v15  ;;  %v261_v36 = vld [vmem:[%s4315_s8 + $0x78] sm:$0xff]  ;;  %v262_v38 = vld [vmem:[%s4315_s8 + $0x80] sm:$0xff]  ;;  %v263_v40 = vld [vmem:[%s4315_s8 + $0x88] sm:$0xff] }
  0x1f   : > { %v325_v37 = vld [vmem:[%s4315_s8 + $0x278] sm:$0xff]  ;;  %v326_v39 = vld [vmem:[%s4315_s8 + $0x280] sm:$0xff]  ;;  %v327_v41 = vld [vmem:[%s4315_s8 + $0x288] sm:$0xff] }
  0x20   : > { %v264_v42 = vld [vmem:[%s4315_s8 + $0x90] sm:$0xff]  ;;  %v265_v44 = vld [vmem:[%s4315_s8 + $0x98] sm:$0xff]  ;;  %v266_v46 = vld [vmem:[%s4315_s8 + $0xa0] sm:$0xff] }
  0x21   : > { %3784 = vmatmul.mubr.msk.f32.gmra.mrb[4].mxu0 %vm385_vm0, %v251_v16  ;;  %3880 = vmatmul.mubr.msk.f32.gmra.mrb[4].mxu1 %vm385_vm0, %v315_v17  ;;  %v328_v43 = vld [vmem:[%s4315_s8 + $0x290] sm:$0xff]  ;;  %v329_v45 = vld [vmem:[%s4315_s8 + $0x298] sm:$0xff]  ;;  %v330_v47 = vld [vmem:[%s4315_s8 + $0x2a0] sm:$0xff] }
  0x22   : > { %3786 = vmatprep.mubr.msk.f32.mxu0 %vm385_vm0, %v252_v18  ;;  %3882 = vmatprep.mubr.msk.f32.mxu1 %vm385_vm0, %v316_v19  ;;  %v267_v48 = vld [vmem:[%s4315_s8 + $0xa8] sm:$0xff]  ;;  %v268_v50 = vld [vmem:[%s4315_s8 + $0xb0] sm:$0xff]  ;;  %v269_v52 = vld [vmem:[%s4315_s8 + $0xb8] sm:$0xff] }
  0x23   : > { %v331_v49 = vld [vmem:[%s4315_s8 + $0x2a8] sm:$0xff]  ;;  %v332_v51 = vld [vmem:[%s4315_s8 + $0x2b0] sm:$0xff]  ;;  %v333_v53 = vld [vmem:[%s4315_s8 + $0x2b8] sm:$0xff] }
  0x24   : > { %v270_v54 = vld [vmem:[%s4315_s8 + $0xc0] sm:$0xff]  ;;  %v271_v56 = vld [vmem:[%s4315_s8 + $0xc8] sm:$0xff]  ;;  %v272_v58 = vld [vmem:[%s4315_s8 + $0xd0] sm:$0xff] }
  0x25   : > { %3787 = vmatmul.mubr.msk.f32.gmra.mrb[6].mxu0 %vm385_vm0, %v253_v20  ;;  %3883 = vmatmul.mubr.msk.f32.gmra.mrb[6].mxu1 %vm385_vm0, %v317_v21  ;;  %v334_v55 = vld [vmem:[%s4315_s8 + $0x2c0] sm:$0xff]  ;;  %v335_v57 = vld [vmem:[%s4315_s8 + $0x2c8] sm:$0xff]  ;;  %v336_v59 = vld [vmem:[%s4315_s8 + $0x2d0] sm:$0xff] }
  0x26   : > { %3885 = vmatprep.mubr.msk.f32.mxu1 %vm385_vm0, %v318_v22  ;;  %3789 = vmatprep.mubr.msk.f32.mxu0 %vm385_vm0, %v254_v23  ;;  %v273_v60 = vld [vmem:[%s4315_s8 + $0xd8] sm:$0xff]  ;;  %v274_v62 = vld [vmem:[%s4315_s8 + $0xe0] sm:$0xff]  ;;  %v275_v0 = vld [vmem:[%s4315_s8 + $0xe8] sm:$0xff] }
  0x27   : > { %v337_v61 = vld [vmem:[%s4315_s8 + $0x2d8] sm:$0xff]  ;;  %v338_v63 = vld [vmem:[%s4315_s8 + $0x2e0] sm:$0xff]  ;;  %v339_v1 = vld [vmem:[%s4315_s8 + $0x2e8] sm:$0xff] }
  0x28   : > { %v276_v2 = vld [vmem:[%s4315_s8 + $0xf0] sm:$0xff]  ;;  %v277_v4 = vld [vmem:[%s4315_s8 + $0xf8] sm:$0xff]  ;;  %v278_v6 = vld [vmem:[%s4315_s8 + $0x100] sm:$0xff] }
  0x29   : > { %3886 = vmatmul.mubr.msk.f32.gmra.mrb[8].mxu1 %vm385_vm0, %v319_v24  ;;  %3790 = vmatmul.mubr.msk.f32.gmra.mrb[8].mxu0 %vm385_vm0, %v255_v25  ;;  %v340_v3 = vld [vmem:[%s4315_s8 + $0x2f0] sm:$0xff]  ;;  %v341_v5 = vld [vmem:[%s4315_s8 + $0x2f8] sm:$0xff]  ;;  %v342_v7 = vld [vmem:[%s4315_s8 + $0x300] sm:$0xff] }
  0x2a   : > { %3792 = vmatprep.mubr.msk.f32.mxu0 %vm385_vm0, %v256_v26  ;;  %3888 = vmatprep.mubr.msk.f32.mxu1 %vm385_vm0, %v320_v27  ;;  %v279_v8 = vld [vmem:[%s4315_s8 + $0x108] sm:$0xff]  ;;  %v280_v10 = vld [vmem:[%s4315_s8 + $0x110] sm:$0xff]  ;;  %v281_v12 = vld [vmem:[%s4315_s8 + $0x118] sm:$0xff] }
  0x2b   : > { %v343_v9 = vld [vmem:[%s4315_s8 + $0x308] sm:$0xff]  ;;  %v344_v11 = vld [vmem:[%s4315_s8 + $0x310] sm:$0xff]  ;;  %v345_v13 = vld [vmem:[%s4315_s8 + $0x318] sm:$0xff] }
  0x2c   : > { %v282_v14 = vld [vmem:[%s4315_s8 + $0x120] sm:$0xff]  ;;  %v283_v16 = vld [vmem:[%s4315_s8 + $0x128] sm:$0xff]  ;;  %v348_v18 = vld [vmem:[%s4315_s8 + $0x330] sm:$0xff] }
  0x2d   : > { %3793 = vmatmul.mubr.msk.f32.gmra.mrb[10].mxu0 %vm385_vm0, %v257_v28  ;;  %3889 = vmatmul.mubr.msk.f32.gmra.mrb[10].mxu1 %vm385_vm0, %v321_v29  ;;  %v346_v15 = vld [vmem:[%s4315_s8 + $0x320] sm:$0xff]  ;;  %v347_v17 = vld [vmem:[%s4315_s8 + $0x328] sm:$0xff]  ;;  %v284_v19 = vld [vmem:[%s4315_s8 + $0x130] sm:$0xff] }
  0x2e   : > { %3795 = vmatprep.mubr.msk.f32.mxu0 %vm385_vm0, %v258_v30  ;;  %3891 = vmatprep.mubr.msk.f32.mxu1 %vm385_vm0, %v322_v31  ;;  %v349_v20 = vld [vmem:[%s4315_s8 + $0x338] sm:$0xff]  ;;  %v286_v22 = vld [vmem:[%s4315_s8 + $0x140] sm:$0xff]  ;;  %v287_v24 = vld [vmem:[%s4315_s8 + $0x148] sm:$0xff] }
  0x2f   : > { %v285_v21 = vld [vmem:[%s4315_s8 + $0x138] sm:$0xff]  ;;  %v350_v23 = vld [vmem:[%s4315_s8 + $0x340] sm:$0xff]  ;;  %v351_v25 = vld [vmem:[%s4315_s8 + $0x348] sm:$0xff] }
  0x30   : > { %v288_v26 = vld [vmem:[%s4315_s8 + $0x150] sm:$0xff]  ;;  %v289_v28 = vld [vmem:[%s4315_s8 + $0x158] sm:$0xff]  ;;  %v290_v30 = vld [vmem:[%s4315_s8 + $0x160] sm:$0xff] }
  0x31   : > { %3796 = vmatmul.mubr.msk.f32.gmra.mrb[12].mxu0 %vm385_vm0, %v259_v32  ;;  %3892 = vmatmul.mubr.msk.f32.gmra.mrb[12].mxu1 %vm385_vm0, %v323_v33  ;;  %v352_v27 = vld [vmem:[%s4315_s8 + $0x350] sm:$0xff]  ;;  %v353_v29 = vld [vmem:[%s4315_s8 + $0x358] sm:$0xff]  ;;  %v354_v31 = vld [vmem:[%s4315_s8 + $0x360] sm:$0xff] }
  0x32   : > { %3798 = vmatprep.mubr.msk.f32.mxu0 %vm385_vm0, %v260_v34  ;;  %3894 = vmatprep.mubr.msk.f32.mxu1 %vm385_vm0, %v324_v35  ;;  %v291_v32 = vld [vmem:[%s4315_s8 + $0x168] sm:$0xff]  ;;  %v292_v34 = vld [vmem:[%s4315_s8 + $0x170] sm:$0xff] }
  0x33   : > { %v355_v33 = vld [vmem:[%s4315_s8 + $0x368] sm:$0xff]  ;;  %v356_v35 = vld [vmem:[%s4315_s8 + $0x370] sm:$0xff] }
  0x35   : > { %3799 = vmatmul.mubr.msk.f32.gmra.mrb[14].mxu0 %vm385_vm0, %v261_v36  ;;  %3895 = vmatmul.mubr.msk.f32.gmra.mrb[14].mxu1 %vm385_vm0, %v325_v37  ;;  %v293_v36 = vld [vmem:[%s4315_s8 + $0x178] sm:$0xff] }
  0x36   : > { %3801 = vmatprep.mubr.msk.f32.mxu0 %vm385_vm0, %v262_v38  ;;  %3897 = vmatprep.mubr.msk.f32.mxu1 %vm385_vm0, %v326_v39  ;;  %v357_v37 = vld [vmem:[%s4315_s8 + $0x378] sm:$0xff]  ;;  %v294_v38 = vld [vmem:[%s4315_s8 + $0x180] sm:$0xff] }
  0x37   : > { %v358_v39 = vld [vmem:[%s4315_s8 + $0x380] sm:$0xff] }
  0x39   : > { %3802 = vmatmul.mubr.msk.f32.gmra.mrb[16].mxu0 %vm385_vm0, %v263_v40  ;;  %3898 = vmatmul.mubr.msk.f32.gmra.mrb[16].mxu1 %vm385_vm0, %v327_v41  ;;  %v295_v40 = vld [vmem:[%s4315_s8 + $0x188] sm:$0xff] }
  0x3a   : > { %3804 = vmatprep.mubr.msk.f32.mxu0 %vm385_vm0, %v264_v42  ;;  %3900 = vmatprep.mubr.msk.f32.mxu1 %vm385_vm0, %v328_v43  ;;  %v359_v41 = vld [vmem:[%s4315_s8 + $0x388] sm:$0xff]  ;;  %v296_v42 = vld [vmem:[%s4315_s8 + $0x190] sm:$0xff] }
  0x3b   : > { %v360_v43 = vld [vmem:[%s4315_s8 + $0x390] sm:$0xff] }
  0x3d   : > { %3805 = vmatmul.mubr.msk.f32.gmra.mrb[18].mxu0 %vm385_vm0, %v265_v44  ;;  %3901 = vmatmul.mubr.msk.f32.gmra.mrb[18].mxu1 %vm385_vm0, %v329_v45  ;;  %v297_v44 = vld [vmem:[%s4315_s8 + $0x198] sm:$0xff] }
  0x3e   : > { %3807 = vmatprep.mubr.msk.f32.mxu0 %vm385_vm0, %v266_v46  ;;  %3903 = vmatprep.mubr.msk.f32.mxu1 %vm385_vm0, %v330_v47  ;;  %v361_v45 = vld [vmem:[%s4315_s8 + $0x398] sm:$0xff]  ;;  %v298_v46 = vld [vmem:[%s4315_s8 + $0x1a0] sm:$0xff] }
  0x3f   : > { %v362_v47 = vld [vmem:[%s4315_s8 + $0x3a0] sm:$0xff] }
  0x41   : > { %3808 = vmatmul.mubr.msk.f32.gmra.mrb[20].mxu0 %vm385_vm0, %v267_v48  ;;  %3904 = vmatmul.mubr.msk.f32.gmra.mrb[20].mxu1 %vm385_vm0, %v331_v49  ;;  %v299_v48 = vld [vmem:[%s4315_s8 + $0x1a8] sm:$0xff] }
  0x42   : > { %3810 = vmatprep.mubr.msk.f32.mxu0 %vm385_vm0, %v268_v50  ;;  %3906 = vmatprep.mubr.msk.f32.mxu1 %vm385_vm0, %v332_v51  ;;  %v363_v49 = vld [vmem:[%s4315_s8 + $0x3a8] sm:$0xff]  ;;  %v300_v50 = vld [vmem:[%s4315_s8 + $0x1b0] sm:$0xff] }
  0x43   : > { %v364_v51 = vld [vmem:[%s4315_s8 + $0x3b0] sm:$0xff] }
  0x45   : > { %3811 = vmatmul.mubr.msk.f32.gmra.mrb[22].mxu0 %vm385_vm0, %v269_v52  ;;  %3907 = vmatmul.mubr.msk.f32.gmra.mrb[22].mxu1 %vm385_vm0, %v333_v53  ;;  %v301_v52 = vld [vmem:[%s4315_s8 + $0x1b8] sm:$0xff] }
  0x46   : > { %3813 = vmatprep.mubr.msk.f32.mxu0 %vm385_vm0, %v270_v54  ;;  %3909 = vmatprep.mubr.msk.f32.mxu1 %vm385_vm0, %v334_v55  ;;  %v365_v53 = vld [vmem:[%s4315_s8 + $0x3b8] sm:$0xff]  ;;  %v302_v54 = vld [vmem:[%s4315_s8 + $0x1c0] sm:$0xff] }
  0x47   : > { %v366_v55 = vld [vmem:[%s4315_s8 + $0x3c0] sm:$0xff] }
  0x49   : > { %3814 = vmatmul.mubr.msk.f32.gmra.mrb[24].mxu0 %vm385_vm0, %v271_v56  ;;  %3910 = vmatmul.mubr.msk.f32.gmra.mrb[24].mxu1 %vm385_vm0, %v335_v57  ;;  %v303_v56 = vld [vmem:[%s4315_s8 + $0x1c8] sm:$0xff] }
  0x4a   : > { %3816 = vmatprep.mubr.msk.f32.mxu0 %vm385_vm0, %v272_v58  ;;  %3912 = vmatprep.mubr.msk.f32.mxu1 %vm385_vm0, %v336_v59  ;;  %v367_v57 = vld [vmem:[%s4315_s8 + $0x3c8] sm:$0xff]  ;;  %v304_v58 = vld [vmem:[%s4315_s8 + $0x1d0] sm:$0xff] }
  0x4b   : > { %v368_v59 = vld [vmem:[%s4315_s8 + $0x3d0] sm:$0xff] }
  0x4d   : > { %3817 = vmatmul.mubr.msk.f32.gmra.mrb[26].mxu0 %vm385_vm0, %v273_v60  ;;  %3913 = vmatmul.mubr.msk.f32.gmra.mrb[26].mxu1 %vm385_vm0, %v337_v61  ;;  %v305_v60 = vld [vmem:[%s4315_s8 + $0x1d8] sm:$0xff] }
  0x4e   : > { %3819 = vmatprep.mubr.msk.f32.mxu0 %vm385_vm0, %v274_v62  ;;  %3915 = vmatprep.mubr.msk.f32.mxu1 %vm385_vm0, %v338_v63  ;;  %v369_v61 = vld [vmem:[%s4315_s8 + $0x3d8] sm:$0xff]  ;;  %v370_v62 = vld [vmem:[%s4315_s8 + $0x3e0] sm:$0xff] }
  0x4f   : > { %v306_v63 = vld [vmem:[%s4315_s8 + $0x1e0] sm:$0xff] }
  0x51   : > { %3820 = vmatmul.mubr.msk.f32.gmra.mrb[28].mxu0 %vm385_vm0, %v275_v0  ;;  %3916 = vmatmul.mubr.msk.f32.gmra.mrb[28].mxu1 %vm385_vm0, %v339_v1  ;;  %v371_v0 = vld [vmem:[%s4315_s8 + $0x3e8] sm:$0xff] }
  0x52   : > { %3822 = vmatprep.mubr.msk.f32.mxu0 %vm385_vm0, %v276_v2  ;;  %3918 = vmatprep.mubr.msk.f32.mxu1 %vm385_vm0, %v340_v3  ;;  %v307_v1 = vld [vmem:[%s4315_s8 + $0x1e8] sm:$0xff]  ;;  %v308_v2 = vld [vmem:[%s4315_s8 + $0x1f0] sm:$0xff] }
  0x53   : > { %v372_v3 = vld [vmem:[%s4315_s8 + $0x3f0] sm:$0xff] }
  0x55   : > { %3823 = vmatmul.mubr.msk.f32.gmra.mrb[30].mxu0 %vm385_vm0, %v277_v4  ;;  %3919 = vmatmul.mubr.msk.f32.gmra.mrb[30].mxu1 %vm385_vm0, %v341_v5  ;;  %v309_v4 = vld [vmem:[%s4315_s8 + $0x1f8] sm:$0xff] }
  0x56   : > { %3825 = vmatprep.mubr.msk.f32.mxu0 %vm385_vm0, %v278_v6  ;;  %3921 = vmatprep.mubr.msk.f32.mxu1 %vm385_vm0, %v342_v7  ;;  %v373_v5 = vld [vmem:[%s4315_s8 + $0x3f8] sm:$0xff]  ;;  %v4576_v6 = vld [vmem:[%s5957_s2] ss:$0 sm:$0xff] }
  0x59   : > { %3826 = vmatmul.mubr.msk.f32.gmra.mrb[32].mxu0 %vm385_vm0, %v279_v8  ;;  %3922 = vmatmul.mubr.msk.f32.gmra.mrb[32].mxu1 %vm385_vm0, %v343_v9 }
  0x5a   : > { %3828 = vmatprep.mubr.msk.f32.mxu0 %vm385_vm0, %v280_v10  ;;  %3924 = vmatprep.mubr.msk.f32.mxu1 %vm385_vm0, %v344_v11 }
  0x5d   : > { %3829 = vmatmul.mubr.msk.f32.gmra.mrb[34].mxu0 %vm385_vm0, %v281_v12  ;;  %3925 = vmatmul.mubr.msk.f32.gmra.mrb[34].mxu1 %vm385_vm0, %v345_v13 }
  0x5e   : > { %3831 = vmatprep.mubr.msk.f32.mxu0 %vm385_vm0, %v282_v14  ;;  %3927 = vmatprep.mubr.msk.f32.mxu1 %vm385_vm0, %v346_v15  ;;  %v4584_v14 = vld [vmem:[%s5958_s3] ss:$0 sm:$0xff] }
  0x61   : > { %3832 = vmatmul.mubr.msk.f32.gmra.mrb[36].mxu0 %vm385_vm0, %v283_v16  ;;  %3928 = vmatmul.mubr.msk.f32.gmra.mrb[36].mxu1 %vm385_vm0, %v347_v17 }
  0x62   : > { %3930 = vmatprep.mubr.msk.f32.mxu1 %vm385_vm0, %v348_v18  ;;  %3834 = vmatprep.mubr.msk.f32.mxu0 %vm385_vm0, %v284_v19 }
  0x65   : > { %3931 = vmatmul.mubr.msk.f32.gmra.mrb[38].mxu1 %vm385_vm0, %v349_v20  ;;  %3835 = vmatmul.mubr.msk.f32.gmra.mrb[38].mxu0 %vm385_vm0, %v285_v21 }
  0x66   : > { %3837 = vmatprep.mubr.msk.f32.mxu0 %vm385_vm0, %v286_v22  ;;  %3933 = vmatprep.mubr.msk.f32.mxu1 %vm385_vm0, %v350_v23 }
  0x69   : > { %3838 = vmatmul.mubr.msk.f32.gmra.mrb[40].mxu0 %vm385_vm0, %v287_v24  ;;  %3934 = vmatmul.mubr.msk.f32.gmra.mrb[40].mxu1 %vm385_vm0, %v351_v25 }
  0x6a   : > { %3840 = vmatprep.mubr.msk.f32.mxu0 %vm385_vm0, %v288_v26  ;;  %3936 = vmatprep.mubr.msk.f32.mxu1 %vm385_vm0, %v352_v27 }
  0x6d   : > { %3841 = vmatmul.mubr.msk.f32.gmra.mrb[42].mxu0 %vm385_vm0, %v289_v28  ;;  %3937 = vmatmul.mubr.msk.f32.gmra.mrb[42].mxu1 %vm385_vm0, %v353_v29 }
  0x6e   : > { %3843 = vmatprep.mubr.msk.f32.mxu0 %vm385_vm0, %v290_v30  ;;  %3939 = vmatprep.mubr.msk.f32.mxu1 %vm385_vm0, %v354_v31 }
  0x71   : > { %3844 = vmatmul.mubr.msk.f32.gmra.mrb[44].mxu0 %vm385_vm0, %v291_v32  ;;  %3940 = vmatmul.mubr.msk.f32.gmra.mrb[44].mxu1 %vm385_vm0, %v355_v33 }
  0x72   : > { %3846 = vmatprep.mubr.msk.f32.mxu0 %vm385_vm0, %v292_v34  ;;  %3942 = vmatprep.mubr.msk.f32.mxu1 %vm385_vm0, %v356_v35 }
  0x75   : > { %3847 = vmatmul.mubr.msk.f32.gmra.mrb[46].mxu0 %vm385_vm0, %v293_v36  ;;  %3943 = vmatmul.mubr.msk.f32.gmra.mrb[46].mxu1 %vm385_vm0, %v357_v37 }
  0x76   : > { %3849 = vmatprep.mubr.msk.f32.mxu0 %vm385_vm0, %v294_v38  ;;  %3945 = vmatprep.mubr.msk.f32.mxu1 %vm385_vm0, %v358_v39 }
  0x79   : > { %3850 = vmatmul.mubr.msk.f32.gmra.mrb[48].mxu0 %vm385_vm0, %v295_v40  ;;  %3946 = vmatmul.mubr.msk.f32.gmra.mrb[48].mxu1 %vm385_vm0, %v359_v41 }
  0x7a   : > { %3852 = vmatprep.mubr.msk.f32.mxu0 %vm385_vm0, %v296_v42  ;;  %3948 = vmatprep.mubr.msk.f32.mxu1 %vm385_vm0, %v360_v43 }
  0x7d   : > { %3853 = vmatmul.mubr.msk.f32.gmra.mrb[50].mxu0 %vm385_vm0, %v297_v44  ;;  %3949 = vmatmul.mubr.msk.f32.gmra.mrb[50].mxu1 %vm385_vm0, %v361_v45 }
  0x7e   : > { %3855 = vmatprep.mubr.msk.f32.mxu0 %vm385_vm0, %v298_v46  ;;  %3951 = vmatprep.mubr.msk.f32.mxu1 %vm385_vm0, %v362_v47 }
  0x81   : > { %3856 = vmatmul.mubr.msk.f32.gmra.mrb[52].mxu0 %vm385_vm0, %v299_v48  ;;  %3952 = vmatmul.mubr.msk.f32.gmra.mrb[52].mxu1 %vm385_vm0, %v363_v49 }
  0x82   : > { %3858 = vmatprep.mubr.msk.f32.mxu0 %vm385_vm0, %v300_v50  ;;  %3954 = vmatprep.mubr.msk.f32.mxu1 %vm385_vm0, %v364_v51 }
  0x85   : > { %3859 = vmatmul.mubr.msk.f32.gmra.mrb[54].mxu0 %vm385_vm0, %v301_v52  ;;  %3955 = vmatmul.mubr.msk.f32.gmra.mrb[54].mxu1 %vm385_vm0, %v365_v53 }
  0x86   : > { %3861 = vmatprep.mubr.msk.f32.mxu0 %vm385_vm0, %v302_v54  ;;  %3957 = vmatprep.mubr.msk.f32.mxu1 %vm385_vm0, %v366_v55 }
  0x89   : > { %3862 = vmatmul.mubr.msk.f32.gmra.mrb[56].mxu0 %vm385_vm0, %v303_v56  ;;  %3958 = vmatmul.mubr.msk.f32.gmra.mrb[56].mxu1 %vm385_vm0, %v367_v57 }
  0x8a   : > { %3864 = vmatprep.mubr.msk.f32.mxu0 %vm385_vm0, %v304_v58  ;;  %3960 = vmatprep.mubr.msk.f32.mxu1 %vm385_vm0, %v368_v59 }
  0x8d   : > { %3865 = vmatmul.mubr.msk.f32.gmra.mrb[58].mxu0 %vm385_vm0, %v305_v60  ;;  %3961 = vmatmul.mubr.msk.f32.gmra.mrb[58].mxu1 %vm385_vm0, %v369_v61 }
  0x8e   : > { %3963 = vmatprep.mubr.msk.f32.mxu1 %vm385_vm0, %v370_v62  ;;  %3867 = vmatprep.mubr.msk.f32.mxu0 %vm385_vm0, %v306_v63 }
  0x91   : > { %3964 = vmatmul.mubr.msk.f32.gmra.mrb[60].mxu1 %vm385_vm0, %v371_v0  ;;  %3868 = vmatmul.mubr.msk.f32.gmra.mrb[60].mxu0 %vm385_vm0, %v307_v1 }
  0x92   : > { %3870 = vmatprep.mubr.msk.f32.mxu0 %vm385_vm0, %v308_v2  ;;  %3966 = vmatprep.mubr.msk.f32.mxu1 %vm385_vm0, %v372_v3 }
  0x95   : > { %3871 = vmatmul.mubr.msk.f32.gmra.mrb[62].mxu0 %vm385_vm0, %v309_v4  ;;  %3967 = vmatmul.mubr.msk.f32.gmra.mrb[62].mxu1 %vm385_vm0, %v373_v5  ;;  %vm3428_vm0 = vcmask 1041409  }
  0xec   : > { %v3779_v7 = vpop.f32.mrb[0].mxu0  ;;  %v3875_v8 = vpop.f32.mrb[0].mxu1 }
  0xed   : > { %v842_v9 = vadd.f32 %v3779_v7, %v4576_v6  ;;  %v1162_v10 = vadd.f32 %v3875_v8, %v4576_v6  ;;  %v836_v11 = vpop.f32.mrb[1].mxu0  ;;  %v1156_v12 = vpop.f32.mrb[1].mxu1 }
  0xee   : > { %v837_v13 = vadd.f32 %v4576_v6, %v836_v11  ;;  %v1157_v18 = vadd.f32 %v4576_v6, %v1156_v12 }
  0xef   : > { %v1476_v15 = vmax.f32 %v842_v9, 0.0  ;;  %v1540_v16 = vmax.f32 %v1162_v10, 0.0 }
  0xf0   : > { %v1475_v17 = vmax.f32 %v837_v13, 0.0  ;;  %v3782_v19 = vpop.f32.mrb[2].mxu0  ;;  %v3878_v20 = vpop.f32.mrb[2].mxu1  ;;  %v1539_v29 = vmax.f32 %v1157_v18, 0.0 }
  0xf1   : > { %v852_v21 = vadd.f32 %v3782_v19, %v4576_v6  ;;  %v846_v22 = vpop.f32.mrb[3].mxu0  ;;  %v1675_v23 = vmul.f32 %v4584_v14, %v1540_v16  ;;  %v1611_v24 = vmul.f32 %v4584_v14, %v1476_v15  ;;  %v1172_v25 = vadd.f32 %v3878_v20, %v4576_v6  ;;  %v1166_v26 = vpop.f32.mrb[3].mxu1 }
  0xf2   : > { %v847_v32 = vadd.f32 %v4576_v6, %v846_v22  ;;  %v1167_v33 = vadd.f32 %v4576_v6, %v1166_v26  ;;  %v1610_v35 = vmul.f32 %v4584_v14, %v1475_v17  ;;  %v1674_v45 = vmul.f32 %v4584_v14, %v1539_v29 }
  0xf3   : > { %v1478_v27 = vmax.f32 %v852_v21, 0.0  ;;  %1868 = vadd.xlane.f32.xlu1 %v1675_v23  ;;  %1740 = vadd.xlane.f32.xlu0 %v1611_v24  ;;  %v1542_v28 = vmax.f32 %v1172_v25, 0.0 }
  0xf4   : > { %v3785_v30 = vpop.f32.mrb[4].mxu0  ;;  %v3881_v31 = vpop.f32.mrb[4].mxu1  ;;  %v1477_v43 = vmax.f32 %v847_v32, 0.0  ;;  %v1541_v44 = vmax.f32 %v1167_v33, 0.0 }
  0xf5   : > { %v1613_v34 = vmul.f32 %v4584_v14, %v1478_v27  ;;  %v856_v36 = vpop.f32.mrb[5].mxu0  ;;  %v1176_v37 = vpop.f32.mrb[5].mxu1  ;;  %v862_v38 = vadd.f32 %v3785_v30, %v4576_v6  ;;  %v1677_v39 = vmul.f32 %v4584_v14, %v1542_v28  ;;  %v1182_v48 = vadd.f32 %v3881_v31, %v4576_v6 }
  0xf6   : > { %v857_v40 = vadd.f32 %v4576_v6, %v856_v36  ;;  %v1177_v51 = vadd.f32 %v4576_v6, %v1176_v37  ;;  %v1612_v54 = vmul.f32 %v4584_v14, %v1477_v43  ;;  %v1676_v55 = vmul.f32 %v4584_v14, %v1541_v44 }
  0xf7   : > { %1744 = vadd.xlane.f32.xlu1 %v1613_v34  ;;  %1738 = vadd.xlane.f32.xlu0 %v1610_v35  ;;  %v1480_v49 = vmax.f32 %v862_v38, 0.0  ;;  %v1544_v58 = vmax.f32 %v1182_v48, 0.0 }
  0xf8   : > { %v3788_v41 = vpop.f32.mrb[6].mxu0  ;;  %v3884_v42 = vpop.f32.mrb[6].mxu1  ;;  %v1479_v50 = vmax.f32 %v857_v40, 0.0  ;;  %v1543_v60 = vmax.f32 %v1177_v51, 0.0 }
  0xf9   : > { %v866_v46 = vpop.f32.mrb[7].mxu0  ;;  %v1186_v47 = vpop.f32.mrb[7].mxu1  ;;  %v872_v59 = vadd.f32 %v3788_v41, %v4576_v6  ;;  %v1615_v62 = vmul.f32 %v4584_v14, %v1480_v49  ;;  %v1192_v4 = vadd.f32 %v3884_v42, %v4576_v6  ;;  %v1679_v5 = vmul.f32 %v4584_v14, %v1544_v58 }
  0xfa   : > { %v867_v61 = vadd.f32 %v4576_v6, %v866_v46  ;;  %v1614_v63 = vmul.f32 %v4584_v14, %v1479_v50  ;;  %v1187_v9 = vadd.f32 %v4576_v6, %v1186_v47  ;;  %v1678_v10 = vmul.f32 %v4584_v14, %v1543_v60 }
  0xfb   : > { %1872 = vadd.xlane.f32.xlu1 %v1677_v39  ;;  %1866 = vadd.xlane.f32.xlu0 %v1674_v45  ;;  %v1482_v7 = vmax.f32 %v872_v59, 0.0  ;;  %v1546_v16 = vmax.f32 %v1192_v4, 0.0 }
  0xfc   : > { %v3887_v52 = vpop.f32.mrb[8].mxu1  ;;  %v3791_v53 = vpop.f32.mrb[8].mxu0  ;;  %v1481_v8 = vmax.f32 %v867_v61, 0.0  ;;  %v1545_v18 = vmax.f32 %v1187_v9, 0.0 }
  0xfd   : > { %v1196_v56 = vpop.f32.mrb[9].mxu1  ;;  %v876_v57 = vpop.f32.mrb[9].mxu0  ;;  %v1202_v17 = vadd.f32 %v3887_v52, %v4576_v6  ;;  %v1617_v19 = vmul.f32 %v4584_v14, %v1482_v7  ;;  %v882_v21 = vadd.f32 %v3791_v53, %v4576_v6  ;;  %v1681_v26 = vmul.f32 %v4584_v14, %v1546_v16 }
  0xfe   : > { %v1616_v20 = vmul.f32 %v4584_v14, %v1481_v8  ;;  %v1680_v29 = vmul.f32 %v4584_v14, %v1545_v18  ;;  %v877_v33 = vadd.f32 %v4576_v6, %v876_v57  ;;  %v1197_v42 = vadd.f32 %v4576_v6, %v1196_v56 }
  0xff   : > { %1742 = vadd.xlane.f32.xlu1 %v1612_v54  ;;  %1870 = vadd.xlane.f32.xlu0 %v1676_v55  ;;  %v1548_v27 = vmax.f32 %v1202_v17, 0.0  ;;  %v1484_v28 = vmax.f32 %v882_v21, 0.0 }
 0x100   : > { %v3794_v0 = vpop.f32.mrb[10].mxu0  ;;  %v3890_v1 = vpop.f32.mrb[10].mxu1  ;;  %v1483_v43 = vmax.f32 %v877_v33, 0.0  ;;  %v1547_v51 = vmax.f32 %v1197_v42, 0.0 }
 0x101   : > { %v4607_v2 = vpop.f32.mrb[11].mxu0  ;;  %v4609_v3 = vpop.f32.mrb[11].mxu1  ;;  %v892_v30 = vadd.f32 %v3794_v0, %v4576_v6  ;;  %v1619_v37 = vmul.f32 %v4584_v14, %v1484_v28  ;;  %v1683_v38 = vmul.f32 %v4584_v14, %v1548_v27  ;;  %v1212_v52 = vadd.f32 %v3890_v1, %v4576_v6 }
 0x102   : > { %v1618_v53 = vmul.f32 %v4584_v14, %v1483_v43  ;;  %v887_v61 = vadd.f32 %v4576_v6, %v4607_v2  ;;  %v1207_v2 = vadd.f32 %v4576_v6, %v4609_v3 }
 0x103   : > { %1748 = vadd.xlane.f32.xlu1 %v1615_v62  ;;  %1746 = vadd.xlane.f32.xlu0 %v1614_v63  ;;  %v1486_v36 = vmax.f32 %v892_v30, 0.0  ;;  %v1550_v62 = vmax.f32 %v1212_v52, 0.0  ;;  %v1682_v63 = vmul.f32 %v4584_v14, %v1547_v51 }
 0x104   : > { %v3797_v11 = vpop.f32.mrb[12].mxu0  ;;  %v4615_v12 = vpop.f32.mrb[12].mxu1 }
 0x105   : > { %v4617_v13 = vpop.f32.mrb[13].mxu0  ;;  %v4619_v15 = vpop.f32.mrb[13].mxu1  ;;  %v902_v39 = vadd.f32 %v3797_v11, %v4576_v6  ;;  %v1621_v47 = vmul.f32 %v4584_v14, %v1486_v36  ;;  %v1685_v11 = vmul.f32 %v4584_v14, %v1550_v62  ;;  %v1222_v3 = vadd.f32 %v4615_v12, %v4576_v6 }
 0x106   : > { %v897_v12 = vadd.f32 %v4576_v6, %v4617_v13  ;;  %v1217_v13 = vadd.f32 %v4576_v6, %v4619_v15 }
 0x107   : > { %1876 = vadd.xlane.f32.xlu1 %v1679_v5  ;;  %1874 = vadd.xlane.f32.xlu0 %v1678_v10  ;;  %v1488_v46 = vmax.f32 %v902_v39, 0.0  ;;  %v1485_v10 = vmax.f32 %v887_v61, 0.0 }
 0x108   : > { %v3800_v22 = vpop.f32.mrb[14].mxu0  ;;  %v4625_v23 = vpop.f32.mrb[14].mxu1  ;;  %v1551_v62 = vmax.f32 %v1217_v13, 0.0 }
 0x109   : > { %v4627_v24 = vpop.f32.mrb[15].mxu0  ;;  %v4629_v25 = vpop.f32.mrb[15].mxu1  ;;  %v912_v48 = vadd.f32 %v3800_v22, %v4576_v6  ;;  %v1623_v57 = vmul.f32 %v4584_v14, %v1488_v46  ;;  %v1620_v27 = vmul.f32 %v4584_v14, %v1485_v10  ;;  %v1232_v15 = vadd.f32 %v4625_v23, %v4576_v6 }
 0x10a   : > { %v907_v23 = vadd.f32 %v4576_v6, %v4627_v24 }
 0x10b   : > { %1752 = vadd.xlane.f32.xlu1 %v1617_v19  ;;  %1750 = vadd.xlane.f32.xlu0 %v1616_v20  ;;  %v1490_v56 = vmax.f32 %v912_v48, 0.0  ;;  %v1487_v48 = vmax.f32 %v897_v12, 0.0 }
 0x10c   : > { %v3803_v31 = vpop.f32.mrb[16].mxu0  ;;  %v4634_v32 = vpop.f32.mrb[16].mxu1  ;;  %v1489_v24 = vmax.f32 %v907_v23, 0.0 }
 0x10d   : > { %v4637_v34 = vpop.f32.mrb[17].mxu0  ;;  %v1236_v35 = vpop.f32.mrb[17].mxu1  ;;  %v922_v58 = vadd.f32 %v3803_v31, %v4576_v6  ;;  %v1625_v5 = vmul.f32 %v4584_v14, %v1490_v56 }
 0x10e   : > { %v1237_v7 = vadd.f32 %v4576_v6, %v1236_v35 }
 0x10f   : > { %1880 = vadd.xlane.f32.xlu1 %v1681_v26  ;;  %1878 = vadd.xlane.f32.xlu0 %v1680_v29  ;;  %v1492_v4 = vmax.f32 %v922_v58, 0.0  ;;  %v1549_v26 = vmax.f32 %v1207_v2, 0.0 }
 0x110   : > { %v3806_v40 = vpop.f32.mrb[18].mxu0  ;;  %v4642_v41 = vpop.f32.mrb[18].mxu1  ;;  %v1555_v18 = vmax.f32 %v1237_v7, 0.0 }
 0x111   : > { %v4645_v44 = vpop.f32.mrb[19].mxu0  ;;  %v1246_v45 = vpop.f32.mrb[19].mxu1  ;;  %v1627_v19 = vmul.f32 %v4584_v14, %v1492_v4  ;;  %v932_v20 = vadd.f32 %v3806_v40, %v4576_v6 }
 0x112   : > { %v1690_v31 = vmul.f32 %v4584_v14, %v1555_v18  ;;  %v1247_v33 = vadd.f32 %v4576_v6, %v1246_v45  ;;  %v1554_v18 = vmax.f32 %v1232_v15, 0.0 }
 0x113   : > { %1756 = vadd.xlane.f32.xlu1 %v1619_v37  ;;  %1884 = vadd.xlane.f32.xlu0 %v1683_v38  ;;  %v1494_v30 = vmax.f32 %v932_v20, 0.0  ;;  %v1552_v37 = vmax.f32 %v1222_v3, 0.0  ;;  %v1684_v38 = vmul.f32 %v4584_v14, %v1549_v26 }
 0x114   : > { %v3809_v49 = vpop.f32.mrb[20].mxu0  ;;  %v4649_v50 = vpop.f32.mrb[20].mxu1  ;;  %v1557_v42 = vmax.f32 %v1247_v33, 0.0  ;;  %v1227_v33 = vadd.f32 %v4576_v6, %v4629_v25  ;;  %v1689_v12 = vmul.f32 %v4584_v14, %v1554_v18  ;;  %v1242_v25 = vadd.f32 %v4634_v32, %v4576_v6 }
 0x115   : > { %v4653_v54 = vpop.f32.mrb[21].mxu0  ;;  %v4655_v55 = vpop.f32.mrb[21].mxu1  ;;  %v1629_v43 = vmul.f32 %v4584_v14, %v1494_v30  ;;  %v942_v45 = vadd.f32 %v3809_v49, %v4576_v6  ;;  %v1687_v51 = vmul.f32 %v4584_v14, %v1552_v37  ;;  %v1262_v49 = vadd.f32 %v4649_v50, %v4576_v6 }
 0x116   : > { %v1553_v13 = vmax.f32 %v1227_v33, 0.0  ;;  %v917_v32 = vadd.f32 %v4576_v6, %v4637_v34  ;;  %v1252_v34 = vadd.f32 %v4642_v41, %v4576_v6  ;;  %v927_v41 = vadd.f32 %v4576_v6, %v4645_v44 }
 0x117   : > { %1760 = vadd.xlane.f32.xlu1 %v1621_v47  ;;  %1754 = vadd.xlane.f32.xlu0 %v1618_v53  ;;  %v1496_v56 = vmax.f32 %v942_v45, 0.0  ;;  %v1560_v7 = vmax.f32 %v1262_v49, 0.0  ;;  %v937_v44 = vadd.f32 %v4576_v6, %v4653_v54  ;;  %v1257_v54 = vadd.f32 %v4576_v6, %v4655_v55 }
 0x118   : > { %v4659_v59 = vpop.f32.mrb[22].mxu0  ;;  %v4661_v60 = vpop.f32.mrb[22].mxu1 }
 0x119   : > { %v4666_v0 = vpop.f32.mrb[23].mxu0  ;;  %v4668_v1 = vpop.f32.mrb[23].mxu1  ;;  %v1631_v10 = vmul.f32 %v4584_v14, %v1496_v56  ;;  %v952_v50 = vadd.f32 %v4659_v59, %v4576_v6  ;;  %v1272_v59 = vadd.f32 %v4661_v60, %v4576_v6  ;;  %v1559_v55 = vmax.f32 %v1257_v54, 0.0 }
 0x11b   : > { %1764 = vadd.xlane.f32.xlu1 %v1623_v57  ;;  %1882 = vadd.xlane.f32.xlu0 %v1682_v63  ;;  %v1692_v57 = vmul.f32 %v4584_v14, %v1557_v42  ;;  %v1622_v63 = vmul.f32 %v4584_v14, %v1487_v48  ;;  %v1498_v3 = vmax.f32 %v952_v50, 0.0  ;;  %v1562_v42 = vmax.f32 %v1272_v59, 0.0 }
 0x11c   : > { %v4672_v8 = vpop.f32.mrb[24].mxu0  ;;  %v4674_v9 = vpop.f32.mrb[24].mxu1 }
 0x11d   : > { %v4679_v16 = vpop.f32.mrb[25].mxu0  ;;  %v4681_v17 = vpop.f32.mrb[25].mxu1  ;;  %v962_v60 = vadd.f32 %v4672_v8, %v4576_v6  ;;  %v1282_v8 = vadd.f32 %v4674_v9, %v4576_v6 }
 0x11e   : > { %v1277_v59 = vadd.f32 %v4576_v6, %v4681_v17  ;;  %v1558_v17 = vmax.f32 %v1252_v34, 0.0 }
 0x11f   : > { %1768 = vadd.xlane.f32.xlu1 %v1625_v5  ;;  %1888 = vadd.xlane.f32.xlu0 %v1685_v11  ;;  %v1500_v49 = vmax.f32 %v962_v60, 0.0  ;;  %v1564_v18 = vmax.f32 %v1282_v8, 0.0 }
 0x120   : > { %v4685_v21 = vpop.f32.mrb[26].mxu0  ;;  %v4687_v22 = vpop.f32.mrb[26].mxu1 }
 0x121   : > { %v4692_v28 = vpop.f32.mrb[27].mxu0  ;;  %v4694_v29 = vpop.f32.mrb[27].mxu1 }
 0x123   : > { %1772 = vadd.xlane.f32.xlu1 %v1627_v19  ;;  %1758 = vadd.xlane.f32.xlu0 %v1620_v27  ;;  %v1686_v19 = vmul.f32 %v4584_v14, %v1551_v62  ;;  %v1695_v27 = vmul.f32 %v4584_v14, %v1560_v7  ;;  %v1697_v62 = vmul.f32 %v4584_v14, %v1562_v42  ;;  %v1556_v7 = vmax.f32 %v1242_v25, 0.0 }
 0x124   : > { %v4698_v35 = vpop.f32.mrb[28].mxu0  ;;  %v4700_v36 = vpop.f32.mrb[28].mxu1  ;;  %v1699_v42 = vmul.f32 %v4584_v14, %v1564_v18  ;;  %v1563_v25 = vmax.f32 %v1277_v59, 0.0 }
 0x125   : > { %v4705_v39 = vpop.f32.mrb[29].mxu0  ;;  %v4707_v40 = vpop.f32.mrb[29].mxu1 }
 0x126   : > { %v1698_v18 = vmul.f32 %v4584_v14, %v1563_v25 }
 0x127   : > { %1898 = vadd.xlane.f32.xlu1 %v1690_v31  ;;  %1886 = vadd.xlane.f32.xlu0 %v1684_v38 }
 0x128   : > { %v4711_v46 = vpop.f32.mrb[30].mxu0  ;;  %v4713_v47 = vpop.f32.mrb[30].mxu1 }
 0x129   : > { %v4718_v52 = vpop.f32.mrb[31].mxu0  ;;  %v4720_v53 = vpop.f32.mrb[31].mxu1 }
 0x12b   : > { %1776 = vadd.xlane.f32.xlu1 %v1629_v43  ;;  %1892 = vadd.xlane.f32.xlu0 %v1687_v51  ;;  %v1633_v43 = vmul.f32 %v4584_v14, %v1498_v3  ;;  %v1624_v51 = vmul.f32 %v4584_v14, %v1489_v24  ;;  %v1691_v24 = vmul.f32 %v4584_v14, %v1556_v7 }
 0x12c   : > { %v4725_v58 = vpop.f32.mrb[32].mxu0  ;;  %v4727_v61 = vpop.f32.mrb[32].mxu1 }
 0x12d   : > { %v4732_v4 = vpop.f32.mrb[33].mxu0  ;;  %v4734_v5 = vpop.f32.mrb[33].mxu1 }
 0x12f   : > { %1902 = vadd.xlane.f32.xlu1 %v1692_v57  ;;  %1762 = vadd.xlane.f32.xlu0 %v1622_v63 }
 0x130   : > { %v4739_v2 = vpop.f32.mrb[34].mxu0  ;;  %v4741_v11 = vpop.f32.mrb[34].mxu1 }
 0x131   : > { %v4746_v20 = vpop.f32.mrb[35].mxu0  ;;  %v4748_v26 = vpop.f32.mrb[35].mxu1 }
 0x133   : > { %1780 = vadd.xlane.f32.xlu1 %v1631_v10  ;;  %1890 = vadd.xlane.f32.xlu0 %v1686_v19  ;;  %v1688_v10 = vmul.f32 %v4584_v14, %v1553_v13  ;;  %v1635_v19 = vmul.f32 %v4584_v14, %v1500_v49 }
 0x134   : > { %v4753_v30 = vpop.f32.mrb[36].mxu0  ;;  %v4755_v31 = vpop.f32.mrb[36].mxu1 }
 0x135   : > { %v4760_v37 = vpop.f32.mrb[37].mxu0  ;;  %v4762_v38 = vpop.f32.mrb[37].mxu1 }
 0x137   : > { %1908 = vadd.xlane.f32.xlu1 %v1695_v27  ;;  %1896 = vadd.xlane.f32.xlu0 %v1689_v12  ;;  %v1491_v27 = vmax.f32 %v917_v32, 0.0 }
 0x138   : > { %v4767_v45 = vpop.f32.mrb[38].mxu1  ;;  %v4769_v48 = vpop.f32.mrb[38].mxu0 }
 0x139   : > { %v4774_v56 = vpop.f32.mrb[39].mxu1  ;;  %v4776_v57 = vpop.f32.mrb[39].mxu0 }
 0x13b   : > { %1784 = vadd.xlane.f32.xlu1 %v1633_v43  ;;  %1766 = vadd.xlane.f32.xlu0 %v1624_v51  ;;  %v972_v43 = vadd.f32 %v4685_v21, %v4576_v6  ;;  %v1626_v51 = vmul.f32 %v4584_v14, %v1491_v27  ;;  %v1292_v21 = vadd.f32 %v4687_v22, %v4576_v6 }
 0x13c   : > { %v4781_v15 = vpop.f32.mrb[40].mxu0  ;;  %v4783_v63 = vpop.f32.mrb[40].mxu1 }
 0x13d   : > { %v4788_v50 = vpop.f32.mrb[41].mxu0  ;;  %v4790_v23 = vpop.f32.mrb[41].mxu1  ;;  %v1502_v8 = vmax.f32 %v972_v43, 0.0  ;;  %v1566_v59 = vmax.f32 %v1292_v21, 0.0  ;;  %v1495_v43 = vmax.f32 %v937_v44, 0.0  ;;  %v982_v21 = vadd.f32 %v4698_v35, %v4576_v6 }
 0x13e   : > { %v1302_v35 = vadd.f32 %v4700_v36, %v4576_v6 }
 0x13f   : > { %1912 = vadd.xlane.f32.xlu1 %v1697_v62  ;;  %1894 = vadd.xlane.f32.xlu0 %v1688_v10  ;;  %v1493_v10 = vmax.f32 %v927_v41, 0.0  ;;  %v1637_v22 = vmul.f32 %v4584_v14, %v1502_v8  ;;  %v1287_v41 = vadd.f32 %v4576_v6, %v4694_v29  ;;  %v1701_v8 = vmul.f32 %v4584_v14, %v1566_v59 }
 0x140   : > { %v4793_v9 = vpop.f32.mrb[42].mxu0  ;;  %v4795_v3 = vpop.f32.mrb[42].mxu1  ;;  %v947_v29 = vadd.f32 %v4576_v6, %v4666_v0  ;;  %v1504_v59 = vmax.f32 %v982_v21, 0.0  ;;  %v1267_v0 = vadd.f32 %v4576_v6, %v4668_v1  ;;  %v1568_v21 = vmax.f32 %v1302_v35, 0.0 }
 0x141   : > { %v4802_v33 = vpop.f32.mrb[43].mxu0  ;;  %v4804_v12 = vpop.f32.mrb[43].mxu1  ;;  %v957_v1 = vadd.f32 %v4576_v6, %v4679_v16  ;;  %v2764_v35 = vlaneseq }
 0x142   : > { %v1497_v54 = vmax.f32 %v947_v29, 0.0  ;;  %v1639_v36 = vmul.f32 %v4584_v14, %v1504_v59  ;;  %v1561_v29 = vmax.f32 %v1267_v0, 0.0  ;;  %v1703_v59 = vmul.f32 %v4584_v14, %v1568_v21 }
 0x143   : > { %1788 = vadd.xlane.f32.xlu1 %v1635_v19  ;;  %1900 = vadd.xlane.f32.xlu0 %v1691_v24  ;;  %v1693_v19 = vmul.f32 %v4584_v14, %v1558_v17  ;;  %v1628_v17 = vmul.f32 %v4584_v14, %v1493_v10  ;;  %v1565_v10 = vmax.f32 %v1287_v41, 0.0  ;;  %v1694_v41 = vmul.f32 %v4584_v14, %v1559_v55 }
 0x144   : > { %v4809_v60 = vpop.f32.mrb[44].mxu0  ;;  %v4811_v13 = vpop.f32.mrb[44].mxu1  ;;  %v1297_v55 = vadd.f32 %v4576_v6, %v4707_v40  ;;  %v992_v0 = vadd.f32 %v4711_v46, %v4576_v6  ;;  %v967_v40 = vadd.f32 %v4576_v6, %v4692_v28  ;;  %v1307_v21 = vadd.f32 %v4576_v6, %v4720_v53 }
 0x145   : > { %v4816_v49 = vpop.f32.mrb[45].mxu0  ;;  %v4818_v62 = vpop.f32.mrb[45].mxu1 }
 0x146   : > { %v1506_v46 = vmax.f32 %v992_v0, 0.0  ;;  %v1501_v28 = vmax.f32 %v967_v40, 0.0  ;;  %v1569_v0 = vmax.f32 %v1307_v21, 0.0 }
 0x147   : > { %1916 = vadd.xlane.f32.xlu1 %v1699_v42  ;;  %1770 = vadd.xlane.f32.xlu0 %v1626_v51 }
 0x148   : > { %v4822_v32 = vpop.f32.mrb[46].mxu0  ;;  %v4824_v7 = vpop.f32.mrb[46].mxu1  ;;  %v1641_v40 = vmul.f32 %v4584_v14, %v1506_v46  ;;  %v1636_v21 = vmul.f32 %v4584_v14, %v1501_v28  ;;  %v1704_v28 = vmul.f32 %v4584_v14, %v1569_v0 }
 0x149   : > { %v4830_v27 = vpop.f32.mrb[47].mxu0  ;;  %v4832_v34 = vpop.f32.mrb[47].mxu1 }
 0x14b   : > { %1914 = vadd.xlane.f32.xlu1 %v1698_v18  ;;  %1904 = vadd.xlane.f32.xlu0 %v1693_v19  ;;  %v1630_v19 = vmul.f32 %v4584_v14, %v1495_v43  ;;  %v1700_v43 = vmul.f32 %v4584_v14, %v1565_v10  ;;  %v1632_v10 = vmul.f32 %v4584_v14, %v1497_v54  ;;  %v1567_v54 = vmax.f32 %v1297_v55, 0.0 }
 0x14c   : > { %v4835_v24 = vpop.f32.mrb[48].mxu0  ;;  %v4837_v42 = vpop.f32.mrb[48].mxu1 }
 0x14d   : > { %v4844_v25 = vpop.f32.mrb[49].mxu0  ;;  %v4846_v51 = vpop.f32.mrb[49].mxu1  ;;  %v1702_v55 = vmul.f32 %v4584_v14, %v1567_v54 }
 0x14e   : > { %5963 = vst [vmem:[#allocation3_spill] sm:$0xff] %v4844_v25 }
 0x14f   : > { %1792 = vadd.xlane.f32.xlu1 %v1637_v22  ;;  %1774 = vadd.xlane.f32.xlu0 %v1628_v17 }
 0x150   : > { %v4851_v44 = vpop.f32.mrb[50].mxu0  ;;  %v4853_v18 = vpop.f32.mrb[50].mxu1 }
 0x151   : > { %5964 = vst [vmem:[#allocation4_spill] sm:$0xff] %v4853_v18  ;;  %v4858_v25 = vpop.f32.mrb[51].mxu0  ;;  %v4860_v22 = vpop.f32.mrb[51].mxu1 }
 0x152   : > { %5965 = vst [vmem:[#allocation5_spill] sm:$0xff] %v4858_v25 }
 0x153   : > { %1920 = vadd.xlane.f32.xlu1 %v1701_v8  ;;  %1778 = vadd.xlane.f32.xlu0 %v1630_v19 }
 0x154   : > { %v4864_v17 = vpop.f32.mrb[52].mxu0  ;;  %v4866_v18 = vpop.f32.mrb[52].mxu1 }
 0x155   : > { %5966 = vst [vmem:[#allocation6_spill] sm:$0xff] %v4866_v18  ;;  %v4872_v25 = vpop.f32.mrb[53].mxu0  ;;  %v4874_v8 = vpop.f32.mrb[53].mxu1 }
 0x156   : > { %5967 = vst [vmem:[#allocation7_spill] sm:$0xff] %v4872_v25 }
 0x157   : > { %1918 = vadd.xlane.f32.xlu1 %v1700_v43  ;;  %1906 = vadd.xlane.f32.xlu0 %v1694_v41 }
 0x158   : > { %v4877_v19 = vpop.f32.mrb[54].mxu0  ;;  %v4879_v18 = vpop.f32.mrb[54].mxu1 }
 0x159   : > { %5968 = vst [vmem:[#allocation8_spill] sm:$0xff] %v4879_v18  ;;  %v4886_v25 = vpop.f32.mrb[55].mxu0  ;;  %v4888_v43 = vpop.f32.mrb[55].mxu1  ;;  %v1499_v18 = vmax.f32 %v957_v1, 0.0 }
 0x15a   : > { %5969 = vst [vmem:[#allocation9_spill] sm:$0xff] %v4886_v25  ;;  %5970 = vst [vmem:[#allocation10_spill] sm:$0xff] %v4888_v43  ;;  %v1696_v25 = vmul.f32 %v4584_v14, %v1561_v29  ;;  %v977_v29 = vadd.f32 %v4576_v6, %v4705_v39  ;;  %v1002_v39 = vadd.f32 %v4725_v58, %v4576_v6 }
 0x15b   : > { %1796 = vadd.xlane.f32.xlu1 %v1639_v36  ;;  %1782 = vadd.xlane.f32.xlu0 %v1632_v10  ;;  %v4904_v10 = vand.u32 127, %v2764_v35  ;;  %v987_v58 = vadd.f32 %v4576_v6, %v4718_v52  ;;  %v997_v52 = vadd.f32 %v4576_v6, %v4732_v4  ;;  %v1332_v4 = vadd.f32 %v4741_v11, %v4576_v6 }
 0x15c   : > { %v4893_v41 = vpop.f32.mrb[56].mxu0  ;;  %v4895_v16 = vpop.f32.mrb[56].mxu1  ;;  %v1007_v11 = vadd.f32 %v4576_v6, %v4746_v20 }
 0x15d   : > { %5971 = vst [vmem:[#allocation11_spill] sm:$0xff] %v4893_v41  ;;  %5972 = vst [vmem:[#allocation12_spill] sm:$0xff] %v4895_v16  ;;  %v4900_v43 = vpop.f32.mrb[57].mxu0  ;;  %v4902_v36 = vpop.f32.mrb[57].mxu1  ;;  %v2770_v53 = vadd.s32 4294967288, %v4904_v10  ;;  %v2784_v54 = vadd.s32 4294967272, %v4904_v10 }
 0x15e   : > { %5973 = vst [vmem:[#allocation13_spill] sm:$0xff] %v4900_v43  ;;  %5974 = vst [vmem:[#allocation14_spill] sm:$0xff] %v4902_v36  ;;  %v1634_v36 = vmul.f32 %v4584_v14, %v1499_v18  ;;  %v2777_v18 = vadd.s32 4294967280, %v4904_v10  ;;  %v1505_v41 = vmax.f32 %v987_v58, 0.0 }
 0x15f   : > { %1924 = vadd.xlane.f32.xlu1 %v1703_v59  ;;  %1910 = vadd.xlane.f32.xlu0 %v1696_v25  ;;  %v4920_v25 = vshrl.u32 %v2764_v35, 7 }
 0x160   : > { %v4908_v16 = vpop.f32.mrb[58].mxu0  ;;  %v4910_v1 = vpop.f32.mrb[58].mxu1  ;;  %v1640_v20 = vmul.f32 %v4584_v14, %v1505_v41 }
 0x161   : > { %5975 = vst [vmem:[#allocation15_spill] sm:$0xff] %v4908_v16  ;;  %5976 = vst [vmem:[#allocation16_spill] sm:$0xff] %v4910_v1  ;;  %v4916_v43 = vpop.f32.mrb[59].mxu0  ;;  %v4918_v59 = vpop.f32.mrb[59].mxu1  ;;  %v2798_v1 = vadd.s32 4294967256, %v4904_v10  ;;  %v4943_v16 = vsub.s32 %v2770_v53, %v4920_v25  ;;  %v1317_v53 = vadd.f32 %v4576_v6, %v4734_v5 }
 0x162   : > { %5977 = vst [vmem:[#allocation17_spill] sm:$0xff] %v4916_v43  ;;  %5978 = vst [vmem:[#allocation18_spill] sm:$0xff] %v4918_v59  ;;  %v1503_v59 = vmax.f32 %v977_v29, 0.0  ;;  %v2791_v29 = vadd.s32 4294967264, %v4904_v10 }
 0x163   : > { %1922 = vadd.xlane.f32.xlu1 %v1702_v55  ;;  %1786 = vadd.xlane.f32.xlu0 %v1634_v36  ;;  %v1312_v36 = vadd.f32 %v4713_v47, %v4576_v6  ;;  %v1508_v47 = vmax.f32 %v1002_v39, 0.0  ;;  %v1571_v58 = vmax.f32 %v1317_v53, 0.0 }
 0x164   : > { %v4929_v43 = vpop.f32.mrb[60].mxu1  ;;  %v4931_v35 = vpop.f32.mrb[60].mxu0 }
 0x165   : > { %5979 = vst [vmem:[#allocation19_spill] sm:$0xff] %v4929_v43  ;;  %5980 = vst [vmem:[#allocation20_spill] sm:$0xff] %v4931_v35  ;;  %v4936_v46 = vpop.f32.mrb[61].mxu1  ;;  %v4938_v55 = vpop.f32.mrb[61].mxu0  ;;  %v4947_v43 = vsub.s32 %v4904_v10, %v4920_v25  ;;  %v4961_v35 = vsub.s32 %v2777_v18, %v4920_v25 }
 0x166   : > { %5981 = vst [vmem:[#allocation21_spill] sm:$0xff] %v4936_v46  ;;  %5982 = vst [vmem:[#allocation22_spill] sm:$0xff] %v4938_v55  ;;  %v1322_v55 = vadd.f32 %v4727_v61, %v4576_v6  ;;  %v4954_v46 = vsub.s32 %v2784_v54, %v4920_v25  ;;  %v1570_v61 = vmax.f32 %v1312_v36, 0.0  ;;  %v1638_v54 = vmul.f32 %v4584_v14, %v1503_v59 }
 0x167   : > { %1800 = vadd.xlane.f32.xlu1 %v1641_v40  ;;  %1790 = vadd.xlane.f32.xlu0 %v1636_v21  ;;  %v4964_v40 = vsub.s32 %v2798_v1, %v4920_v25  ;;  %v1012_v21 = vadd.f32 %v4739_v2, %v4576_v6  ;;  %v4980_v1 = vsub.s32 %v2791_v29, %v4920_v25  ;;  %v2805_v36 = vadd.s32 4294967248, %v4904_v10 }
 0x168   : > { %v4966_v39 = vpop.f32.mrb[62].mxu0  ;;  %v4968_v0 = vpop.f32.mrb[62].mxu1  ;;  %v1572_v59 = vmax.f32 %v1322_v55, 0.0  ;;  %v1643_v2 = vmul.f32 %v4584_v14, %v1508_v47  ;;  %v1022_v29 = vadd.f32 %v4753_v30, %v4576_v6  ;;  %v1574_v55 = vmax.f32 %v1332_v4, 0.0 }
 0x169   : > { %5983 = vst [vmem:[#allocation23_spill] sm:$0xff] %v4966_v39  ;;  %5984 = vst [vmem:[#allocation24_spill] sm:$0xff] %v4968_v0  ;;  %v4975_v5 = vpop.f32.mrb[63].mxu0  ;;  %v4977_v18 = vpop.f32.mrb[63].mxu1  ;;  %v2812_v39 = vadd.s32 4294967240, %v4904_v10  ;;  %v1327_v0 = vadd.f32 %v4576_v6, %v4748_v26  ;;  %v1017_v47 = vadd.f32 %v4576_v6, %v4760_v37  ;;  %v1337_v26 = vadd.f32 %v4576_v6, %v4762_v38 }
 0x16a   : > { %5985 = vst [vmem:[#allocation25_spill] sm:$0xff] %v4975_v5  ;;  %5986 = vst [vmem:[#allocation26_spill] sm:$0xff] %v4977_v18  ;;  %v1507_v18 = vmax.f32 %v997_v52, 0.0  ;;  %v1342_v5 = vadd.f32 %v4755_v31, %v4576_v6  ;;  %v5003_v30 = vsub.s32 %v2805_v36, %v4920_v25  ;;  %v1509_v31 = vmax.f32 %v1007_v11, 0.0 }
 0x16b   : > { %1926 = vadd.xlane.f32.xlu1 %v1704_v28  ;;  %1794 = vadd.xlane.f32.xlu0 %v1638_v54  ;;  %v1705_v28 = vmul.f32 %v4584_v14, %v1570_v61  ;;  %v1510_v54 = vmax.f32 %v1012_v21, 0.0  ;;  %v5000_v52 = vsub.s32 %v2812_v39, %v4920_v25  ;;  %v1707_v53 = vmul.f32 %v4584_v14, %v1572_v59 }
 0x16c   : > { %v1573_v61 = vmax.f32 %v1327_v0, 0.0  ;;  %v2826_v37 = vadd.s32 4294967224, %v4904_v10  ;;  %v1642_v41 = vmul.f32 %v4584_v14, %v1507_v18  ;;  %v1512_v21 = vmax.f32 %v1022_v29, 0.0 }
 0x16d   : > { %v1706_v38 = vmul.f32 %v4584_v14, %v1571_v58  ;;  %v1576_v39 = vmax.f32 %v1342_v5, 0.0  ;;  %v1645_v4 = vmul.f32 %v4584_v14, %v1510_v54  ;;  %v1511_v36 = vmax.f32 %v1017_v47, 0.0 }
 0x16e   : > { %v1032_v11 = vadd.f32 %v4769_v48, %v4576_v6  ;;  %v1575_v59 = vmax.f32 %v1337_v26, 0.0  ;;  %v1352_v0 = vadd.f32 %v4767_v45, %v4576_v6  ;;  %v2840_v18 = vadd.s32 4294967208, %v4904_v10 }
 0x16f   : > { %1804 = vadd.xlane.f32.xlu1 %v1643_v2  ;;  %1928 = vadd.xlane.f32.xlu0 %v1705_v28  ;;  %v1709_v2 = vmul.f32 %v4584_v14, %v1574_v55  ;;  %v1027_v28 = vadd.f32 %v4576_v6, %v4776_v57  ;;  %v1708_v5 = vmul.f32 %v4584_v14, %v1573_v61  ;;  %v2819_v48 = vadd.s32 4294967232, %v4904_v10 }
 0x170   : > { %v1644_v58 = vmul.f32 %v4584_v14, %v1509_v31  ;;  %v5023_v29 = vsub.s32 %v2826_v37, %v4920_v25  ;;  %v5027_v54 = vmul.f32 %v4584_v14, %v1512_v21  ;;  %v1347_v45 = vadd.f32 %v4576_v6, %v4774_v56 }
 0x171   : > { %v5032_v57 = vmul.f32 %v4584_v14, %v1576_v39  ;;  %v1042_v55 = vadd.f32 %v4781_v15, %v4576_v6  ;;  %v5037_v47 = vmul.f32 %v4584_v14, %v1511_v36  ;;  %v1037_v26 = vadd.f32 %v4576_v6, %v4788_v50 }
 0x172   : > { %v1362_v31 = vadd.f32 %v4783_v63, %v4576_v6  ;;  %v1513_v61 = vmax.f32 %v1027_v28, 0.0  ;;  %v5044_v56 = vmul.f32 %v4584_v14, %v1575_v59  ;;  %v5047_v37 = vsub.s32 %v2840_v18, %v4920_v25 }
 0x173   : > { %1932 = vadd.xlane.f32.xlu1 %v1707_v53  ;;  %1798 = vadd.xlane.f32.xlu0 %v1640_v20  ;;  %v1514_v20 = vmax.f32 %v1032_v11, 0.0  ;;  %v1578_v53 = vmax.f32 %v1352_v0, 0.0  ;;  %v5050_v15 = vstv %s5006_s13  ;;  %v1052_v21 = vadd.f32 %v4793_v9, %v4576_v6 }
 0x174   : > { %v1357_v50 = vadd.f32 %v4576_v6, %v4790_v23  ;;  %v5057_v63 = vsub.s32 %v2819_v48, %v4920_v25  ;;  %v1577_v39 = vmax.f32 %v1347_v45, 0.0  ;;  %v1516_v36 = vmax.f32 %v1042_v55, 0.0 }
 0x175   : > { %v1372_v11 = vadd.f32 %v4795_v3, %v4576_v6  ;;  %v2854_v59 = vadd.s32 4294967192, %v4904_v10  ;;  %v1580_v0 = vmax.f32 %v1362_v31, 0.0  ;;  %v1047_v9 = vadd.f32 %v4576_v6, %v4802_v33 }
 0x176   : > { %v5068_v23 = vmul.f32 %v4584_v14, %v1578_v53  ;;  %v5071_v28 = vmul.f32 %v4584_v14, %v1513_v61  ;;  %v1062_v18 = vadd.f32 %v4809_v60, %v4576_v6  ;;  %v1367_v3 = vadd.f32 %v4576_v6, %v4804_v12 }
 0x177   : > { %1808 = vadd.xlane.f32.xlu1 %v1645_v4  ;;  %1802 = vadd.xlane.f32.xlu0 %v1642_v41  ;;  %v1515_v4 = vmax.f32 %v1037_v26, 0.0  ;;  %v5063_v41 = vmul.f32 %v4584_v14, %v1514_v20  ;;  %v1518_v48 = vmax.f32 %v1052_v21, 0.0  ;;  %v1579_v45 = vmax.f32 %v1357_v50, 0.0 }
 0x178   : > { %v1382_v55 = vadd.f32 %v4811_v13, %v4576_v6  ;;  %v2868_v33 = vadd.s32 4294967176, %v4904_v10  ;;  %v5081_v20 = vmul.f32 %v4584_v14, %v1516_v36  ;;  %v1582_v26 = vmax.f32 %v1372_v11, 0.0 }
 0x179   : > { %v5084_v31 = vmul.f32 %v4584_v14, %v1577_v39  ;;  %v5087_v60 = vsub.s32 %v2854_v59, %v4920_v25  ;;  %v1517_v12 = vmax.f32 %v1047_v9, 0.0  ;;  %v5095_v13 = vmul.f32 %v4584_v14, %v1515_v4 }
 0x17a   : > { %v1520_v53 = vmax.f32 %v1062_v18, 0.0  ;;  %v1057_v61 = vadd.f32 %v4576_v6, %v4816_v49  ;;  %v1581_v21 = vmax.f32 %v1367_v3, 0.0  ;;  %v2833_v50 = vadd.s32 4294967216, %v4904_v10 }
 0x17b   : > { %1936 = vadd.xlane.f32.xlu1 %v1709_v2  ;;  %1930 = vadd.xlane.f32.xlu0 %v1706_v38  ;;  %v1377_v38 = vadd.f32 %v4576_v6, %v4818_v62  ;;  %v5092_v2 = vmul.f32 %v4584_v14, %v1580_v0  ;;  %v5101_v39 = vmul.f32 %v4584_v14, %v1518_v48  ;;  %v1584_v36 = vmax.f32 %v1382_v55, 0.0 }
 0x17c   : > { %v5104_v62 = vmul.f32 %v4584_v14, %v1579_v45  ;;  %v5107_v11 = vsub.s32 %v2868_v33, %v4920_v25  ;;  %v1072_v49 = vadd.f32 %v4822_v32, %v4576_v6  ;;  %v1067_v0 = vadd.f32 %v4576_v6, %v4830_v27  ;;  %v5137_v33 = vld [vmem:[%s5957_s2] ss:$0 sm:$0xff] }
 0x17d   : > { %v1583_v3 = vmax.f32 %v1377_v38, 0.0  ;;  %v5121_v48 = vmul.f32 %v4584_v14, %v1517_v12  ;;  %v1519_v45 = vmax.f32 %v1057_v61, 0.0  ;;  %v5124_v32 = vmul.f32 %v4584_v14, %v1520_v53 }
 0x17e   : > { %5987 = vst [vmem:[#allocation27_spill] sm:$0xff] %v5107_v11  ;;  %v5127_v27 = vmul.f32 %v4584_v14, %v1581_v21  ;;  %v5142_v12 = vmul.f32 %v4584_v14, %v1584_v36  ;;  %v1522_v61 = vmax.f32 %v1072_v49, 0.0  ;;  %v1521_v21 = vmax.f32 %v1067_v0, 0.0  ;;  %v5988_v36 = vld [vmem:[#allocation3_spill] sm:$0xff] }
 0x17f   : > { %1934 = vadd.xlane.f32.xlu1 %v1708_v5  ;;  %1806 = vadd.xlane.f32.xlu0 %v1644_v58  ;;  %v1392_v5 = vadd.f32 %v4824_v7, %v4576_v6  ;;  %v5116_v58 = vmul.f32 %v4584_v14, %v1582_v26  ;;  %v5130_v6 = vsub.s32 %v2833_v50, %v4920_v25 }
 0x180   : > { %v1869_v59 = vpop.xlane.xlu1 %1868  ;;  %v1741_v4 = vpop.xlane.xlu0 %1740  ;;  %v1387_v26 = vadd.f32 %v5137_v33, %v4832_v34  ;;  %v1402_v34 = vadd.f32 %v5137_v33, %v4837_v42  ;;  %v1077_v49 = vadd.f32 %v5137_v33, %v5988_v36 }
 0x181   : > { %v2061_v9 = vadd.f32 %v5050_v15, %v1869_v59  ;;  %v1997_v18 = vadd.f32 %v5050_v15, %v1741_v4  ;;  %v1586_v50 = vmax.f32 %v1392_v5, 0.0  ;;  %v5151_v4 = vld [vmem:[%s5958_s3] ss:$0 sm:$0xff] }
 0x182   : > { %v5154_v14 = vmul.f32 %v5151_v4, %v1583_v3  ;;  %v5163_v0 = vmul.f32 %v5151_v4, %v1519_v45 }
 0x183   : > { %v2189_v7 = vmul.f32 0.5, %v2061_v9  ;;  %v2125_v55 = vmul.f32 0.5, %v1997_v18  ;;  %1812 = vadd.xlane.f32.xlu1 %v5027_v54  ;;  %1810 = vadd.xlane.f32.xlu0 %v5037_v47  ;;  %v1082_v54 = vadd.f32 %v5137_v33, %v4835_v24  ;;  %v1397_v24 = vadd.f32 %v5137_v33, %v4846_v51 }
 0x184   : > { %v1745_v38 = vpop.xlane.xlu1 %1744  ;;  %v1739_v53 = vpop.xlane.xlu0 %1738  ;;  %v1585_v18 = vmax.f32 %v1387_v26, 0.0  ;;  %v5174_v51 = vmul.f32 %v5151_v4, %v1586_v50  ;;  %v5989_v50 = vld [vmem:[#allocation4_spill] sm:$0xff] }
 0x185   : > { %v1999_v47 = vadd.f32 %v5050_v15, %v1745_v38  ;;  %v1996_v59 = vadd.f32 %v5050_v15, %v1739_v53  ;;  %3989 = vtanh.f32 %v2125_v55  ;;  %v5168_v55 = vmul.f32 %v5151_v4, %v1521_v21 }
 0x186   : > { %3991 = vtanh.f32 %v2189_v7  ;;  %v5171_v38 = vmul.f32 %v5151_v4, %v1522_v61  ;;  %v1524_v45 = vmax.f32 %v1082_v54, 0.0  ;;  %v1588_v53 = vmax.f32 %v1402_v34, 0.0 }
 0x187   : > { %v2127_v5 = vmul.f32 0.5, %v1999_v47  ;;  %v2124_v9 = vmul.f32 0.5, %v1996_v59  ;;  %1940 = vadd.xlane.f32.xlu1 %v5032_v57  ;;  %1938 = vadd.xlane.f32.xlu0 %v5044_v56  ;;  %v1523_v56 = vmax.f32 %v1077_v49, 0.0  ;;  %v1587_v26 = vmax.f32 %v1397_v24, 0.0  ;;  %v5990_v24 = vld [vmem:[#allocation5_spill] sm:$0xff] }
 0x188   : > { %v1873_v3 = vpop.xlane.xlu1 %1872  ;;  %v1867_v42 = vpop.xlane.xlu0 %1866  ;;  %v1092_v21 = vadd.f32 %v5137_v33, %v4851_v44  ;;  %v5183_v61 = vmul.f32 %v5151_v4, %v1585_v18  ;;  %v1412_v54 = vadd.f32 %v5137_v33, %v5989_v50  ;;  %v5188_v49 = vmul.f32 %v5151_v4, %v1524_v45 }
 0x189   : > { %3993 = vtanh.f32 %v2127_v5  ;;  %v2063_v7 = vadd.f32 %v5050_v15, %v1873_v3  ;;  %v2060_v57 = vadd.f32 %v5050_v15, %v1867_v42  ;;  %v1087_v44 = vadd.f32 %v5137_v33, %v5990_v24 }
 0x18a   : > { %3995 = vtanh.f32 %v2124_v9  ;;  %v1407_v5 = vadd.f32 %v5137_v33, %v4860_v22  ;;  %v5198_v18 = vmul.f32 %v5151_v4, %v1588_v53  ;;  %v5201_v3 = vmul.f32 %v5151_v4, %v1523_v56 }
 0x18b   : > { %v2191_v47 = vmul.f32 0.5, %v2063_v7  ;;  %v2188_v59 = vmul.f32 0.5, %v2060_v57  ;;  %1816 = vadd.xlane.f32.xlu1 %v5063_v41  ;;  %1944 = vadd.xlane.f32.xlu0 %v5068_v23  ;;  %v2847_v41 = vadd.s32 4294967200, %v4904_v10  ;;  %v5204_v42 = vmul.f32 %v5151_v4, %v1587_v26 }
 0x18c   : > { %v1743_v36 = vpop.xlane.xlu1 %1742  ;;  %v1871_v34 = vpop.xlane.xlu0 %1870  ;;  %v1526_v45 = vmax.f32 %v1092_v21, 0.0  ;;  %v1590_v57 = vmax.f32 %v1412_v54, 0.0  ;;  %v1525_v56 = vmax.f32 %v1087_v44, 0.0 }
 0x18d   : > { %3997 = vtanh.f32 %v2191_v47  ;;  %v1998_v23 = vadd.f32 %v5050_v15, %v1743_v36  ;;  %v2062_v9 = vadd.f32 %v5050_v15, %v1871_v34  ;;  %v1102_v47 = vadd.f32 %v5137_v33, %v4864_v17  ;;  %v5991_v34 = vld [vmem:[#allocation6_spill] sm:$0xff] }
 0x18e   : > { %3999 = vtanh.f32 %v2188_v59  ;;  %v1589_v36 = vmax.f32 %v1407_v5, 0.0  ;;  %v1422_v26 = vadd.f32 %v5137_v33, %v5991_v34  ;;  %v5213_v21 = vsub.s32 %v2847_v41, %v4920_v25 }
 0x18f   : > { %v2126_v7 = vmul.f32 0.5, %v1998_v23  ;;  %v2190_v22 = vmul.f32 0.5, %v2062_v9  ;;  %1820 = vadd.xlane.f32.xlu1 %v5081_v20  ;;  %1814 = vadd.xlane.f32.xlu0 %v5071_v28  ;;  %v3990_v53 = vpop.eup %3989  ;;  %v5218_v17 = vmul.f32 %v5151_v4, %v1526_v45  ;;  %v5993_v23 = vld [vmem:[#allocation7_spill] sm:$0xff]  ;;  %v5226_v5 = vadd.f32 %v5137_v33, %v4874_v8 }
 0x190   : > { %v1749_v59 = vpop.xlane.xlu1 %1748  ;;  %v1747_v50 = vpop.xlane.xlu0 %1746  ;;  %5992 = vst [vmem:[#allocation3_spill] sm:$0xff] %v5213_v21  ;;  %v2381_v20 = vmul.f32 0.5, %v3990_v53  ;;  %v5222_v44 = vadd.f32 %v5137_v33, %v5993_v23  ;;  %v5234_v11 = vmul.f32 %v5151_v4, %v1525_v56  ;;  %v5237_v8 = vmul.f32 %v5151_v4, %v1589_v36 }
 0x191   : > { %v3992_v24 = vpop.eup %3991  ;;  %4001 = vtanh.f32 %v2126_v7  ;;  %v2001_v28 = vadd.f32 %v5050_v15, %v1749_v59  ;;  %v2000_v54 = vadd.f32 %v5050_v15, %v1747_v50  ;;  %v1528_v7 = vmax.f32 %v1102_v47, 0.0 }
 0x192   : > { %4003 = vtanh.f32 %v2190_v22  ;;  %v5231_v22 = vmul.f32 %v5151_v4, %v1590_v57  ;;  %v2445_v59 = vmul.f32 0.5, %v3992_v24  ;;  %v2509_v50 = vadd.f32 0.5, %v2381_v20 }
 0x193   : > { %v3994_v41 = vpop.eup %3993  ;;  %v2129_v9 = vmul.f32 0.5, %v2001_v28  ;;  %v2128_v53 = vmul.f32 0.5, %v2000_v54  ;;  %1824 = vadd.xlane.f32.xlu1 %v5101_v39  ;;  %1942 = vadd.xlane.f32.xlu0 %v5084_v31  ;;  %v1592_v31 = vmax.f32 %v1422_v26, 0.0  ;;  %v5246_v36 = vmul.f32 %v5151_v4, %v1528_v7 }
 0x194   : > { %v3996_v45 = vpop.eup %3995  ;;  %v1877_v34 = vpop.xlane.xlu1 %1876  ;;  %v2383_v54 = vmul.f32 0.5, %v3994_v41 }
 0x195   : > { %v1875_v23 = vpop.xlane.xlu0 %1874  ;;  %v2380_v28 = vmul.f32 0.5, %v3996_v45  ;;  %4005 = vtanh.f32 %v2129_v9  ;;  %v2065_v39 = vadd.f32 %v5050_v15, %v1877_v34  ;;  %v2573_v9 = vadd.f32 0.5, %v2445_v59 }
 0x196   : > { %4007 = vtanh.f32 %v2128_v53  ;;  %v2064_v57 = vadd.f32 %v5050_v15, %v1875_v23  ;;  %v2774_v53 = vrot.slane %v2509_v50, %v4943_v16  ;;  %v5253_v7 = vmul.f32 %v5151_v4, %v1592_v31 }
 0x197   : > { %v3998_v20 = vpop.eup %3997  ;;  %v2508_v21 = vadd.f32 0.5, %v2380_v28  ;;  %v2193_v56 = vmul.f32 0.5, %v2065_v39  ;;  %1828 = vadd.xlane.f32.xlu1 %v5124_v32  ;;  %1948 = vadd.xlane.f32.xlu0 %v5092_v2  ;;  %v5257_v59 = vadd.f32 %v5137_v33, %v4877_v19  ;;  %v2511_v39 = vadd.f32 0.5, %v2383_v54 }
 0x198   : > { %v4000_v26 = vpop.eup %3999  ;;  %v2447_v45 = vmul.f32 0.5, %v3998_v20  ;;  %v2192_v34 = vmul.f32 0.5, %v2064_v57  ;;  %v1753_v23 = vpop.xlane.xlu1 %1752 }
 0x199   : > { %v1751_v24 = vpop.xlane.xlu0 %1750  ;;  %v2769_v41 = vrot.slane %v2508_v21, %v4947_v43  ;;  %v2444_v28 = vmul.f32 0.5, %v4000_v26  ;;  %4009 = vtanh.f32 %v2193_v56  ;;  %v2003_v32 = vadd.f32 %v5050_v15, %v1753_v23 }
 0x19a   : > { %4011 = vtanh.f32 %v2192_v34  ;;  %v2002_v2 = vadd.f32 %v5050_v15, %v1751_v24  ;;  %v3119_v24 = vrot.slane %v2573_v9, %v4943_v16  ;;  %v2575_v26 = vadd.f32 0.5, %v2447_v45 }
 0x19b   : > { %v4002_v50 = vpop.eup %4001  ;;  %v2776_v57 = vsel %vm2775_vm1, %v2774_v53, %v2769_v41  ;;  %v2572_v20 = vadd.f32 0.5, %v2444_v28  ;;  %v2131_v21 = vmul.f32 0.5, %v2003_v32  ;;  %1832 = vadd.xlane.f32.xlu1 %v5171_v38  ;;  %1818 = vadd.xlane.f32.xlu0 %v5095_v13  ;;  %v5994_v38 = vld [vmem:[#allocation8_spill] sm:$0xff]  ;;  %v2788_v28 = vrot.slane %v2511_v39, %v4954_v46 }
 0x19c   : > { %v4004_v56 = vpop.eup %4003  ;;  %v2382_v31 = vmul.f32 0.5, %v4002_v50  ;;  %v2130_v34 = vmul.f32 0.5, %v2002_v2  ;;  %v1881_v23 = vpop.xlane.xlu1 %1880  ;;  %v5268_v9 = vadd.f32 %v5137_v33, %v5994_v38 }
 0x19d   : > { %v1879_v19 = vpop.xlane.xlu0 %1878  ;;  %v3115_v47 = vrot.slane %v2572_v20, %v4947_v43  ;;  %v2446_v54 = vmul.f32 0.5, %v4004_v56  ;;  %4013 = vtanh.f32 %v2131_v21  ;;  %v2067_v53 = vadd.f32 %v5050_v15, %v1881_v23 }
 0x19e   : > { %v2510_v41 = vadd.f32 0.5, %v2382_v31  ;;  %4015 = vtanh.f32 %v2130_v34  ;;  %v2066_v13 = vadd.f32 %v5050_v15, %v1879_v19  ;;  %v3129_v21 = vrot.slane %v2575_v26, %v4954_v46 }
 0x19f   : > { %v4006_v45 = vpop.eup %4005  ;;  %v3120_v32 = vsel %vm2775_vm1, %v3119_v24, %v3115_v47  ;;  %v2574_v2 = vadd.f32 0.5, %v2446_v54  ;;  %v2195_v50 = vmul.f32 0.5, %v2067_v53  ;;  %1960 = vadd.xlane.f32.xlu1 %v5174_v51  ;;  %1946 = vadd.xlane.f32.xlu0 %v5104_v62 }
 0x1a0   : > { %v4008_v20 = vpop.eup %4007  ;;  %v2781_v56 = vrot.slane %v2510_v41, %v4961_v35  ;;  %v2385_v31 = vmul.f32 0.5, %v4006_v45  ;;  %v2194_v34 = vmul.f32 0.5, %v2066_v13  ;;  %v1757_v23 = vpop.xlane.xlu1 %1756 }
 0x1a1   : > { %v1885_v19 = vpop.xlane.xlu0 %1884  ;;  %v3124_v38 = vrot.slane %v2574_v2, %v4961_v35  ;;  %v2384_v39 = vmul.f32 0.5, %v4008_v20  ;;  %4017 = vtanh.f32 %v2195_v50  ;;  %v2005_v47 = vadd.f32 %v5050_v15, %v1757_v23 }
 0x1a2   : > { %v2783_v24 = vsel %vm2782_vm2, %v2781_v56, %v2776_v57  ;;  %v2513_v51 = vadd.f32 0.5, %v2385_v31  ;;  %4019 = vtanh.f32 %v2194_v34  ;;  %v2069_v62 = vadd.f32 %v5050_v15, %v1885_v19 }
 0x1a3   : > { %v4010_v54 = vpop.eup %4009  ;;  %v3125_v26 = vsel %vm2782_vm2, %v3124_v38, %v3120_v32  ;;  %v2790_v53 = vsel %vm2789_vm3, %v2788_v28, %v2783_v24  ;;  %v2512_v41 = vadd.f32 0.5, %v2384_v39  ;;  %v2133_v13 = vmul.f32 0.5, %v2005_v47  ;;  %1958 = vadd.xlane.f32.xlu1 %v5183_v61  ;;  %1952 = vadd.xlane.f32.xlu0 %v5116_v58  ;;  %v5997_v38 = vld [vmem:[#allocation9_spill] sm:$0xff] }
 0x1a4   : > { %v4012_v45 = vpop.eup %4011  ;;  %v2802_v2 = vrot.slane %v2513_v51, %v4964_v40  ;;  %v2449_v50 = vmul.f32 0.5, %v4010_v54  ;;  %v3130_v57 = vsel %vm2789_vm3, %v3129_v21, %v3125_v26  ;;  %v1761_v20 = vpop.xlane.xlu1 %1760  ;;  %v5995_v31 = vmax.f32 %v5222_v44, 0.0 }
 0x1a5   : > { %v1755_v56 = vpop.xlane.xlu0 %1754  ;;  %v2795_v28 = vrot.slane %v2512_v41, %v4980_v1  ;;  %v2448_v34 = vmul.f32 0.5, %v4012_v45  ;;  %4021 = vtanh.f32 %v2133_v13  ;;  %v2197_v61 = vmul.f32 0.5, %v2069_v62  ;;  %v5998_v62 = vld [vmem:[#allocation10_spill] sm:$0xff] }
 0x1a6   : > { %v5289_v32 = vmul.f32 %v5151_v4, %v5995_v31  ;;  %v2577_v58 = vadd.f32 0.5, %v2449_v50  ;;  %v2004_v23 = vadd.f32 %v5050_v15, %v1755_v56  ;;  %v5996_v19 = vmax.f32 %v5226_v5, 0.0 }
 0x1a7   : > { %v5300_v44 = vadd.f32 %v5137_v33, %v5997_v38  ;;  %v4014_v39 = vpop.eup %4013  ;;  %v2797_v47 = vsel %vm2796_vm4, %v2795_v28, %v2790_v53  ;;  %v2576_v24 = vadd.f32 0.5, %v2448_v34  ;;  %1836 = vadd.xlane.f32.xlu1 %v5188_v49  ;;  %1822 = vadd.xlane.f32.xlu0 %v5121_v48  ;;  %v1530_v51 = vmax.f32 %v5257_v59, 0.0 }
 0x1a8   : > { %v5296_v21 = vmul.f32 %v5151_v4, %v5996_v19  ;;  %v1427_v5 = vadd.f32 %v5137_v33, %v5998_v62  ;;  %v4016_v54 = vpop.eup %4015  ;;  %v3139_v26 = vrot.slane %v2577_v58, %v4964_v40  ;;  %v2387_v41 = vmul.f32 0.5, %v4014_v39  ;;  %v1765_v50 = vpop.xlane.xlu1 %1764 }
 0x1a9   : > { %v2804_v13 = vsel %vm2803_vm5, %v2802_v2, %v2797_v47  ;;  %v2132_v45 = vmul.f32 0.5, %v2004_v23  ;;  %v1883_v56 = vpop.xlane.xlu0 %1882  ;;  %v3134_v53 = vrot.slane %v2576_v24, %v4980_v1  ;;  %v2386_v31 = vmul.f32 0.5, %v4016_v54  ;;  %v5999_v54 = vld [vmem:[#allocation11_spill] sm:$0xff] }
 0x1aa   : > { %4023 = vtanh.f32 %v2197_v61  ;;  %v2007_v48 = vadd.f32 %v5050_v15, %v1761_v20  ;;  %v2515_v49 = vadd.f32 0.5, %v2387_v41  ;;  %v2068_v59 = vadd.f32 %v5050_v15, %v1883_v56 }
 0x1ab   : > { %4025 = vtanh.f32 %v2132_v45  ;;  %v1594_v28 = vmax.f32 %v5268_v9, 0.0  ;;  %v4018_v34 = vpop.eup %4017  ;;  %v3135_v58 = vsel %vm2796_vm4, %v3134_v53, %v3130_v57  ;;  %v2514_v19 = vadd.f32 0.5, %v2386_v31  ;;  %1964 = vadd.xlane.f32.xlu1 %v5198_v18  ;;  %1950 = vadd.xlane.f32.xlu0 %v5127_v27  ;;  %v6000_v31 = vld [vmem:[#allocation12_spill] sm:$0xff] }
 0x1ac   : > { %v1529_v2 = vmax.f32 %v5300_v44, 0.0  ;;  %v2861_v61 = vadd.s32 4294967184, %v4904_v10  ;;  %v4020_v23 = vpop.eup %4019  ;;  %v2816_v20 = vrot.slane %v2515_v49, %v5000_v52  ;;  %v2451_v38 = vmul.f32 0.5, %v4018_v34  ;;  %v5321_v9 = vpop.xlane.xlu1 %1768 }
 0x1ad   : > { %v3140_v39 = vsel %vm2803_vm5, %v3139_v26, %v3135_v58  ;;  %v2196_v47 = vmul.f32 0.5, %v2068_v59  ;;  %v1889_v24 = vpop.xlane.xlu0 %1888  ;;  %v2809_v57 = vrot.slane %v2514_v19, %v5003_v30  ;;  %v2450_v62 = vmul.f32 0.5, %v4020_v23 }
 0x1ae   : > { %v2135_v18 = vmul.f32 0.5, %v2007_v48  ;;  %v1122_v27 = vadd.f32 %v5137_v33, %v5999_v54  ;;  %v2579_v44 = vadd.f32 0.5, %v2451_v38  ;;  %v2071_v10 = vadd.f32 %v5050_v15, %v1889_v24 }
 0x1af   : > { %4027 = vtanh.f32 %v2196_v47  ;;  %v1593_v41 = vmax.f32 %v1427_v5, 0.0  ;;  %v4022_v45 = vpop.eup %4021  ;;  %v2811_v56 = vsel %vm2810_vm6, %v2809_v57, %v2804_v13  ;;  %v2578_v26 = vadd.f32 0.5, %v2450_v62  ;;  %1840 = vadd.xlane.f32.xlu1 %v5218_v17  ;;  %1956 = vadd.xlane.f32.xlu0 %v5142_v12  ;;  %v6001_v17 = vld [vmem:[#allocation13_spill] sm:$0xff] }
 0x1b0   : > { %v5331_v53 = vmul.f32 %v5151_v4, %v1530_v51  ;;  %v1442_v48 = vadd.f32 %v5137_v33, %v6000_v31  ;;  %v3149_v49 = vrot.slane %v2579_v44, %v5000_v52  ;;  %v2818_v59 = vsel %vm2817_vm7, %v2816_v20, %v2811_v56  ;;  %v5337_v5 = vpop.xlane.xlu1 %1772 }
 0x1b1   : > { %v1759_v34 = vpop.xlane.xlu0 %1758  ;;  %v5340_v13 = vmul.f32 %v5151_v4, %v1594_v28  ;;  %v1117_v12 = vadd.f32 %v5137_v33, %v6001_v17  ;;  %v3144_v51 = vrot.slane %v2578_v26, %v5003_v30  ;;  %4029 = vtanh.f32 %v2135_v18 }
 0x1b2   : > { %v2199_v58 = vmul.f32 0.5, %v2071_v10  ;;  %v1532_v19 = vmax.f32 %v1122_v27, 0.0  ;;  %v2389_v23 = vmul.f32 0.5, %v4022_v45  ;;  %v2006_v38 = vadd.f32 %v5050_v15, %v1759_v34  ;;  %v6002_v45 = vld [vmem:[#allocation14_spill] sm:$0xff]  ;;  %v6004_v34 = vld [vmem:[#allocation17_spill] sm:$0xff] }
 0x1b3   : > { %v5347_v20 = vmul.f32 %v5151_v4, %v1529_v2  ;;  %v5350_v47 = vmul.f32 %v5151_v4, %v1593_v41  ;;  %v3145_v24 = vsel %vm2810_vm6, %v3144_v51, %v3140_v39  ;;  %v2009_v57 = vadd.f32 %v5050_v15, %v1765_v50  ;;  %1968 = vadd.xlane.f32.xlu1 %v5231_v22 }
 0x1b4   : > { %v4024_v28 = vpop.eup %4023  ;;  %1826 = vadd.xlane.f32.xlu0 %v5163_v0  ;;  %v1596_v62 = vmax.f32 %v1442_v48, 0.0  ;;  %v5357_v18 = vsub.s32 %v2861_v61, %v4920_v25  ;;  %v3150_v2 = vsel %vm2817_vm7, %v3149_v49, %v3145_v24  ;;  %v2134_v27 = vmul.f32 0.5, %v2006_v38  ;;  %v5360_v44 = vpop.xlane.xlu1 %1898  ;;  %v6003_v0 = vld [vmem:[#allocation15_spill] sm:$0xff] }
 0x1b5   : > { %v4026_v54 = vpop.eup %4025  ;;  %v1887_v10 = vpop.xlane.xlu0 %1886  ;;  %v1531_v41 = vmax.f32 %v1117_v12, 0.0  ;;  %v1437_v39 = vadd.f32 %v5137_v33, %v6002_v45  ;;  %4031 = vtanh.f32 %v2199_v58  ;;  %v5365_v22 = vmul.f32 %v5151_v4, %v1532_v19 }
 0x1b6   : > { %v2388_v50 = vmul.f32 0.5, %v4026_v54  ;;  %v1132_v25 = vadd.f32 %v5137_v33, %v6003_v0  ;;  %v2517_v61 = vadd.f32 0.5, %v2389_v23  ;;  %v2453_v56 = vmul.f32 0.5, %v4024_v28  ;;  %v6005_v28 = vld [vmem:[#allocation16_spill] sm:$0xff] }
 0x1b7   : > { %4033 = vtanh.f32 %v2134_v27  ;;  %v2070_v26 = vadd.f32 %v5050_v15, %v1887_v10  ;;  %v2137_v48 = vmul.f32 0.5, %v2009_v57  ;;  %1844 = vadd.xlane.f32.xlu1 %v5246_v36  ;;  %v5373_v49 = vmul.f32 %v5151_v4, %v1596_v62  ;;  %v6006_v62 = vld [vmem:[#allocation18_spill] sm:$0xff] }
 0x1b8   : > { %v2516_v31 = vadd.f32 0.5, %v2388_v50  ;;  %1954 = vadd.xlane.f32.xlu0 %v5154_v14  ;;  %v1127_v17 = vadd.f32 %v5137_v33, %v6004_v34  ;;  %v5377_v58 = vpop.xlane.xlu1 %1776  ;;  %v5380_v23 = vmul.f32 %v5151_v4, %v1531_v41  ;;  %v1595_v38 = vmax.f32 %v1437_v39, 0.0 }
 0x1b9   : > { %v4028_v12 = vpop.eup %4027  ;;  %v2198_v51 = vmul.f32 0.5, %v2070_v26  ;;  %v1893_v19 = vpop.xlane.xlu0 %1892  ;;  %v1452_v36 = vadd.f32 %v5137_v33, %v6005_v28  ;;  %v1534_v57 = vmax.f32 %v1132_v25, 0.0  ;;  %v1447_v54 = vadd.f32 %v5137_v33, %v6006_v62 }
 0x1ba   : > { %v2823_v14 = vrot.slane %v2516_v31, %v5057_v63  ;;  %v2452_v24 = vmul.f32 0.5, %v4028_v12  ;;  %v2830_v27 = vrot.slane %v2517_v61, %v5023_v29  ;;  %v2581_v10 = vadd.f32 0.5, %v2453_v56 }
 0x1bb   : > { %4035 = vtanh.f32 %v2198_v51  ;;  %v2073_v45 = vadd.f32 %v5050_v15, %v1893_v19  ;;  %v4030_v50 = vpop.eup %4029  ;;  %1972 = vadd.xlane.f32.xlu1 %v5253_v7  ;;  %v1533_v0 = vmax.f32 %v1127_v17, 0.0  ;;  %v2011_v25 = vadd.f32 %v5050_v15, %v5321_v9  ;;  %v6007_v51 = vld [vmem:[#allocation19_spill] sm:$0xff] }
 0x1bc   : > { %v2825_v41 = vsel %vm2824_vm8, %v2823_v14, %v2818_v59  ;;  %4037 = vtanh.f32 %v2137_v48  ;;  %v2580_v39 = vadd.f32 0.5, %v2452_v24  ;;  %1830 = vadd.xlane.f32.xlu0 %v5168_v55  ;;  %v1903_v61 = vpop.xlane.xlu1 %1902  ;;  %v5396_v31 = vmul.f32 %v5151_v4, %v1595_v38  ;;  %v6008_v14 = vld [vmem:[#allocation20_spill] sm:$0xff] }
 0x1bd   : > { %v2832_v26 = vsel %vm2831_vm9, %v2830_v27, %v2825_v41  ;;  %v1763_v56 = vpop.xlane.xlu0 %1762  ;;  %v1598_v34 = vmax.f32 %v1452_v36, 0.0  ;;  %v2013_v7 = vadd.f32 %v5050_v15, %v5337_v5  ;;  %v2201_v48 = vmul.f32 0.5, %v2073_v45  ;;  %v6009_v41 = vld [vmem:[#allocation21_spill] sm:$0xff] }
 0x1be   : > { %v3154_v59 = vrot.slane %v2580_v39, %v5057_v63  ;;  %v5402_v55 = vmul.f32 %v5151_v4, %v1534_v57  ;;  %v3159_v9 = vrot.slane %v2581_v10, %v5023_v29  ;;  %v2391_v17 = vmul.f32 0.5, %v4030_v50 }
 0x1bf   : > { %v2008_v12 = vadd.f32 %v5050_v15, %v1763_v56  ;;  %v1462_v19 = vadd.f32 %v5137_v33, %v6007_v51  ;;  %v4032_v38 = vpop.eup %4031  ;;  %1848 = vadd.xlane.f32.xlu1 %v5331_v53  ;;  %v5412_v5 = vmul.f32 %v5151_v4, %v1533_v0  ;;  %v1597_v36 = vmax.f32 %v1447_v54, 0.0 }
 0x1c0   : > { %v3155_v28 = vsel %vm2824_vm8, %v3154_v59, %v3150_v2  ;;  %1834 = vadd.xlane.f32.xlu0 %v5201_v3  ;;  %v1142_v24 = vadd.f32 %v5137_v33, %v6008_v14  ;;  %v2139_v62 = vmul.f32 0.5, %v2011_v25  ;;  %v5417_v45 = vpop.xlane.xlu1 %1780  ;;  %v5420_v2 = vmul.f32 %v5151_v4, %v1598_v34 }
 0x1c1   : > { %v4034_v57 = vpop.eup %4033  ;;  %v3160_v27 = vsel %vm2831_vm9, %v3159_v9, %v3155_v28  ;;  %v2136_v10 = vmul.f32 0.5, %v2008_v12  ;;  %v1891_v50 = vpop.xlane.xlu0 %1890  ;;  %v2141_v53 = vmul.f32 0.5, %v2013_v7  ;;  %4039 = vtanh.f32 %v2201_v48 }
 0x1c2   : > { %v2390_v3 = vmul.f32 0.5, %v4034_v57  ;;  %v1457_v54 = vadd.f32 %v5137_v33, %v6009_v41  ;;  %v2519_v39 = vadd.f32 0.5, %v2391_v17  ;;  %v2455_v0 = vmul.f32 0.5, %v4032_v38  ;;  %v6010_v38 = vld [vmem:[#allocation22_spill] sm:$0xff] }
 0x1c3   : > { %4041 = vtanh.f32 %v2136_v10  ;;  %v2072_v25 = vadd.f32 %v5050_v15, %v1891_v50  ;;  %1976 = vadd.xlane.f32.xlu1 %v5340_v13  ;;  %v5428_v59 = vmul.f32 %v5151_v4, %v1597_v36  ;;  %v1600_v34 = vmax.f32 %v1462_v19, 0.0 }
 0x1c4   : > { %v2518_v56 = vadd.f32 0.5, %v2390_v3  ;;  %1962 = vadd.xlane.f32.xlu0 %v5204_v42  ;;  %v1536_v7 = vmax.f32 %v1142_v24, 0.0  ;;  %4043 = vtanh.f32 %v2139_v62  ;;  %v2076_v48 = vadd.f32 %v5050_v15, %v5360_v44  ;;  %v1909_v12 = vpop.xlane.xlu1 %1908 }
 0x1c5   : > { %v4036_v9 = vpop.eup %4035  ;;  %v2200_v17 = vmul.f32 0.5, %v2072_v25  ;;  %v1897_v51 = vpop.xlane.xlu0 %1896  ;;  %v1137_v28 = vadd.f32 %v5137_v33, %v6010_v38  ;;  %4045 = vtanh.f32 %v2141_v53  ;;  %v1599_v36 = vmax.f32 %v1457_v54, 0.0 }
 0x1c6   : > { %v4038_v14 = vpop.eup %4037  ;;  %v2837_v42 = vrot.slane %v2518_v56, %v5130_v6  ;;  %v2454_v13 = vmul.f32 0.5, %v4036_v9  ;;  %v2844_v19 = vrot.slane %v2519_v39, %v5047_v37  ;;  %v2583_v24 = vadd.f32 0.5, %v2455_v0  ;;  %v6011_v9 = vld [vmem:[#allocation23_spill] sm:$0xff] }
 0x1c7   : > { %4047 = vtanh.f32 %v2200_v17  ;;  %v2075_v57 = vadd.f32 %v5050_v15, %v1897_v51  ;;  %v2078_v10 = vadd.f32 %v5050_v15, %v1903_v61  ;;  %1974 = vadd.xlane.f32.xlu1 %v5350_v47  ;;  %v5442_v50 = vmul.f32 %v5151_v4, %v1600_v34 }
 0x1c8   : > { %v2839_v44 = vsel %vm2838_vm10, %v2837_v42, %v2832_v26  ;;  %v2582_v62 = vadd.f32 0.5, %v2454_v13  ;;  %1838 = vadd.xlane.f32.xlu0 %v5234_v11  ;;  %v2393_v53 = vmul.f32 0.5, %v4038_v14  ;;  %v2204_v3 = vmul.f32 0.5, %v2076_v48  ;;  %v5445_v54 = vpop.xlane.xlu1 %1784 }
 0x1c9   : > { %v2846_v41 = vsel %vm2845_vm11, %v2844_v19, %v2839_v44  ;;  %v1767_v39 = vpop.xlane.xlu0 %1766  ;;  %v5448_v26 = vmul.f32 %v5151_v4, %v1536_v7  ;;  %v2015_v47 = vadd.f32 %v5050_v15, %v5377_v58  ;;  %v2203_v11 = vmul.f32 0.5, %v2075_v57  ;;  %v6012_v58 = vld [vmem:[#allocation25_spill] sm:$0xff] }
 0x1ca   : > { %v3164_v61 = vrot.slane %v2582_v62, %v5130_v6  ;;  %v1535_v0 = vmax.f32 %v1137_v28, 0.0  ;;  %v3169_v25 = vrot.slane %v2583_v24, %v5047_v37  ;;  %v2010_v56 = vadd.f32 %v5050_v15, %v1767_v39  ;;  %v6013_v28 = vld [vmem:[#allocation24_spill] sm:$0xff]  ;;  %v6014_v39 = vld [vmem:[#allocation26_spill] sm:$0xff] }
 0x1cb   : > { %v5456_v34 = vmul.f32 %v5151_v4, %v1599_v36  ;;  %v5460_v48 = vadd.f32 %v5137_v33, %v6011_v9  ;;  %v4040_v7 = vpop.eup %4039  ;;  %v2206_v51 = vmul.f32 0.5, %v2078_v10  ;;  %1852 = vadd.xlane.f32.xlu1 %v5365_v22  ;;  %v5467_v38 = vadd.f32 %v5137_v33, %v6012_v58 }
 0x1cc   : > { %v3165_v17 = vsel %vm2838_vm10, %v3164_v61, %v3160_v27  ;;  %1966 = vadd.xlane.f32.xlu0 %v5237_v8  ;;  %v5471_v14 = vadd.f32 %v5137_v33, %v6013_v28  ;;  %v2521_v13 = vadd.f32 0.5, %v2393_v53  ;;  %4049 = vtanh.f32 %v2204_v3  ;;  %v1913_v27 = vpop.xlane.xlu1 %1912 }
 0x1cd   : > { %v4042_v42 = vpop.eup %4041  ;;  %v3170_v36 = vsel %vm2845_vm11, %v3169_v25, %v3165_v17  ;;  %v2138_v19 = vmul.f32 0.5, %v2010_v56  ;;  %v1895_v24 = vpop.xlane.xlu0 %1894  ;;  %v2143_v57 = vmul.f32 0.5, %v2015_v47  ;;  %v2017_v8 = vadd.f32 %v5050_v15, %v5417_v45 }
 0x1ce   : > { %v2392_v22 = vmul.f32 0.5, %v4042_v42  ;;  %4051 = vtanh.f32 %v2203_v11  ;;  %v4044_v44 = vpop.eup %4043  ;;  %v2457_v62 = vmul.f32 0.5, %v4040_v7  ;;  %v2074_v10 = vadd.f32 %v5050_v15, %v1895_v24 }
 0x1cf   : > { %4053 = vtanh.f32 %v2138_v19  ;;  %v5479_v53 = vadd.f32 %v5137_v33, %v6014_v39  ;;  %v4046_v3 = vpop.eup %4045  ;;  %v2081_v25 = vadd.f32 %v5050_v15, %v1909_v12  ;;  %1980 = vadd.xlane.f32.xlu1 %v5373_v49  ;;  %v5485_v45 = vmul.f32 %v5151_v4, %v1535_v0 }
 0x1d0   : > { %4055 = vtanh.f32 %v2206_v51  ;;  %v2520_v61 = vadd.f32 0.5, %v2392_v22  ;;  %1842 = vadd.xlane.f32.xlu0 %v5289_v32  ;;  %v2858_v11 = vrot.slane %v2521_v13, %v5087_v60  ;;  %v2202_v56 = vmul.f32 0.5, %v2074_v10  ;;  %v1789_v9 = vpop.xlane.xlu1 %1788  ;;  %v6015_v51 = vld [vmem:[#allocation3_spill] sm:$0xff] }
 0x1d1   : > { %v4048_v47 = vpop.eup %4047  ;;  %v1901_v7 = vpop.xlane.xlu0 %1900  ;;  %v1538_v33 = vmax.f32 %v5460_v48, 0.0  ;;  %v1537_v17 = vmax.f32 %v5467_v38, 0.0  ;;  %4057 = vtanh.f32 %v2143_v57  ;;  %v2145_v58 = vmul.f32 0.5, %v2017_v8 }
 0x1d2   : > { %v2851_v12 = vrot.slane %v2520_v61, %v6015_v51  ;;  %v2456_v49 = vmul.f32 0.5, %v4048_v47  ;;  %v2395_v28 = vmul.f32 0.5, %v4044_v44  ;;  %v2585_v32 = vadd.f32 0.5, %v2457_v62 }
 0x1d3   : > { %4059 = vtanh.f32 %v2202_v56  ;;  %v2077_v0 = vadd.f32 %v5050_v15, %v1901_v7  ;;  %v2397_v42 = vmul.f32 0.5, %v4046_v3  ;;  %v2209_v24 = vmul.f32 0.5, %v2081_v25  ;;  %1978 = vadd.xlane.f32.xlu1 %v5396_v31 }
 0x1d4   : > { %v2853_v13 = vsel %vm2852_vm12, %v2851_v12, %v2846_v41  ;;  %v2584_v19 = vadd.f32 0.5, %v2456_v49  ;;  %1970 = vadd.xlane.f32.xlu0 %v5296_v21  ;;  %v2019_v48 = vadd.f32 %v5050_v15, %v5445_v54  ;;  %v1917_v22 = vpop.xlane.xlu1 %1916  ;;  %v1602_v44 = vmax.f32 %v5471_v14, 0.0 }
 0x1d5   : > { %v5498_v38 = vsel %vm2859_vm13, %v2858_v11, %v2853_v13  ;;  %v2205_v57 = vmul.f32 0.5, %v2077_v0  ;;  %v1771_v8 = vpop.xlane.xlu0 %1770  ;;  %4061 = vtanh.f32 %v2145_v58  ;;  %v2083_v31 = vadd.f32 %v5050_v15, %v1913_v27 }
 0x1d6   : > { %v3174_v41 = vrot.slane %v2584_v19, %v6015_v51  ;;  %v1601_v21 = vmax.f32 %v5479_v53, 0.0  ;;  %v4050_v62 = vpop.eup %4049  ;;  %v3179_v54 = vrot.slane %v2585_v32, %v5087_v60  ;;  %v2012_v10 = vadd.f32 %v5050_v15, %v1771_v8  ;;  %v6016_v19 = vld [vmem:[#allocation27_spill] sm:$0xff] }
 0x1d7   : > { %4063 = vtanh.f32 %v2205_v57  ;;  %v5507_v39 = vmul.f32 %v5151_v4, %v1538_v33  ;;  %v2523_v61 = vadd.f32 0.5, %v2395_v28  ;;  %v5509_v25 = vadd.f32 0.5, %v2397_v42  ;;  %1856 = vadd.xlane.f32.xlu1 %v5402_v55 }
 0x1d8   : > { %v4052_v3 = vpop.eup %4051  ;;  %v3175_v47 = vsel %vm2852_vm12, %v3174_v41, %v3170_v36  ;;  %4065 = vtanh.f32 %v2209_v24  ;;  %1846 = vadd.xlane.f32.xlu0 %v5347_v20  ;;  %v2147_v11 = vmul.f32 0.5, %v2019_v48  ;;  %v2021_v7 = vadd.f32 %v5050_v15, %v1789_v9  ;;  %v1915_v33 = vpop.xlane.xlu1 %1914 }
 0x1d9   : > { %v4054_v27 = vpop.eup %4053  ;;  %v3180_v56 = vsel %vm2859_vm13, %v3179_v54, %v3175_v47  ;;  %v2140_v12 = vmul.f32 0.5, %v2012_v10  ;;  %v1905_v58 = vpop.xlane.xlu0 %1904  ;;  %v2211_v32 = vmul.f32 0.5, %v2083_v31  ;;  %v2085_v0 = vadd.f32 %v5050_v15, %v1917_v22 }
 0x1da   : > { %v4056_v49 = vpop.eup %4055  ;;  %v2394_v28 = vmul.f32 0.5, %v4054_v27  ;;  %v5518_v36 = vmul.f32 %v5151_v4, %v1537_v17  ;;  %v2460_v55 = vmul.f32 0.5, %v4050_v62  ;;  %v2459_v42 = vmul.f32 0.5, %v4052_v3 }
 0x1db   : > { %4067 = vtanh.f32 %v2140_v12  ;;  %v2079_v20 = vadd.f32 %v5050_v15, %v1905_v58  ;;  %v4058_v13 = vpop.eup %4057  ;;  %v2872_v24 = vrot.slane %v2523_v61, %v6016_v19  ;;  %v2882_v9 = vrot.slane %v5509_v25, %v4943_v16  ;;  %1984 = vadd.xlane.f32.xlu1 %v5420_v2 }
 0x1dc   : > { %v2522_v48 = vadd.f32 0.5, %v2394_v28  ;;  %v2084_v57 = vadd.f32 %v5050_v15, %v1915_v33  ;;  %1850 = vadd.xlane.f32.xlu0 %v5380_v23  ;;  %v2462_v17 = vmul.f32 0.5, %v4056_v49  ;;  %4069 = vtanh.f32 %v2147_v11  ;;  %v1793_v41 = vpop.xlane.xlu1 %1792 }
 0x1dd   : > { %v4060_v4 = vpop.eup %4059  ;;  %v2149_v22 = vmul.f32 0.5, %v2021_v7  ;;  %v2207_v8 = vmul.f32 0.5, %v2079_v20  ;;  %v1775_v31 = vpop.xlane.xlu0 %1774  ;;  %4071 = vtanh.f32 %v2211_v32  ;;  %v2213_v10 = vmul.f32 0.5, %v2085_v0 }
 0x1de   : > { %v2865_v62 = vrot.slane %v2522_v48, %v5357_v18  ;;  %v2458_v54 = vmul.f32 0.5, %v4060_v4  ;;  %v2588_v3 = vadd.f32 0.5, %v2460_v55  ;;  %v2587_v61 = vadd.f32 0.5, %v2459_v42 }
 0x1df   : > { %4073 = vtanh.f32 %v2207_v8  ;;  %v2014_v47 = vadd.f32 %v5050_v15, %v1775_v31  ;;  %v4062_v2 = vpop.eup %4061  ;;  %v2212_v11 = vmul.f32 0.5, %v2084_v57  ;;  %v2023_v7 = vadd.f32 %v5050_v15, %v1793_v41  ;;  %1982 = vadd.xlane.f32.xlu1 %v5428_v59 }
 0x1e0   : > { %v2867_v23 = vsel %vm2866_vm14, %v2865_v62, %v5498_v38  ;;  %v2586_v27 = vadd.f32 0.5, %v2458_v54  ;;  %1854 = vadd.xlane.f32.xlu0 %v5412_v5  ;;  %v2399_v33 = vmul.f32 0.5, %v4058_v13  ;;  %4075 = vtanh.f32 %v2149_v22  ;;  %v1921_v28 = vpop.xlane.xlu1 %1920 }
 0x1e1   : > { %v4064_v12 = vpop.eup %4063  ;;  %v5535_v58 = vsel %vm2873_vm15, %v2872_v24, %v2867_v23  ;;  %v2142_v49 = vmul.f32 0.5, %v2014_v47  ;;  %v1779_v32 = vpop.xlane.xlu0 %1778  ;;  %v2590_v55 = vadd.f32 0.5, %v2462_v17  ;;  %4077 = vtanh.f32 %v2213_v10 }
 0x1e2   : > { %v4066_v0 = vpop.eup %4065  ;;  %v3184_v38 = vrot.slane %v2586_v27, %v5357_v18  ;;  %v2461_v42 = vmul.f32 0.5, %v4064_v12  ;;  %v2401_v20 = vmul.f32 0.5, %v4062_v2  ;;  %v3189_v59 = vrot.slane %v2587_v61, %v6016_v19 }
 0x1e3   : > { %4079 = vtanh.f32 %v2142_v49  ;;  %v2016_v5 = vadd.f32 %v5050_v15, %v1779_v32  ;;  %v2151_v48 = vmul.f32 0.5, %v2023_v7  ;;  %1860 = vadd.xlane.f32.xlu1 %v5448_v26  ;;  %v2465_v4 = vmul.f32 0.5, %v4066_v0 }
 0x1e4   : > { %v3185_v13 = vsel %vm2866_vm14, %v3184_v38, %v3180_v56  ;;  %v2589_v24 = vadd.f32 0.5, %v2461_v42  ;;  %4081 = vtanh.f32 %v2212_v11  ;;  %1988 = vadd.xlane.f32.xlu0 %v5442_v50  ;;  %v2087_v22 = vadd.f32 %v5050_v15, %v1921_v28  ;;  %v1919_v41 = vpop.xlane.xlu1 %1918 }
 0x1e5   : > { %v4068_v57 = vpop.eup %4067  ;;  %v5544_v17 = vsel %vm2873_vm15, %v3189_v59, %v3185_v13  ;;  %v2144_v8 = vmul.f32 0.5, %v2016_v5  ;;  %v1907_v31 = vpop.xlane.xlu0 %1906  ;;  %v3194_v62 = vrot.slane %v2588_v3, %v4947_v43  ;;  %v2086_v10 = vadd.f32 %v5050_v15, %v1919_v41 }
 0x1e6   : > { %v3198_v56 = vrot.slane %v2589_v24, %v4943_v16  ;;  %v2396_v54 = vmul.f32 0.5, %v4068_v57  ;;  %v4070_v26 = vpop.eup %4069  ;;  %v5550_v61 = vadd.f32 0.5, %v2399_v33  ;;  %v3203_v50 = vrot.slane %v2590_v55, %v4961_v35 }
 0x1e7   : > { %4083 = vtanh.f32 %v2144_v8  ;;  %v2080_v47 = vadd.f32 %v5050_v15, %v1907_v31  ;;  %v4072_v2 = vpop.eup %4071  ;;  %v5554_v23 = vadd.f32 0.5, %v2401_v20  ;;  %1986 = vadd.xlane.f32.xlu1 %v5456_v34  ;;  %v5559_v7 = vadd.f32 0.5, %v2465_v4  ;;  %v4247_v34 = vld [vmem:[%s5958_s3] ss:$0 sm:$0xff] }
 0x1e8   : > { %v3199_v27 = vsel %vm2775_vm1, %v3198_v56, %v3194_v62  ;;  %v2524_v11 = vadd.f32 0.5, %v2396_v54  ;;  %4085 = vtanh.f32 %v2151_v48  ;;  %1858 = vadd.xlane.f32.xlu0 %v5485_v45  ;;  %v2215_v33 = vmul.f32 0.5, %v2087_v22  ;;  %v1797_v28 = vpop.xlane.xlu1 %1796 }
 0x1e9   : > { %v4074_v3 = vpop.eup %4073  ;;  %v3204_v12 = vsel %vm2782_vm2, %v3203_v50, %v3199_v27  ;;  %v2208_v49 = vmul.f32 0.5, %v2080_v47  ;;  %v1783_v32 = vpop.xlane.xlu0 %1782  ;;  %v2214_v38 = vmul.f32 0.5, %v2086_v10  ;;  %v2025_v42 = vadd.f32 %v5050_v15, %v1797_v28 }
 0x1ea   : > { %v2878_v0 = vrot.slane %v2524_v11, %v4947_v43  ;;  %v2463_v55 = vmul.f32 0.5, %v4074_v3  ;;  %v4076_v20 = vpop.eup %4075  ;;  %v1737_v45 = vmul.f32 %v4247_v34, %v1602_v44  ;;  %v1736_v59 = vmul.f32 %v4247_v34, %v1601_v21 }
 0x1eb   : > { %4087 = vtanh.f32 %v2208_v49  ;;  %v2018_v5 = vadd.f32 %v5050_v15, %v1783_v32  ;;  %v4078_v13 = vpop.eup %4077  ;;  %v2892_v24 = vrot.slane %v5550_v61, %v4954_v46  ;;  %v2902_v48 = vrot.slane %v5554_v23, %v4964_v40  ;;  %1864 = vadd.xlane.f32.xlu1 %v5507_v39 }
 0x1ec   : > { %v2883_v57 = vsel %vm2775_vm1, %v2882_v9, %v2878_v0  ;;  %v2591_v4 = vadd.f32 0.5, %v2463_v55  ;;  %1862 = vadd.xlane.f32.xlu0 %v5518_v36  ;;  %v3218_v53 = vrot.slane %v5559_v7, %v4964_v40  ;;  %4089 = vtanh.f32 %v2215_v33  ;;  %v1925_v22 = vpop.xlane.xlu1 %1924 }
 0x1ed   : > { %v4080_v14 = vpop.eup %4079  ;;  %v2153_v44 = vmul.f32 0.5, %v2025_v42  ;;  %v2146_v21 = vmul.f32 0.5, %v2018_v5  ;;  %v1911_v8 = vpop.xlane.xlu0 %1910  ;;  %4091 = vtanh.f32 %v2214_v38  ;;  %v2089_v9 = vadd.f32 %v5050_v15, %v1925_v22 }
 0x1ee   : > { %v4082_v41 = vpop.eup %4081  ;;  %v3208_v31 = vrot.slane %v2591_v4, %v4954_v46  ;;  %v2398_v25 = vmul.f32 0.5, %v4080_v14  ;;  %v2403_v62 = vmul.f32 0.5, %v4070_v26  ;;  %v2467_v39 = vmul.f32 0.5, %v4072_v2 }
 0x1ef   : > { %4093 = vtanh.f32 %v2146_v21  ;;  %v2082_v36 = vadd.f32 %v5050_v15, %v1911_v8  ;;  %v2405_v56 = vmul.f32 0.5, %v4076_v20  ;;  %v2217_v61 = vmul.f32 0.5, %v2089_v9  ;;  %1992 = vadd.xlane.f32.xlu1 %v1737_v45 }
 0x1f0   : > { %v5588_v54 = vsel %vm2789_vm3, %v3208_v31, %v3204_v12  ;;  %v2526_v10 = vadd.f32 0.5, %v2398_v25  ;;  %1990 = vadd.xlane.f32.xlu0 %v1736_v59  ;;  %v2469_v47 = vmul.f32 0.5, %v4078_v13  ;;  %v2468_v27 = vmul.f32 0.5, %v4082_v41  ;;  %v1923_v3 = vpop.xlane.xlu1 %1922 }
 0x1f1   : > { %v4084_v50 = vpop.eup %4083  ;;  %4095 = vtanh.f32 %v2153_v44  ;;  %v2210_v11 = vmul.f32 0.5, %v2082_v36  ;;  %v1787_v33 = vpop.xlane.xlu0 %1786  ;;  %v2088_v28 = vadd.f32 %v5050_v15, %v1923_v3  ;;  %v5592_v12 = vadd.f32 0.5, %v2403_v62 }
 0x1f2   : > { %v4086_v26 = vpop.eup %4085  ;;  %v2887_v2 = vrot.slane %v2526_v10, %v4961_v35  ;;  %v2400_v49 = vmul.f32 0.5, %v4084_v50  ;;  %4097 = vtanh.f32 %v2217_v61  ;;  %v5594_v32 = vadd.f32 0.5, %v2467_v39 }
 0x1f3   : > { %4099 = vtanh.f32 %v2210_v11  ;;  %v2020_v0 = vadd.f32 %v5050_v15, %v1787_v33  ;;  %v5597_v55 = vadd.f32 0.5, %v2405_v56  ;;  %v2216_v20 = vmul.f32 0.5, %v2088_v28 }
 0x1f4   : > { %v2888_v38 = vsel %vm2782_vm2, %v2887_v2, %v2883_v57  ;;  %v2528_v42 = vadd.f32 0.5, %v2400_v49  ;;  %v5600_v45 = vadd.f32 0.5, %v2469_v47  ;;  %v2407_v59 = vmul.f32 0.5, %v4086_v26  ;;  %v1801_v4 = vpop.xlane.xlu1 %1800 }
 0x1f5   : > { %v4088_v34 = vpop.eup %4087  ;;  %v2893_v5 = vsel %vm2789_vm3, %v2892_v24, %v2888_v38  ;;  %v2148_v13 = vmul.f32 0.5, %v2020_v0  ;;  %v1791_v14 = vpop.xlane.xlu0 %1790  ;;  %v5603_v44 = vadd.f32 0.5, %v2468_v27  ;;  %4101 = vtanh.f32 %v2216_v20 }
 0x1f6   : > { %v2897_v21 = vrot.slane %v2528_v42, %v4980_v1  ;;  %v2464_v22 = vmul.f32 0.5, %v4088_v34  ;;  %v4090_v8 = vpop.eup %4089  ;;  %v2912_v57 = vrot.slane %v5592_v12, %v5000_v52  ;;  %v3228_v41 = vrot.slane %v5594_v32, %v5000_v52 }
 0x1f7   : > { %4103 = vtanh.f32 %v2148_v13  ;;  %v2022_v31 = vadd.f32 %v5050_v15, %v1791_v14  ;;  %v4092_v24 = vpop.eup %4091  ;;  %v2922_v25 = vrot.slane %v5597_v55, %v5023_v29  ;;  %v2027_v39 = vadd.f32 %v5050_v15, %v1801_v4 }
 0x1f8   : > { %v2898_v9 = vsel %vm2796_vm4, %v2897_v21, %v2893_v5  ;;  %v2592_v62 = vadd.f32 0.5, %v2464_v22  ;;  %v3238_v56 = vrot.slane %v5600_v45, %v5023_v29  ;;  %v5617_v10 = vadd.f32 0.5, %v2407_v59  ;;  %v1927_v47 = vpop.xlane.xlu1 %1926 }
 0x1f9   : > { %v4094_v36 = vpop.eup %4093  ;;  %v2903_v61 = vsel %vm2803_vm5, %v2902_v48, %v2898_v9  ;;  %v2150_v50 = vmul.f32 0.5, %v2022_v31  ;;  %v1795_v27 = vpop.xlane.xlu0 %1794  ;;  %v3233_v11 = vrot.slane %v5603_v44, %v5057_v63  ;;  %v2090_v26 = vadd.f32 %v5050_v15, %v1927_v47 }
 0x1fa   : > { %v3213_v3 = vrot.slane %v2592_v62, %v4980_v1  ;;  %v2402_v33 = vmul.f32 0.5, %v4094_v36  ;;  %v2471_v49 = vmul.f32 0.5, %v4090_v8  ;;  %v2470_v28 = vmul.f32 0.5, %v4092_v24 }
 0x1fb   : > { %v4096_v2 = vpop.eup %4095  ;;  %4105 = vtanh.f32 %v2150_v50  ;;  %v2024_v12 = vadd.f32 %v5050_v15, %v1795_v27  ;;  %v2155_v38 = vmul.f32 0.5, %v2027_v39  ;;  %v2218_v42 = vmul.f32 0.5, %v2090_v26 }
 0x1fc   : > { %v4098_v23 = vpop.eup %4097  ;;  %v3214_v48 = vsel %vm2796_vm4, %v3213_v3, %v5588_v54  ;;  %v2530_v0 = vadd.f32 0.5, %v2402_v33  ;;  %v2932_v34 = vrot.slane %v5617_v10, %v5047_v37  ;;  %v1805_v4 = vpop.xlane.xlu1 %1804  ;;  %v2599_v22 = vadd.f32 0.5, %v2471_v49 }
 0x1fd   : > { %v4100_v20 = vpop.eup %4099  ;;  %v2473_v59 = vmul.f32 0.5, %v4098_v23  ;;  %v3219_v5 = vsel %vm2803_vm5, %v3218_v53, %v3214_v48  ;;  %v2152_v13 = vmul.f32 0.5, %v2024_v12  ;;  %v1929_v14 = vpop.xlane.xlu0 %1928  ;;  %4107 = vtanh.f32 %v2218_v42 }
 0x1fe   : > { %v2907_v44 = vrot.slane %v2530_v0, %v5003_v30  ;;  %v2466_v21 = vmul.f32 0.5, %v4100_v20  ;;  %v2029_v54 = vadd.f32 %v5050_v15, %v1805_v4  ;;  %v2598_v8 = vadd.f32 0.5, %v2470_v28 }
 0x1ff   : > { %4109 = vtanh.f32 %v2152_v13  ;;  %v2091_v31 = vadd.f32 %v5050_v15, %v1929_v14  ;;  %v4102_v24 = vpop.eup %4101  ;;  %v2409_v9 = vmul.f32 0.5, %v4096_v2  ;;  %v2601_v39 = vadd.f32 0.5, %v2473_v59 }
 0x200   : > { %v2908_v7 = vsel %vm2810_vm6, %v2907_v44, %v2903_v61  ;;  %v2594_v62 = vadd.f32 0.5, %v2466_v21  ;;  %4111 = vtanh.f32 %v2155_v38  ;;  %v2472_v36 = vmul.f32 0.5, %v4102_v24  ;;  %v1933_v27 = vpop.xlane.xlu1 %1932 }
 0x201   : > { %v4104_v53 = vpop.eup %4103  ;;  %v2913_v50 = vsel %vm2817_vm7, %v2912_v57, %v2908_v7  ;;  %v2219_v47 = vmul.f32 0.5, %v2091_v31  ;;  %v1799_v3 = vpop.xlane.xlu0 %1798  ;;  %v2157_v49 = vmul.f32 0.5, %v2029_v54  ;;  %v2093_v28 = vadd.f32 %v5050_v15, %v1933_v27 }
 0x202   : > { %v3223_v33 = vrot.slane %v2594_v62, %v5003_v30  ;;  %v2404_v26 = vmul.f32 0.5, %v4104_v53  ;;  %v3248_v2 = vrot.slane %v2599_v22, %v5047_v37  ;;  %v2600_v12 = vadd.f32 0.5, %v2472_v36 }
 0x203   : > { %4113 = vtanh.f32 %v2219_v47  ;;  %v2026_v61 = vadd.f32 %v5050_v15, %v1799_v3  ;;  %v3243_v23 = vrot.slane %v2598_v8, %v5130_v6  ;;  %v5646_v48 = vadd.f32 0.5, %v2409_v9 }
 0x204   : > { %v3224_v57 = vsel %vm2810_vm6, %v3223_v33, %v3219_v5  ;;  %v2532_v0 = vadd.f32 0.5, %v2404_v26  ;;  %v3258_v42 = vrot.slane %v2601_v39, %v5087_v60  ;;  %v2221_v59 = vmul.f32 0.5, %v2093_v28  ;;  %v1809_v4 = vpop.xlane.xlu1 %1808 }
 0x205   : > { %v4106_v38 = vpop.eup %4105  ;;  %v3229_v20 = vsel %vm2817_vm7, %v3228_v41, %v3224_v57  ;;  %v2154_v13 = vmul.f32 0.5, %v2026_v61  ;;  %v1803_v14 = vpop.xlane.xlu0 %1802  ;;  %4115 = vtanh.f32 %v2157_v49  ;;  %v3253_v22 = vrot.slane %v2600_v12, %v6015_v51 }
 0x206   : > { %v3234_v44 = vsel %vm2824_vm8, %v3233_v11, %v3229_v20  ;;  %v2917_v21 = vrot.slane %v2532_v0, %v5057_v63  ;;  %v2406_v54 = vmul.f32 0.5, %v4106_v38  ;;  %v2031_v32 = vadd.f32 %v5050_v15, %v1809_v4 }
 0x207   : > { %v3239_v5 = vsel %vm2831_vm9, %v3238_v56, %v3234_v44  ;;  %4117 = vtanh.f32 %v2154_v13  ;;  %v4108_v41 = vpop.eup %4107  ;;  %v2028_v24 = vadd.f32 %v5050_v15, %v1803_v14  ;;  %v2942_v12 = vrot.slane %v5646_v48, %v5087_v60 }
 0x208   : > { %v3244_v8 = vsel %vm2838_vm10, %v3243_v23, %v3239_v5  ;;  %v2918_v31 = vsel %vm2824_vm8, %v2917_v21, %v2913_v50  ;;  %v2534_v11 = vadd.f32 0.5, %v2406_v54  ;;  %v2474_v56 = vmul.f32 0.5, %v4108_v41  ;;  %v1937_v62 = vpop.xlane.xlu1 %1936 }
 0x209   : > { %v4110_v9 = vpop.eup %4109  ;;  %v3249_v7 = vsel %vm2845_vm11, %v3248_v2, %v3244_v8  ;;  %v2923_v45 = vsel %vm2831_vm9, %v2922_v25, %v2918_v31  ;;  %4119 = vtanh.f32 %v2221_v59  ;;  %v1931_v53 = vpop.xlane.xlu0 %1930  ;;  %v2159_v27 = vmul.f32 0.5, %v2031_v32 }
 0x20a   : > { %v4112_v39 = vpop.eup %4111  ;;  %v3254_v36 = vsel %vm2852_vm12, %v3253_v22, %v3249_v7  ;;  %v2927_v50 = vrot.slane %v2534_v11, %v5130_v6  ;;  %v2408_v47 = vmul.f32 0.5, %v4110_v9  ;;  %v2602_v3 = vadd.f32 0.5, %v2474_v56 }
 0x20b   : > { %v3259_v33 = vsel %vm2859_vm13, %v3258_v42, %v3254_v36  ;;  %v2156_v26 = vmul.f32 0.5, %v2028_v24  ;;  %v2095_v49 = vadd.f32 %v5050_v15, %v1937_v62  ;;  %4121 = vtanh.f32 %v2159_v27 }
 0x20c   : > { %v2928_v55 = vsel %vm2838_vm10, %v2927_v50, %v2923_v45  ;;  %v2536_v25 = vadd.f32 0.5, %v2408_v47  ;;  %v2092_v28 = vadd.f32 %v5050_v15, %v1931_v53  ;;  %v3263_v61 = vrot.slane %v2602_v3, %v5357_v18  ;;  %v1935_v57 = vpop.xlane.xlu1 %1934 }
 0x20d   : > { %v4114_v2 = vpop.eup %4113  ;;  %v2933_v23 = vsel %vm2845_vm11, %v2932_v34, %v2928_v55  ;;  %4123 = vtanh.f32 %v2156_v26  ;;  %v1807_v0 = vpop.xlane.xlu0 %1806  ;;  %v2223_v20 = vmul.f32 0.5, %v2095_v49  ;;  %v2411_v13 = vmul.f32 0.5, %v4112_v39 }
 0x20e   : > { %v2937_v38 = vrot.slane %v2536_v25, %v6015_v51  ;;  %v2475_v42 = vmul.f32 0.5, %v4114_v2  ;;  %v2220_v59 = vmul.f32 0.5, %v2092_v28  ;;  %v3264_v4 = vsel %vm2866_vm14, %v3263_v61, %v3259_v33 }
 0x20f   : > { %v2094_v48 = vadd.f32 %v5050_v15, %v1935_v57  ;;  %v2030_v14 = vadd.f32 %v5050_v15, %v1807_v0  ;;  %v4116_v44 = vpop.eup %4115  ;;  %4125 = vtanh.f32 %v2223_v20  ;;  %v2539_v24 = vadd.f32 0.5, %v2411_v13 }
 0x210   : > { %v2938_v10 = vsel %vm2852_vm12, %v2937_v38, %v2933_v23  ;;  %v2603_v21 = vadd.f32 0.5, %v2475_v42  ;;  %4127 = vtanh.f32 %v2220_v59  ;;  %v1813_v5 = vpop.xlane.xlu1 %1812  ;;  %v2413_v9 = vmul.f32 0.5, %v4116_v44 }
 0x211   : > { %v4118_v34 = vpop.eup %4117  ;;  %v2943_v54 = vsel %vm2859_vm13, %v2942_v12, %v2938_v10  ;;  %v1811_v22 = vpop.xlane.xlu0 %1810  ;;  %v2222_v8 = vmul.f32 0.5, %v2094_v48  ;;  %v2158_v31 = vmul.f32 0.5, %v2030_v14  ;;  %v2033_v7 = vadd.f32 %v5050_v15, %v1813_v5 }
 0x212   : > { %v3268_v32 = vrot.slane %v2603_v21, %v6016_v19  ;;  %v2410_v41 = vmul.f32 0.5, %v4118_v34  ;;  %v2032_v45 = vadd.f32 %v5050_v15, %v1811_v22  ;;  %v2952_v49 = vrot.slane %v2539_v24, %v6016_v19 }
 0x213   : > { %v4120_v11 = vpop.eup %4119  ;;  %4129 = vtanh.f32 %v2222_v8  ;;  %v2161_v53 = vmul.f32 0.5, %v2033_v7  ;;  %v2541_v55 = vadd.f32 0.5, %v2413_v9 }
 0x214   : > { %v5693_v56 = vsel %vm2873_vm15, %v3268_v32, %v3264_v4  ;;  %v2538_v62 = vadd.f32 0.5, %v2410_v41  ;;  %4131 = vtanh.f32 %v2158_v31  ;;  %v2160_v39 = vmul.f32 0.5, %v2032_v45  ;;  %v1941_v36 = vpop.xlane.xlu1 %1940 }
 0x215   : > { %v1939_v50 = vpop.xlane.xlu0 %1938  ;;  %v4122_v47 = vpop.eup %4121  ;;  %v2097_v3 = vadd.f32 %v5050_v15, %v1941_v36  ;;  %v2477_v25 = vmul.f32 0.5, %v4120_v11  ;;  %4133 = vtanh.f32 %v2161_v53  ;;  %v2961_v48 = vrot.slane %v2541_v55, %v4943_v16 }
 0x216   : > { %v2947_v27 = vrot.slane %v2538_v62, %v5357_v18  ;;  %v2096_v33 = vadd.f32 %v5050_v15, %v1939_v50  ;;  %4135 = vtanh.f32 %v2160_v39  ;;  %v2415_v23 = vmul.f32 0.5, %v4122_v47 }
 0x217   : > { %v4124_v26 = vpop.eup %4123  ;;  %v2225_v12 = vmul.f32 0.5, %v2097_v3  ;;  %v2605_v14 = vadd.f32 0.5, %v2477_v25 }
 0x218   : > { %v2948_v28 = vsel %vm2866_vm14, %v2947_v27, %v2943_v54  ;;  %v2412_v2 = vmul.f32 0.5, %v4124_v26  ;;  %v2224_v57 = vmul.f32 0.5, %v2096_v33  ;;  %v1817_v0 = vpop.xlane.xlu1 %1816  ;;  %v2543_v32 = vadd.f32 0.5, %v2415_v23 }
 0x219   : > { %v2953_v61 = vsel %vm2873_vm15, %v2952_v49, %v2948_v28  ;;  %v1945_v38 = vpop.xlane.xlu0 %1944  ;;  %v4126_v42 = vpop.eup %4125  ;;  %4137 = vtanh.f32 %v2225_v12  ;;  %v2035_v13 = vadd.f32 %v5050_v15, %v1817_v0  ;;  %v3277_v9 = vrot.slane %v2605_v14, %v4943_v16 }
 0x21a   : > { %v5703_v20 = vsel %vm3428_vm0, %v2953_v61, %v5535_v58  ;;  %v2540_v59 = vadd.f32 0.5, %v2412_v2  ;;  %v4128_v4 = vpop.eup %4127  ;;  %4139 = vtanh.f32 %v2224_v57  ;;  %v2479_v10 = vmul.f32 0.5, %v4126_v42 }
 0x21b   : > { %v2476_v21 = vmul.f32 0.5, %v4128_v4  ;;  %v2163_v34 = vmul.f32 0.5, %v2035_v13  ;;  %v2099_v54 = vadd.f32 %v5050_v15, %v1945_v38  ;;  %v2971_v33 = vrot.slane %v2543_v32, %v4954_v46 }
 0x21c   : > { %v2957_v44 = vrot.slane %v2540_v59, %v4947_v43  ;;  %v1821_v5 = vpop.xlane.xlu1 %1820  ;;  %v2607_v7 = vadd.f32 0.5, %v2479_v10  ;;  %vm3430_vm0 = vcmask 1042434  }
 0x21d   : > { %v1815_v22 = vpop.xlane.xlu0 %1814  ;;  %v4130_v58 = vpop.eup %4129  ;;  %v2604_v8 = vadd.f32 0.5, %v2476_v21  ;;  %4141 = vtanh.f32 %v2163_v34  ;;  %v2227_v36 = vmul.f32 0.5, %v2099_v54  ;;  %v2037_v2 = vadd.f32 %v5050_v15, %v1821_v5 }
 0x21e   : > { %v2962_v41 = vsel %vm2775_vm1, %v2961_v48, %v2957_v44  ;;  %v4132_v31 = vpop.eup %4131  ;;  %v2478_v11 = vmul.f32 0.5, %v4130_v58  ;;  %v2034_v24 = vadd.f32 %v5050_v15, %v1815_v22  ;;  %v3287_v61 = vrot.slane %v2607_v7, %v4954_v46 }
 0x21f   : > { %v3273_v45 = vrot.slane %v2604_v8, %v4947_v43  ;;  %v2414_v62 = vmul.f32 0.5, %v4132_v31  ;;  %v4134_v53 = vpop.eup %4133  ;;  %v2165_v32 = vmul.f32 0.5, %v2037_v2 }
 0x220   : > { %v2606_v39 = vadd.f32 0.5, %v2478_v11  ;;  %v2162_v50 = vmul.f32 0.5, %v2034_v24  ;;  %v1825_v47 = vpop.xlane.xlu1 %1824  ;;  %v4136_v3 = vpop.eup %4135  ;;  %v2417_v55 = vmul.f32 0.5, %v4134_v53 }
 0x221   : > { %v1943_v27 = vpop.xlane.xlu0 %1942  ;;  %v3278_v26 = vsel %vm2775_vm1, %v3277_v9, %v3273_v45  ;;  %v2542_v49 = vadd.f32 0.5, %v2414_v62  ;;  %v2416_v28 = vmul.f32 0.5, %v4136_v3 }
 0x222   : > { %v3282_v25 = vrot.slane %v2606_v39, %v4961_v35  ;;  %4143 = vtanh.f32 %v2162_v50  ;;  %v2545_v57 = vadd.f32 0.5, %v2417_v55  ;;  %v2098_v0 = vadd.f32 %v5050_v15, %v1943_v27 }
 0x223   : > { %v4138_v12 = vpop.eup %4137  ;;  %v2966_v23 = vrot.slane %v2542_v49, %v4961_v35  ;;  %v2544_v59 = vadd.f32 0.5, %v2416_v28  ;;  %4145 = vtanh.f32 %v2227_v36  ;;  %v2039_v27 = vadd.f32 %v5050_v15, %v1825_v47 }
 0x224   : > { %v4140_v38 = vpop.eup %4139  ;;  %v3283_v42 = vsel %vm2782_vm2, %v3282_v25, %v3278_v26  ;;  %v2481_v13 = vmul.f32 0.5, %v4138_v12  ;;  %v1829_v4 = vpop.xlane.xlu1 %1828  ;;  %v2981_v44 = vrot.slane %v2545_v57, %v4964_v40  ;;  %v2226_v8 = vmul.f32 0.5, %v2098_v0 }
 0x225   : > { %v1949_v48 = vpop.xlane.xlu0 %1948  ;;  %v2967_v14 = vsel %vm2782_vm2, %v2966_v23, %v2962_v41  ;;  %v3288_v10 = vsel %vm2789_vm3, %v3287_v61, %v3283_v42  ;;  %v2480_v21 = vmul.f32 0.5, %v4140_v38  ;;  %v2976_v54 = vrot.slane %v2544_v59, %v4980_v1 }
 0x226   : > { %v2972_v34 = vsel %vm2789_vm3, %v2971_v33, %v2967_v14  ;;  %v2609_v5 = vadd.f32 0.5, %v2481_v13  ;;  %v2101_v31 = vadd.f32 %v5050_v15, %v1949_v48  ;;  %4147 = vtanh.f32 %v2226_v8 }
 0x227   : > { %v4142_v22 = vpop.eup %4141  ;;  %v2608_v58 = vadd.f32 0.5, %v2480_v21  ;;  %v2977_v11 = vsel %vm2796_vm4, %v2976_v54, %v2972_v34  ;;  %4149 = vtanh.f32 %v2165_v32  ;;  %v2167_v61 = vmul.f32 0.5, %v2039_v27 }
 0x228   : > { %v3297_v41 = vrot.slane %v2609_v5, %v4964_v40  ;;  %v1833_v24 = vpop.xlane.xlu1 %1832  ;;  %v2982_v45 = vsel %vm2803_vm5, %v2981_v44, %v2977_v11  ;;  %v2419_v62 = vmul.f32 0.5, %v4142_v22  ;;  %v2229_v53 = vmul.f32 0.5, %v2101_v31 }
 0x229   : > { %v1819_v9 = vpop.xlane.xlu0 %1818  ;;  %v3292_v7 = vrot.slane %v2608_v58, %v4980_v1  ;;  %v2041_v32 = vadd.f32 %v5050_v15, %v1829_v4 }
 0x22a   : > { %v2036_v36 = vadd.f32 %v5050_v15, %v1819_v9  ;;  %v2547_v25 = vadd.f32 0.5, %v2419_v62  ;;  %4151 = vtanh.f32 %v2229_v53 }
 0x22b   : > { %v3293_v39 = vsel %vm2796_vm4, %v3292_v7, %v3288_v10 }
 0x22c   : > { %v4144_v50 = vpop.eup %4143  ;;  %v3298_v3 = vsel %vm2803_vm5, %v3297_v41, %v3293_v39  ;;  %v1961_v33 = vpop.xlane.xlu1 %1960  ;;  %v2164_v28 = vmul.f32 0.5, %v2036_v36  ;;  %v2991_v59 = vrot.slane %v2547_v25, %v5000_v52  ;;  %v2169_v36 = vmul.f32 0.5, %v2041_v32 }
 0x22d   : > { %v1947_v26 = vpop.xlane.xlu0 %1946  ;;  %v2418_v49 = vmul.f32 0.5, %v4144_v50  ;;  %v4146_v55 = vpop.eup %4145 }
 0x22e   : > { %v2100_v2 = vadd.f32 %v5050_v15, %v1947_v26  ;;  %4153 = vtanh.f32 %v2164_v28  ;;  %v2483_v38 = vmul.f32 0.5, %v4146_v55 }
 0x22f   : > { %v2546_v12 = vadd.f32 0.5, %v2418_v49  ;;  %v2043_v49 = vadd.f32 %v5050_v15, %v1833_v24 }
 0x230   : > { %v2228_v23 = vmul.f32 0.5, %v2100_v2  ;;  %v1959_v57 = vpop.xlane.xlu1 %1958  ;;  %v4148_v13 = vpop.eup %4147  ;;  %v2611_v54 = vadd.f32 0.5, %v2483_v38 }
 0x231   : > { %v1953_v0 = vpop.xlane.xlu0 %1952  ;;  %v2986_v47 = vrot.slane %v2546_v12, %v5003_v30  ;;  %v2482_v14 = vmul.f32 0.5, %v4148_v13  ;;  %v4150_v34 = vpop.eup %4149 }
 0x232   : > { %v2103_v42 = vadd.f32 %v5050_v15, %v1953_v0  ;;  %4155 = vtanh.f32 %v2228_v23  ;;  %v2421_v11 = vmul.f32 0.5, %v4150_v34 }
 0x233   : > { %v2987_v48 = vsel %vm2810_vm6, %v2986_v47, %v2982_v45  ;;  %4157 = vtanh.f32 %v2167_v61  ;;  %v2610_v58 = vadd.f32 0.5, %v2482_v14  ;;  %v3307_v45 = vrot.slane %v2611_v54, %v5000_v52 }
 0x234   : > { %v2992_v44 = vsel %vm2817_vm7, %v2991_v59, %v2987_v48  ;;  %v5741_v10 = vpop.xlane.xlu1 %1836  ;;  %v2231_v5 = vmul.f32 0.5, %v2103_v42  ;;  %v4152_v31 = vpop.eup %4151  ;;  %v2549_v26 = vadd.f32 0.5, %v2421_v11  ;;  %v2107_v61 = vadd.f32 %v5050_v15, %v1961_v33 }
 0x235   : > { %v1823_v21 = vpop.xlane.xlu0 %1822  ;;  %v3302_v41 = vrot.slane %v2610_v58, %v5003_v30  ;;  %v2485_v50 = vmul.f32 0.5, %v4152_v31  ;;  %v2106_v42 = vadd.f32 %v5050_v15, %v1959_v57  ;;  %v2171_v59 = vmul.f32 0.5, %v2043_v49 }
 0x236   : > { %v2038_v22 = vadd.f32 %v5050_v15, %v1823_v21  ;;  %4159 = vtanh.f32 %v2231_v5  ;;  %v3001_v24 = vrot.slane %v2549_v26, %v5023_v29  ;;  %v2235_v34 = vmul.f32 0.5, %v2107_v61 }
 0x237   : > { %v3303_v39 = vsel %vm2810_vm6, %v3302_v41, %v3298_v3  ;;  %v2613_v38 = vadd.f32 0.5, %v2485_v50 }
 0x238   : > { %v2166_v8 = vmul.f32 0.5, %v2038_v22  ;;  %v5746_v9 = vpop.xlane.xlu1 %1964  ;;  %v4154_v53 = vpop.eup %4153  ;;  %v3308_v27 = vsel %vm2817_vm7, %v3307_v45, %v3303_v39 }
 0x239   : > { %v1951_v7 = vpop.xlane.xlu0 %1950  ;;  %v2420_v4 = vmul.f32 0.5, %v4154_v53  ;;  %v3317_v32 = vrot.slane %v2613_v38, %v5023_v29 }
 0x23a   : > { %v2102_v62 = vadd.f32 %v5050_v15, %v1951_v7  ;;  %4161 = vtanh.f32 %v2166_v8  ;;  %v2234_v8 = vmul.f32 0.5, %v2106_v42 }
 0x23b   : > { %v2548_v12 = vadd.f32 0.5, %v2420_v4 }
 0x23c   : > { %v2230_v55 = vmul.f32 0.5, %v2102_v62  ;;  %v5753_v25 = vpop.xlane.xlu1 %1840  ;;  %v4156_v2 = vpop.eup %4155 }
 0x23d   : > { %v1957_v28 = vpop.xlane.xlu0 %1956  ;;  %v4158_v23 = vpop.eup %4157  ;;  %v2484_v0 = vmul.f32 0.5, %v4156_v2  ;;  %v2996_v47 = vrot.slane %v2548_v12, %v5057_v63 }
 0x23e   : > { %4163 = vtanh.f32 %v2230_v55  ;;  %v2105_v3 = vadd.f32 %v5050_v15, %v1957_v28  ;;  %v2423_v21 = vmul.f32 0.5, %v4158_v23 }
 0x23f   : > { %4165 = vtanh.f32 %v2169_v36  ;;  %v2612_v13 = vadd.f32 0.5, %v2484_v0  ;;  %v2997_v33 = vsel %vm2824_vm8, %v2996_v47, %v2992_v44  ;;  %v2045_v0 = vadd.f32 %v5050_v15, %v5741_v10 }
 0x240   : > { %v1969_v48 = vpop.xlane.xlu1 %1968  ;;  %v3002_v5 = vsel %vm2831_vm9, %v3001_v24, %v2997_v33  ;;  %v2233_v22 = vmul.f32 0.5, %v2105_v3  ;;  %v4160_v58 = vpop.eup %4159  ;;  %4167 = vtanh.f32 %v2171_v59  ;;  %v2551_v45 = vadd.f32 0.5, %v2423_v21 }
 0x241   : > { %v1827_v14 = vpop.xlane.xlu0 %1826  ;;  %v3312_v54 = vrot.slane %v2612_v13, %v5057_v63  ;;  %4169 = vtanh.f32 %v2235_v34  ;;  %v2487_v53 = vmul.f32 0.5, %v4160_v58 }
 0x242   : > { %v2040_v57 = vadd.f32 %v5050_v15, %v1827_v14  ;;  %4171 = vtanh.f32 %v2233_v22  ;;  %v3011_v12 = vrot.slane %v2551_v45, %v5047_v37  ;;  %v2109_v14 = vadd.f32 %v5050_v15, %v5746_v9 }
 0x243   : > { %v3313_v11 = vsel %vm2824_vm8, %v3312_v54, %v3308_v27  ;;  %4173 = vtanh.f32 %v2234_v8  ;;  %v2615_v61 = vadd.f32 0.5, %v2487_v53  ;;  %v2173_v54 = vmul.f32 0.5, %v2045_v0 }
 0x244   : > { %v4162_v31 = vpop.eup %4161  ;;  %v1845_v41 = vpop.xlane.xlu1 %1844  ;;  %v3318_v62 = vsel %vm2831_vm9, %v3317_v32, %v3313_v11  ;;  %v2168_v39 = vmul.f32 0.5, %v2040_v57  ;;  %v2047_v22 = vadd.f32 %v5050_v15, %v5753_v25  ;;  %v2111_v8 = vadd.f32 %v5050_v15, %v1969_v48 }
 0x245   : > { %v1955_v7 = vpop.xlane.xlu0 %1954  ;;  %v2422_v44 = vmul.f32 0.5, %v4162_v31  ;;  %v3327_v34 = vrot.slane %v2615_v61, %v5047_v37  ;;  %v2237_v45 = vmul.f32 0.5, %v2109_v14 }
 0x246   : > { %v2104_v36 = vadd.f32 %v5050_v15, %v1955_v7  ;;  %4175 = vtanh.f32 %v2168_v39  ;;  %v2049_v39 = vadd.f32 %v5050_v15, %v1845_v41  ;;  %v2239_v48 = vmul.f32 0.5, %v2111_v8 }
 0x247   : > { %v2550_v50 = vadd.f32 0.5, %v2422_v44 }
 0x248   : > { %v4164_v4 = vpop.eup %4163  ;;  %v1973_v26 = vpop.xlane.xlu1 %1972  ;;  %v2232_v2 = vmul.f32 0.5, %v2104_v36  ;;  %v2177_v41 = vmul.f32 0.5, %v2049_v39 }
 0x249   : > { %v1831_v49 = vpop.xlane.xlu0 %1830  ;;  %v4166_v55 = vpop.eup %4165  ;;  %v3006_v27 = vrot.slane %v2550_v50, %v5130_v6  ;;  %v2486_v28 = vmul.f32 0.5, %v4164_v4 }
 0x24a   : > { %v2042_v23 = vadd.f32 %v5050_v15, %v1831_v49  ;;  %4177 = vtanh.f32 %v2232_v2  ;;  %v2425_v47 = vmul.f32 0.5, %v4166_v55  ;;  %v4168_v33 = vpop.eup %4167  ;;  %v2113_v49 = vadd.f32 %v5050_v15, %v1973_v26 }
 0x24b   : > { %v3007_v3 = vsel %vm2838_vm10, %v3006_v27, %v3002_v5  ;;  %v2614_v38 = vadd.f32 0.5, %v2486_v28  ;;  %v4170_v10 = vpop.eup %4169  ;;  %v2427_v7 = vmul.f32 0.5, %v4168_v33 }
 0x24c   : > { %v3012_v42 = vsel %vm2845_vm11, %v3011_v12, %v3007_v3  ;;  %v2170_v24 = vmul.f32 0.5, %v2042_v23  ;;  %v1849_v59 = vpop.xlane.xlu1 %1848  ;;  %v4172_v58 = vpop.eup %4171  ;;  %v2553_v32 = vadd.f32 0.5, %v2425_v47  ;;  %v2491_v53 = vmul.f32 0.5, %v4170_v10 }
 0x24d   : > { %v1835_v13 = vpop.xlane.xlu0 %1834  ;;  %v3322_v21 = vrot.slane %v2614_v38, %v5130_v6  ;;  %v4174_v11 = vpop.eup %4173  ;;  %v2489_v36 = vmul.f32 0.5, %v4172_v58  ;;  %v2555_v2 = vadd.f32 0.5, %v2427_v7  ;;  %v2241_v33 = vmul.f32 0.5, %v2113_v49 }
 0x24e   : > { %4179 = vtanh.f32 %v2170_v24  ;;  %v3021_v50 = vrot.slane %v2553_v32, %v5087_v60  ;;  %v2490_v4 = vmul.f32 0.5, %v4174_v11  ;;  %v2044_v61 = vadd.f32 %v5050_v15, %v1835_v13 }
 0x24f   : > { %v3323_v5 = vsel %vm2838_vm10, %v3322_v21, %v3318_v62  ;;  %4181 = vtanh.f32 %v2173_v54  ;;  %v2175_v62 = vmul.f32 0.5, %v2047_v22  ;;  %v2619_v23 = vadd.f32 0.5, %v2491_v53 }
 0x250   : > { %v3328_v57 = vsel %vm2845_vm11, %v3327_v34, %v3323_v5  ;;  %v5784_v9 = vpop.xlane.xlu1 %1976  ;;  %v4176_v44 = vpop.eup %4175  ;;  %4183 = vtanh.f32 %v2237_v45  ;;  %v2617_v38 = vadd.f32 0.5, %v2489_v36  ;;  %v2618_v14 = vadd.f32 0.5, %v2490_v4 }
 0x251   : > { %v1963_v31 = vpop.xlane.xlu0 %1962  ;;  %v2424_v25 = vmul.f32 0.5, %v4176_v44  ;;  %4185 = vtanh.f32 %v2175_v62  ;;  %v2051_v5 = vadd.f32 %v5050_v15, %v1849_v59  ;;  %v2172_v22 = vmul.f32 0.5, %v2044_v61 }
 0x252   : > { %v2108_v3 = vadd.f32 %v5050_v15, %v1963_v31  ;;  %4187 = vtanh.f32 %v2239_v48  ;;  %v3337_v31 = vrot.slane %v2617_v38, %v5087_v60  ;;  %v3347_v44 = vrot.slane %v2619_v23, %v6016_v19 }
 0x253   : > { %v2552_v12 = vadd.f32 0.5, %v2424_v25  ;;  %4189 = vtanh.f32 %v2177_v41  ;;  %v3031_v4 = vrot.slane %v2555_v2, %v6016_v19  ;;  %v2115_v38 = vadd.f32 %v5050_v15, %v5784_v9 }
 0x254   : > { %v1975_v55 = vpop.xlane.xlu1 %1974  ;;  %v4178_v28 = vpop.eup %4177  ;;  %v2236_v8 = vmul.f32 0.5, %v2108_v3  ;;  %4191 = vtanh.f32 %v2241_v33 }
 0x255   : > { %v1839_v27 = vpop.xlane.xlu0 %1838  ;;  %v2488_v0 = vmul.f32 0.5, %v4178_v28  ;;  %v3016_v47 = vrot.slane %v2552_v12, %v6015_v51  ;;  %4193 = vtanh.f32 %v2172_v22  ;;  %v2114_v12 = vadd.f32 %v5050_v15, %v1975_v55 }
 0x256   : > { %v2046_v26 = vadd.f32 %v5050_v15, %v1839_v27  ;;  %4195 = vtanh.f32 %v2236_v8 }
 0x257   : > { %v2616_v21 = vadd.f32 0.5, %v2488_v0  ;;  %v3017_v10 = vsel %vm2852_vm12, %v3016_v47, %v3012_v42  ;;  %v3342_v42 = vrot.slane %v2618_v14, %v5357_v18  ;;  %v2242_v14 = vmul.f32 0.5, %v2114_v12 }
 0x258   : > { %v4180_v24 = vpop.eup %4179  ;;  %v5793_v34 = vpop.xlane.xlu1 %1852  ;;  %v3022_v32 = vsel %vm2859_vm13, %v3021_v50, %v3017_v10  ;;  %v2174_v7 = vmul.f32 0.5, %v2046_v26  ;;  %v2179_v50 = vmul.f32 0.5, %v2051_v5  ;;  %v2243_v5 = vmul.f32 0.5, %v2115_v38 }
 0x259   : > { %v1967_v13 = vpop.xlane.xlu0 %1966  ;;  %v2426_v54 = vmul.f32 0.5, %v4180_v24  ;;  %v3332_v58 = vrot.slane %v2616_v21, %v6015_v51  ;;  %v4182_v62 = vpop.eup %4181 }
 0x25a   : > { %v2110_v45 = vadd.f32 %v5050_v15, %v1967_v13  ;;  %v4184_v27 = vpop.eup %4183  ;;  %4197 = vtanh.f32 %v2174_v7  ;;  %v2429_v2 = vmul.f32 0.5, %v4182_v62 }
 0x25b   : > { %v2554_v11 = vadd.f32 0.5, %v2426_v54  ;;  %v3333_v53 = vsel %vm2852_vm12, %v3332_v58, %v3328_v57  ;;  %v4186_v0 = vpop.eup %4185  ;;  %v2493_v24 = vmul.f32 0.5, %v4184_v27 }
 0x25c   : > { %v1981_v59 = vpop.xlane.xlu1 %1980  ;;  %v3338_v36 = vsel %vm2859_vm13, %v3337_v31, %v3333_v53  ;;  %v2238_v49 = vmul.f32 0.5, %v2110_v45  ;;  %v4188_v47 = vpop.eup %4187  ;;  %v5822_v54 = vadd.f32 0.5, %v2429_v2  ;;  %v2431_v58 = vmul.f32 0.5, %v4186_v0 }
 0x25d   : > { %v1843_v39 = vpop.xlane.xlu0 %1842  ;;  %v3026_v25 = vrot.slane %v2554_v11, %v5357_v18  ;;  %v3343_v48 = vsel %vm2866_vm14, %v3342_v42, %v3338_v36  ;;  %v4190_v21 = vpop.eup %4189  ;;  %v5825_v8 = vadd.f32 0.5, %v2493_v24  ;;  %v2495_v31 = vmul.f32 0.5, %v4188_v47 }
 0x25e   : > { %v5809_v28 = vsel %vm2873_vm15, %v3347_v44, %v3343_v48  ;;  %4199 = vtanh.f32 %v2238_v49  ;;  %v2048_v26 = vadd.f32 %v5050_v15, %v1843_v39  ;;  %v4192_v22 = vpop.eup %4191  ;;  %v2433_v11 = vmul.f32 0.5, %v4190_v21 }
 0x25f   : > { %v3027_v57 = vsel %vm2866_vm14, %v3026_v25, %v3022_v32  ;;  %4201 = vtanh.f32 %v2179_v50  ;;  %v4194_v32 = vpop.eup %4193  ;;  %v2053_v45 = vadd.f32 %v5050_v15, %v5793_v34  ;;  %v3040_v36 = vrot.slane %v5822_v54, %v4943_v16 }
 0x260   : > { %v3032_v61 = vsel %vm2873_vm15, %v3031_v4, %v3027_v57  ;;  %v1979_v23 = vpop.xlane.xlu1 %1978  ;;  %v2176_v33 = vmul.f32 0.5, %v2048_v26  ;;  %v4196_v7 = vpop.eup %4195  ;;  %v5833_v4 = vadd.f32 0.5, %v2431_v58  ;;  %v2497_v48 = vmul.f32 0.5, %v4192_v22 }
 0x261   : > { %v1971_v41 = vpop.xlane.xlu0 %1970  ;;  %v5816_v3 = vsel %vm3430_vm0, %v3032_v61, %v5703_v20  ;;  %v2116_v44 = vadd.f32 %v5050_v15, %v1979_v23  ;;  %v2117_v49 = vadd.f32 %v5050_v15, %v1981_v59  ;;  %v3356_v27 = vrot.slane %v5825_v8, %v4943_v16 }
 0x262   : > { %v2112_v55 = vadd.f32 %v5050_v15, %v1971_v41  ;;  %4203 = vtanh.f32 %v2176_v33  ;;  %v5838_v57 = vadd.f32 0.5, %v2495_v31  ;;  %v2428_v12 = vmul.f32 0.5, %v4194_v32 }
 0x263   : > { %4205 = vtanh.f32 %v2242_v14  ;;  %v5840_v23 = vadd.f32 0.5, %v2433_v11  ;;  %v2492_v41 = vmul.f32 0.5, %v4196_v7  ;;  %v2181_v0 = vmul.f32 0.5, %v2053_v45 }
 0x264   : > { %v1857_v13 = vpop.xlane.xlu1 %1856  ;;  %v2240_v20 = vmul.f32 0.5, %v2112_v55  ;;  %v4198_v62 = vpop.eup %4197  ;;  %v2244_v2 = vmul.f32 0.5, %v2116_v44  ;;  %v3050_v14 = vrot.slane %v5833_v4, %v4954_v46  ;;  %v5846_v21 = vadd.f32 0.5, %v2497_v48 }
 0x265   : > { %v1847_v10 = vpop.xlane.xlu0 %1846  ;;  %v2430_v26 = vmul.f32 0.5, %v4198_v62  ;;  %v2620_v32 = vadd.f32 0.5, %v2492_v41  ;;  %v2055_v31 = vadd.f32 %v5050_v15, %v1857_v13 }
 0x266   : > { %v2050_v9 = vadd.f32 %v5050_v15, %v1847_v10  ;;  %4207 = vtanh.f32 %v2240_v20  ;;  %v2245_v10 = vmul.f32 0.5, %v2117_v49  ;;  %v2556_v20 = vadd.f32 0.5, %v2428_v12 }
 0x267   : > { %4209 = vtanh.f32 %v2243_v5  ;;  %v3366_v5 = vrot.slane %v5838_v57, %v4954_v46  ;;  %v2558_v44 = vadd.f32 0.5, %v2430_v26  ;;  %v3352_v41 = vrot.slane %v2620_v32, %v4947_v43 }
 0x268   : > { %v2178_v42 = vmul.f32 0.5, %v2050_v9  ;;  %v1985_v53 = vpop.xlane.xlu1 %1984  ;;  %v4200_v50 = vpop.eup %4199  ;;  %v3060_v9 = vrot.slane %v5840_v23, %v4964_v40 }
 0x269   : > { %v1851_v39 = vpop.xlane.xlu0 %1850  ;;  %v4202_v34 = vpop.eup %4201  ;;  %v2494_v55 = vmul.f32 0.5, %v4200_v50  ;;  %v2119_v48 = vadd.f32 %v5050_v15, %v1985_v53 }
 0x26a   : > { %v2052_v25 = vadd.f32 %v5050_v15, %v1851_v39  ;;  %4211 = vtanh.f32 %v2178_v42  ;;  %v2435_v33 = vmul.f32 0.5, %v4202_v34  ;;  %v3036_v34 = vrot.slane %v2556_v20, %v4947_v43 }
 0x26b   : > { %v2622_v42 = vadd.f32 0.5, %v2494_v55  ;;  %v3045_v55 = vrot.slane %v2558_v44, %v4961_v35 }
 0x26c   : > { %v2180_v61 = vmul.f32 0.5, %v2052_v25  ;;  %v1983_v38 = vpop.xlane.xlu1 %1982  ;;  %v4204_v58 = vpop.eup %4203  ;;  %v3376_v25 = vrot.slane %v5846_v21, %v4964_v40  ;;  %v5855_v50 = vadd.f32 0.5, %v2435_v33  ;;  %v2247_v33 = vmul.f32 0.5, %v2119_v48 }
 0x26d   : > { %v1855_v47 = vpop.xlane.xlu0 %1854  ;;  %v2118_v59 = vadd.f32 %v5050_v15, %v1983_v38  ;;  %v4206_v45 = vpop.eup %4205  ;;  %v2432_v13 = vmul.f32 0.5, %v4204_v58  ;;  %v3041_v43 = vsel %vm2775_vm1, %v3040_v36, %v3036_v34 }
 0x26e   : > { %v2054_v24 = vadd.f32 %v5050_v15, %v1855_v47  ;;  %4213 = vtanh.f32 %v2180_v61 }
 0x26f   : > { %4215 = vtanh.f32 %v2181_v0  ;;  %v2246_v39 = vmul.f32 0.5, %v2118_v59  ;;  %v2498_v0 = vmul.f32 0.5, %v4206_v45  ;;  %v3361_v59 = vrot.slane %v2622_v42, %v4961_v35 }
 0x270   : > { %v2182_v22 = vmul.f32 0.5, %v2054_v24  ;;  %v1861_v11 = vpop.xlane.xlu1 %1860  ;;  %4217 = vtanh.f32 %v2244_v2  ;;  %v4208_v62 = vpop.eup %4207  ;;  %v2183_v2 = vmul.f32 0.5, %v2055_v31  ;;  %v3357_v35 = vsel %vm2775_vm1, %v3356_v27, %v3352_v41 }
 0x271   : > { %v1989_v7 = vpop.xlane.xlu0 %1988  ;;  %4219 = vtanh.f32 %v2245_v10  ;;  %v4210_v49 = vpop.eup %4209  ;;  %v2496_v12 = vmul.f32 0.5, %v4208_v62  ;;  %v2057_v38 = vadd.f32 %v5050_v15, %v1861_v11  ;;  %v2626_v31 = vadd.f32 0.5, %v2498_v0 }
 0x272   : > { %4221 = vtanh.f32 %v2182_v22  ;;  %v2499_v24 = vmul.f32 0.5, %v4210_v49  ;;  %v2121_v10 = vadd.f32 %v5050_v15, %v1989_v7  ;;  %v2560_v22 = vadd.f32 0.5, %v2432_v13 }
 0x273   : > { %v2624_v53 = vadd.f32 0.5, %v2496_v12  ;;  %4223 = vtanh.f32 %v2246_v39  ;;  %v2185_v11 = vmul.f32 0.5, %v2057_v38  ;;  %v3046_v42 = vsel %vm2782_vm2, %v3045_v55, %v3041_v43 }
 0x274   : > { %v4212_v61 = vpop.eup %4211  ;;  %v1987_v47 = vpop.xlane.xlu1 %1986  ;;  %4225 = vtanh.f32 %v2183_v2  ;;  %v3362_v54 = vsel %vm2782_vm2, %v3361_v59, %v3357_v35  ;;  %v2249_v48 = vmul.f32 0.5, %v2121_v10  ;;  %v2627_v27 = vadd.f32 0.5, %v2499_v24 }
 0x275   : > { %v1859_v26 = vpop.xlane.xlu0 %1858  ;;  %v2120_v20 = vadd.f32 %v5050_v15, %v1987_v47  ;;  %v2434_v58 = vmul.f32 0.5, %v4212_v61  ;;  %v3371_v36 = vrot.slane %v2624_v53, %v4980_v1  ;;  %4227 = vtanh.f32 %v2247_v33 }
 0x276   : > { %v2056_v32 = vadd.f32 %v5050_v15, %v1859_v26  ;;  %v3055_v34 = vrot.slane %v2560_v22, %v4980_v1  ;;  %v3381_v61 = vrot.slane %v2626_v31, %v5003_v30  ;;  %v3367_v41 = vsel %vm2789_vm3, %v3366_v5, %v3362_v54 }
 0x277   : > { %v2248_v39 = vmul.f32 0.5, %v2120_v20  ;;  %v2562_v13 = vadd.f32 0.5, %v2434_v58  ;;  %v3051_v1 = vsel %vm2789_vm3, %v3050_v14, %v3046_v42  ;;  %v3372_v55 = vsel %vm2796_vm4, %v3371_v36, %v3367_v41 }
 0x278   : > { %v1865_v7 = vpop.xlane.xlu1 %1864  ;;  %v4214_v44 = vpop.eup %4213  ;;  %v2184_v49 = vmul.f32 0.5, %v2056_v32  ;;  %v3056_v24 = vsel %vm2796_vm4, %v3055_v34, %v3051_v1  ;;  %v3377_v46 = vsel %vm2803_vm5, %v3376_v25, %v3372_v55  ;;  %v3386_v31 = vrot.slane %v2627_v27, %v5000_v52 }
 0x279   : > { %v1863_v45 = vpop.xlane.xlu0 %1862  ;;  %v4216_v62 = vpop.eup %4215  ;;  %v2059_v16 = vadd.f32 %v5050_v15, %v1865_v7  ;;  %4229 = vtanh.f32 %v2248_v39  ;;  %v2436_v0 = vmul.f32 0.5, %v4214_v44  ;;  %v3065_v33 = vrot.slane %v2562_v13, %v5003_v30 }
 0x27a   : > { %v4218_v8 = vpop.eup %4217  ;;  %4231 = vtanh.f32 %v2185_v11  ;;  %v2437_v26 = vmul.f32 0.5, %v4216_v62  ;;  %v2058_v57 = vadd.f32 %v5050_v15, %v1863_v45  ;;  %v3070_v30 = vrot.slane %v5855_v50, %v5000_v52 }
 0x27b   : > { %v4220_v12 = vpop.eup %4219  ;;  %4233 = vtanh.f32 %v2184_v49  ;;  %v2500_v59 = vmul.f32 0.5, %v4218_v8  ;;  %v2187_v53 = vmul.f32 0.5, %v2059_v16  ;;  %v2564_v4 = vadd.f32 0.5, %v2436_v0 }
 0x27c   : > { %v1993_v2 = vpop.xlane.xlu1 %1992  ;;  %v4222_v47 = vpop.eup %4221  ;;  %4235 = vtanh.f32 %v2249_v48  ;;  %v2501_v43 = vmul.f32 0.5, %v4220_v12  ;;  %v2186_v22 = vmul.f32 0.5, %v2058_v57  ;;  %v3382_v7 = vsel %vm2810_vm6, %v3381_v61, %v3377_v46 }
 0x27d   : > { %v1991_v38 = vpop.xlane.xlu0 %1990  ;;  %v4224_v5 = vpop.eup %4223  ;;  %v2123_v10 = vadd.f32 %v5050_v15, %v1993_v2  ;;  %v2438_v14 = vmul.f32 0.5, %v4222_v47  ;;  %4237 = vtanh.f32 %v2187_v53  ;;  %v3061_v21 = vsel %vm2803_vm5, %v3060_v9, %v3056_v24 }
 0x27e   : > { %v2122_v20 = vadd.f32 %v5050_v15, %v1991_v38  ;;  %v4226_v35 = vpop.eup %4225  ;;  %v2502_v11 = vmul.f32 0.5, %v4224_v5  ;;  %v2628_v15 = vadd.f32 0.5, %v2500_v59  ;;  %4239 = vtanh.f32 %v2186_v22 }
 0x27f   : > { %v2251_v58 = vmul.f32 0.5, %v2123_v10  ;;  %v4228_v25 = vpop.eup %4227  ;;  %v3066_v45 = vsel %vm2810_vm6, %v3065_v33, %v3061_v21  ;;  %v3075_v44 = vrot.slane %v2564_v4, %v5057_v63  ;;  %v2566_v42 = vadd.f32 0.5, %v2438_v14 }
 0x280   : > { %v2250_v32 = vmul.f32 0.5, %v2122_v20  ;;  %v2565_v54 = vadd.f32 0.5, %v2437_v26  ;;  %v2629_v52 = vadd.f32 0.5, %v2501_v43  ;;  %v2439_v36 = vmul.f32 0.5, %v4226_v35 }
 0x281   : > { %4241 = vtanh.f32 %v2251_v58  ;;  %v2630_v62 = vadd.f32 0.5, %v2502_v11  ;;  %v2503_v40 = vmul.f32 0.5, %v4228_v25  ;;  %v3071_v23 = vsel %vm2817_vm7, %v3070_v30, %v3066_v45 }
 0x282   : > { %4243 = vtanh.f32 %v2250_v32  ;;  %v3387_v9 = vsel %vm2817_vm7, %v3386_v31, %v3382_v7  ;;  %v3391_v8 = vrot.slane %v2628_v15, %v5057_v63  ;;  %v3076_v27 = vsel %vm2824_vm8, %v3075_v44, %v3071_v23 }
 0x283   : > { %v4230_v50 = vpop.eup %4229  ;;  %v3085_v34 = vrot.slane %v2566_v42, %v5130_v6  ;;  %v3080_v12 = vrot.slane %v2565_v54, %v5023_v29  ;;  %v3396_v61 = vrot.slane %v2629_v52, %v5023_v29  ;;  %v2567_v41 = vadd.f32 0.5, %v2439_v36 }
 0x284   : > { %v4232_v39 = vpop.eup %4231  ;;  %v2504_v48 = vmul.f32 0.5, %v4230_v50  ;;  %v3392_v38 = vsel %vm2824_vm8, %v3391_v8, %v3387_v9  ;;  %v3401_v47 = vrot.slane %v2630_v62, %v5130_v6  ;;  %v2631_v63 = vadd.f32 0.5, %v2503_v40 }
 0x285   : > { %v4234_v49 = vpop.eup %4233  ;;  %v2441_v0 = vmul.f32 0.5, %v4232_v39  ;;  %v3081_v55 = vsel %vm2831_vm9, %v3080_v12, %v3076_v27  ;;  %v3090_v24 = vrot.slane %v2567_v41, %v5047_v37  ;;  %v3397_v33 = vsel %vm2831_vm9, %v3396_v61, %v3392_v38 }
 0x286   : > { %v4236_v16 = vpop.eup %4235  ;;  %v2440_v13 = vmul.f32 0.5, %v4234_v49  ;;  %v2632_v26 = vadd.f32 0.5, %v2504_v48  ;;  %v3086_v57 = vsel %vm2838_vm10, %v3085_v34, %v3081_v55  ;;  %v3402_v46 = vsel %vm2838_vm10, %v3401_v47, %v3397_v33 }
 0x287   : > { %v4238_v2 = vpop.eup %4237  ;;  %v2505_v59 = vmul.f32 0.5, %v4236_v16  ;;  %v2569_v10 = vadd.f32 0.5, %v2441_v0  ;;  %v3406_v22 = vrot.slane %v2631_v63, %v5047_v37  ;;  %v3091_v32 = vsel %vm2845_vm11, %v3090_v24, %v3086_v57 }
 0x288   : > { %v2568_v1 = vadd.f32 0.5, %v2440_v13  ;;  %v2443_v53 = vmul.f32 0.5, %v4238_v2  ;;  %v4240_v29 = vpop.eup %4239  ;;  %v3411_v4 = vrot.slane %v2632_v26, %v6015_v51  ;;  %vm3432_vm1 = vcmask 1043459  }
 0x289   : > { %v2442_v14 = vmul.f32 0.5, %v4240_v29  ;;  %v2633_v58 = vadd.f32 0.5, %v2505_v59  ;;  %v3100_v15 = vrot.slane %v2569_v10, %v5087_v60  ;;  %v3407_v7 = vsel %vm2845_vm11, %v3406_v22, %v3402_v46 }
 0x28a   : > { %v3095_v5 = vrot.slane %v2568_v1, %v6015_v51  ;;  %v2571_v20 = vadd.f32 0.5, %v2443_v53  ;;  %v3412_v51 = vsel %vm2852_vm12, %v3411_v4, %v3407_v7  ;;  %vm3434_vm2 = vcmask 1044484  }
 0x28b   : > { %v4242_v6 = vpop.eup %4241  ;;  %v2570_v31 = vadd.f32 0.5, %v2442_v14  ;;  %v3416_v44 = vrot.slane %v2633_v58, %v5087_v60  ;;  %vm3436_vm3 = vcmask 1045509   ;;  %vm3438_vm4 = vcmask 1046534  }
 0x28c   : > { %v4244_v43 = vpop.eup %4243  ;;  %v2507_v35 = vmul.f32 0.5, %v4242_v6  ;;  %v3096_v30 = vsel %vm2852_vm12, %v3095_v5, %v3091_v32  ;;  %v3110_v21 = vrot.slane %v2571_v20, %v6016_v19  ;;  %vm3440_vm5 = vcmask 1047559  }
 0x28d   : > { %v2506_v11 = vmul.f32 0.5, %v4244_v43  ;;  %v3105_v37 = vrot.slane %v2570_v31, %v5357_v18  ;;  %v3101_v42 = vsel %vm2859_vm13, %v3100_v15, %v3096_v30  ;;  %v3417_v39 = vsel %vm2859_vm13, %v3416_v44, %v3412_v51 }
 0x28e   : > { %v2635_v25 = vadd.f32 0.5, %v2507_v35 }
 0x28f   : > { %v2634_v45 = vadd.f32 0.5, %v2506_v11  ;;  %v3106_v54 = vsel %vm2866_vm14, %v3105_v37, %v3101_v42 }
 0x290   : > { %v3426_v50 = vrot.slane %v2635_v25, %v6016_v19  ;;  %v3111_v36 = vsel %vm2873_vm15, %v3110_v21, %v3106_v54 }
 0x291   : > { %v3421_v52 = vrot.slane %v2634_v45, %v5357_v18  ;;  %v3433_v62 = vsel %vm3432_vm1, %v3111_v36, %v5816_v3 }
 0x292   : > { %v3435_v48 = vsel %vm3434_vm2, %v5544_v17, %v3433_v62 }
 0x293   : > { %v3422_v60 = vsel %vm2866_vm14, %v3421_v52, %v3417_v39  ;;  %v3437_v18 = vsel %vm3436_vm3, %v5693_v56, %v3435_v48 }
 0x294   : > { %v3427_v19 = vsel %vm2873_vm15, %v3426_v50, %v3422_v60  ;;  %v3439_v49 = vsel %vm3438_vm4, %v5809_v28, %v3437_v18 }
 0x295   : > { %v3441_v40 = vsel %vm3440_vm5, %v3427_v19, %v3439_v49 }
 0x296   : > { %3443 = vst [vmem:[%s245_s24] sm:$0xff] %v3441_v40 }
 0x297 PF: > { %s16_s20 = sadd.s32 1, %s4254_s20  }
 0x298   : > { %p13_p5 = scmp.ge.s32.totalorder %s16_s20, 5  }
 0x29a   :  { %15 = sbr.rel (!%p13_p5) target bundleno = 2 (0x2), region = 70 }

</bundles_post_ra>
